<compile_context>
chip_gen: v5e
topology: v5e:2x2
jax: 0.10.0
libtpu: 0.0.40
codegen_flags: <defaults>
</compile_context>

<pallas_src>
import functools
import math

import jax
import jax.numpy as jnp
import numpy as np
from jax import lax
from jax.experimental import pallas as pl
from jax.experimental.pallas import tpu as pltpu


def _layer_norm(x, w, b, eps=1e-5):
    mu = jnp.mean(x, axis=-1, keepdims=True)
    var = jnp.mean((x - mu) ** 2, axis=-1, keepdims=True)
    return (x - mu) * lax.rsqrt(var + eps) * w + b


def _matmul(a, b):
    return jnp.dot(a, b, preferred_element_type=jnp.float32)


def _matmul_t(a, w):
    # a @ w.T with the contraction folded into dot_general (no transpose op).
    return lax.dot_general(a, w, (((1,), (1,)), ((), ())),
                           preferred_element_type=jnp.float32)


def _temporal_encoder_kernel(
    x_ref,                       # (B_blk, S, E)   batch block, preamble applied
    place_ref,                   # (B_blk, R, S)   batch-row placement (constant)
    bias_ref,                    # (HR, HR)        block-diag (head,batch) causal mask
    rep_ref,                     # (HR, R)         per-head row replication (constant)
    hmask_ref,                   # (HR, E)         head-lane indicator (constant)
    coll_ref,                    # (R, HR)         collapse head row-blocks (constant)
    sel_ref,                     # (B_blk, R)      pick each element's cls row (constant)
    wq_ref, bq_ref,              # (L, E, E), (L, 1, E)   wq/bq pre-scaled by 1/sqrt(hd)
    wk_ref, bk_ref,              # (L, E, E), (L, 1, E)
    wv_ref, bv_ref,              # (L, E, E), (L, 1, E)
    wo_ref, bo_ref,              # (L, E, E), (L, 1, E)
    n1w_ref, n1b_ref,            # (L, 1, E)
    n2w_ref, n2b_ref,            # (L, 1, E)
    w1_ref, b1_ref,              # (L, 4E, E), (L, 1, 4E)
    w2_ref, b2_ref,              # (L, E, 4E), (L, 1, E)
    fnw_ref, fnb_ref,            # (1, E)          final encoder LayerNorm
    o_ref,                       # (1, B_blk, E)   out[-1] for this batch block
):
    B = x_ref.shape[0]
    L = wq_ref.shape[0]

    # Merge the B_blk batch rows into (R, E) = (B_blk*S, E) via constant
    # placement matmuls (avoids a sublane-repacking reshape/concatenate).
    x = _matmul(place_ref[0], x_ref[0])
    for b in range(1, B):
        x = x + _matmul(place_ref[b], x_ref[b])

    def layer(l, x):
        # ---------------- pre-norm self-attention ----------------
        y = _layer_norm(x, n1w_ref[l], n1b_ref[l])                    # (R, E)
        y_rep = _matmul(rep_ref[...], y)                              # (HR, E)
        q = _matmul_t(y_rep, wq_ref[l]) + bq_ref[l]                   # scale pre-folded
        k = (_matmul_t(y_rep, wk_ref[l]) + bk_ref[l]) * hmask_ref[...]
        v = (_matmul_t(y_rep, wv_ref[l]) + bv_ref[l]) * hmask_ref[...]
        # all heads x batch rows at once; off-block entries are -1e30 -> 0 after softmax
        s = _matmul_t(q, k) + bias_ref[...]                           # (HR, HR)
        s = s - jnp.max(s, axis=-1, keepdims=True)
        p = jnp.exp(s)
        # exact reciprocal kept: only one per layer now; holds the 1e-4 tolerance
        p = p * pl.reciprocal(jnp.sum(p, axis=-1, keepdims=True), approx=False)
        o_heads = _matmul(p, v)                                       # (HR, E)
        o_cat = _matmul(coll_ref[...], o_heads)                       # (R, E) head concat
        x = x + _matmul_t(o_cat, wo_ref[l]) + bo_ref[l]               # dropout1 -> id

        # ---------------- pre-norm feed-forward ------------------
        y = _layer_norm(x, n2w_ref[l], n2b_ref[l])
        h1 = jnp.maximum(_matmul_t(y, w1_ref[l]) + b1_ref[l], 0.0)    # ReLU
        return x + _matmul_t(h1, w2_ref[l]) + b2_ref[l]               # dropout/2 -> id

    x = lax.fori_loop(0, L, layer, x)

    # Final encoder LayerNorm only on each element's last (cls) row.
    last = _matmul(sel_ref[...], x)                                   # (B_blk, E)
    o_ref[0] = _layer_norm(last, fnw_ref[...], fnb_ref[...]).astype(o_ref.dtype)


def temporal_encoder_forward(x, padding_mask, params, *, num_heads, batch_block=None):
    """x: (T, N, E) f32 (seq, batch, embed) — same layout as the PyTorch module.
    padding_mask: (N, T) bool.  Returns (N, E) = transformer_encoder(...)[-1]."""
    T, N, E = x.shape
    S = T + 1
    H = num_heads
    hd = E // H
    layers = params["layers"]
    L = len(layers)

    # ---- preamble (tiny, one-shot, plain JAX): padding-token select,
    #      cls-token concat, positional embedding. ----
    xp = jnp.where(padding_mask.T[:, :, None], params["padding_token"], x)  # (T, N, E)
    cls = jnp.broadcast_to(params["cls_token"], (1, N, E))
    xp = jnp.concatenate([xp, cls], axis=0) + params["pos_embed"]           # (S, N, E)
    xb = jnp.transpose(xp, (1, 0, 2)).astype(jnp.float32)                   # (N, S, E)

    # ---- batch blocking: several batch elements per grid step ----
    if batch_block is None:
        batch_block = max(1, min(N, 512 // (H * S)))
        # TODO(synk): on v7x pick batch_block = cdiv(N, 2) so the "parallel"
        # grid axis keeps both TensorCores busy.
    b_blk = int(batch_block)
    n_blocks = -(-N // b_blk)
    Npad = n_blocks * b_blk
    if Npad != N:
        xb = jnp.concatenate([xb, jnp.zeros((Npad - N, S, E), xb.dtype)], axis=0)

    R = b_blk * S          # rows per grid step
    HR = H * R             # head-stacked rows

    # ---- compile-time constant matrices (built once, DMA'd once) ----
    place = np.zeros((b_blk, R, S), np.float32)
    for b in range(b_blk):
        place[b, b * S:(b + 1) * S, :] = np.eye(S, dtype=np.float32)
    eye_r = np.eye(R, dtype=np.float32)
    rep = np.tile(eye_r, (H, 1))                                            # (HR, R)
    coll = np.tile(eye_r, (1, H))                                           # (R, HR)
    rho_h = np.arange(HR) // R
    rho_r = np.arange(HR) % R
    rho_b = rho_r // S
    rho_s = rho_r % S
    ok = ((rho_h[:, None] == rho_h[None, :]) &
          (rho_b[:, None] == rho_b[None, :]) &
          (rho_s[None, :] <= rho_s[:, None]))
    attn_bias = np.where(ok, 0.0, -1e30).astype(np.float32)                 # (HR, HR)
    hmask = (rho_h[:, None] == (np.arange(E) // hd)[None, :]).astype(np.float32)
    sel = np.zeros((b_blk, R), np.float32)
    sel[np.arange(b_blk), np.arange(b_blk) * S + (S - 1)] = 1.0

    consts = [jnp.asarray(a) for a in (place, attn_bias, rep, hmask, coll, sel)]

    # ---- stack per-layer weights along a leading L axis (constant index_map
    # -> DMA'd into VMEM once, resident for the whole grid). ----
    st = lambda name: jnp.stack([p[name] for p in layers])
    scale = 1.0 / math.sqrt(hd)
    in_w = st("in_proj_w")                                   # (L, 3E, E)
    in_b = st("in_proj_b")                                   # (L, 3E)
    wq = in_w[:, 0 * E:1 * E, :] * scale                     # softmax scale folded in
    wk = in_w[:, 1 * E:2 * E, :]
    wv = in_w[:, 2 * E:3 * E, :]
    bq = in_b[:, 0 * E:1 * E].reshape(L, 1, E) * scale
    bk = in_b[:, 1 * E:2 * E].reshape(L, 1, E)
    bv = in_b[:, 2 * E:3 * E].reshape(L, 1, E)
    wo = st("out_proj_w")                                    # (L, E, E)
    bo = st("out_proj_b").reshape(L, 1, E)
    n1w = st("norm1_w").reshape(L, 1, E)
    n1b = st("norm1_b").reshape(L, 1, E)
    n2w = st("norm2_w").reshape(L, 1, E)
    n2b = st("norm2_b").reshape(L, 1, E)
    w1 = st("lin1_w")                                        # (L, 4E, E)
    b1 = st("lin1_b").reshape(L, 1, 4 * E)
    w2 = st("lin2_w")                                        # (L, E, 4E)
    b2 = st("lin2_b").reshape(L, 1, E)
    fnw = params["final_norm_w"].reshape(1, E)
    fnb = params["final_norm_b"].reshape(1, E)

    weights = [wq, bq, wk, bk, wv, bv, wo, bo, n1w, n1b, n2w, n2b,
               w1, b1, w2, b2, fnw, fnb]

    def full_spec(arr):
        nd = arr.ndim
        # Constant index_map: fetched once, resident across the whole grid.
        return pl.BlockSpec(arr.shape, lambda blk: (0,) * nd)

    out = pl.pallas_call(
        _temporal_encoder_kernel,
        grid=(n_blocks,),
        in_specs=[pl.BlockSpec((b_blk, S, E), lambda blk: (blk, 0, 0))]
                 + [full_spec(a) for a in consts]
                 + [full_spec(w) for w in weights],
        out_specs=pl.BlockSpec((1, b_blk, E), lambda blk: (blk, 0, 0)),
        out_shape=jax.ShapeDtypeStruct((n_blocks, b_blk, E), jnp.float32),
        compiler_params=pltpu.CompilerParams(dimension_semantics=("parallel",)),
    )(xb, *consts, *weights)

    return out.reshape(Npad, E)[:N].astype(x.dtype)                         # (N, E)


# ------------------------- pure-JAX reference ---------------------------------
def reference(x, padding_mask, params, *, num_heads):
    T, N, E = x.shape
    H = num_heads
    hd = E // H
    S = T + 1

    def ln(v, w, b, eps=1e-5):
        mu = jnp.mean(v, axis=-1, keepdims=True)
        var = jnp.mean((v - mu) ** 2, axis=-1, keepdims=True)
        return (v - mu) / jnp.sqrt(var + eps) * w + b

    xp = jnp.where(padding_mask.T[:, :, None], params["padding_token"], x)
    cls = jnp.broadcast_to(params["cls_token"], (1, N, E))
    xp = jnp.concatenate([xp, cls], axis=0) + params["pos_embed"]           # (S, N, E)

    causal = jnp.where(jnp.tril(jnp.ones((S, S), bool)), 0.0, -jnp.inf)

    h_ = jnp.transpose(xp, (1, 0, 2))                                       # (N, S, E)
    for p in params["layers"]:
        y = ln(h_, p["norm1_w"], p["norm1_b"])
        qkv = jnp.einsum("nse,fe->nsf", y, p["in_proj_w"]) + p["in_proj_b"]
        q, k, v = jnp.split(qkv, 3, axis=-1)
        q = q.reshape(N, S, H, hd).transpose(0, 2, 1, 3) / math.sqrt(hd)
        k = k.reshape(N, S, H, hd).transpose(0, 2, 1, 3)
        v = v.reshape(N, S, H, hd).transpose(0, 2, 1, 3)
        s = jnp.einsum("nhqd,nhkd->nhqk", q, k) + causal
        a = jax.nn.softmax(s, axis=-1)
        o = jnp.einsum("nhqk,nhkd->nhqd", a, v).transpose(0, 2, 1, 3).reshape(N, S, E)
        o = jnp.einsum("nse,fe->nsf", o, p["out_proj_w"]) + p["out_proj_b"]
        h_ = h_ + o
        y = ln(h_, p["norm2_w"], p["norm2_b"])
        ff = jax.nn.relu(jnp.einsum("nse,fe->nsf", y, p["lin1_w"]) + p["lin1_b"])
        h_ = h_ + jnp.einsum("nsf,ef->nse", ff, p["lin2_w"]) + p["lin2_b"]
    out = ln(h_, params["final_norm_w"], params["final_norm_b"])
    return out[:, -1, :]


def init_params(key, T, E, num_heads, num_layers):
    ks = iter(jax.random.split(key, 3 + 8 * num_layers))
    u = lambda k, shape, s: jax.random.uniform(k, shape, jnp.float32, -s, s)
    xav = lambda k, shape: u(k, shape, math.sqrt(6.0 / (shape[0] + shape[1])))
    layers = []
    for _ in range(num_layers):
        layers.append({
            "in_proj_w": u(next(ks), (3 * E, E), math.sqrt(6.0 / (E + E))),
            "in_proj_b": u(next(ks), (3 * E,), 0.02),
            "out_proj_w": xav(next(ks), (E, E)),
            "out_proj_b": u(next(ks), (E,), 0.02),
            "norm1_w": jnp.ones((E,), jnp.float32),
            "norm1_b": jnp.zeros((E,), jnp.float32),
            "norm2_w": jnp.ones((E,), jnp.float32),
            "norm2_b": jnp.zeros((E,), jnp.float32),
            "lin1_w": xav(next(ks), (4 * E, E)),
            "lin1_b": u(next(ks), (4 * E,), 0.02),
            "lin2_w": xav(next(ks), (E, 4 * E)),
            "lin2_b": u(next(ks), (E,), 0.02),
        })
    return {
        "layers": layers,
        "padding_token": 0.02 * jax.random.normal(next(ks), (T, 1, E), jnp.float32),
        "cls_token": 0.02 * jax.random.normal(next(ks), (1, 1, E), jnp.float32),
        "pos_embed": 0.02 * jax.random.normal(next(ks), (T + 1, 1, E), jnp.float32),
        "final_norm_w": jnp.ones((E,), jnp.float32),
        "final_norm_b": jnp.zeros((E,), jnp.float32),
    }


if __name__ == "__main__":
    T, N, E, H, L = 8, 2, 32, 8, 4   # historical_steps, batch, embed_dim, heads, layers
    key = jax.random.PRNGKey(0)
    kx, km, kp = jax.random.split(key, 3)
    x = jax.random.normal(kx, (T, N, E), jnp.float32)
    padding_mask = jax.random.bernoulli(km, 0.3, (N, T))
    params = init_params(kp, T, E, H, L)

    fwd = jax.jit(functools.partial(temporal_encoder_forward, num_heads=H))
    out = jax.block_until_ready(fwd(x, padding_mask, params))

    ref = reference(x, padding_mask, params, num_heads=H)
    assert out.shape == (N, E)
    err = float(jnp.max(jnp.abs(out - ref)))
    assert jnp.allclose(out, ref, atol=1e-4, rtol=1e-4), err
    print("KERNEL_OK")
</pallas_src>

<mosaic_0001>
module attributes {stable_mosaic.version = 11 : i64} {
  func.func @_temporal_encoder_kernel(%arg0: i32, %arg1: memref<2x9x32xf32, #tpu.memory_space<vmem>>, %arg2: memref<2x18x9xf32, #tpu.memory_space<vmem>>, %arg3: memref<144x144xf32, #tpu.memory_space<vmem>>, %arg4: memref<144x18xf32, #tpu.memory_space<vmem>>, %arg5: memref<144x32xf32, #tpu.memory_space<vmem>>, %arg6: memref<18x144xf32, #tpu.memory_space<vmem>>, %arg7: memref<2x18xf32, #tpu.memory_space<vmem>>, %arg8: memref<4x32x32xf32, #tpu.memory_space<vmem>>, %arg9: memref<4x1x32xf32, #tpu.memory_space<vmem>>, %arg10: memref<4x32x32xf32, #tpu.memory_space<vmem>>, %arg11: memref<4x1x32xf32, #tpu.memory_space<vmem>>, %arg12: memref<4x32x32xf32, #tpu.memory_space<vmem>>, %arg13: memref<4x1x32xf32, #tpu.memory_space<vmem>>, %arg14: memref<4x32x32xf32, #tpu.memory_space<vmem>>, %arg15: memref<4x1x32xf32, #tpu.memory_space<vmem>>, %arg16: memref<4x1x32xf32, #tpu.memory_space<vmem>>, %arg17: memref<4x1x32xf32, #tpu.memory_space<vmem>>, %arg18: memref<4x1x32xf32, #tpu.memory_space<vmem>>, %arg19: memref<4x1x32xf32, #tpu.memory_space<vmem>>, %arg20: memref<4x128x32xf32, #tpu.memory_space<vmem>>, %arg21: memref<4x1x128xf32, #tpu.memory_space<vmem>>, %arg22: memref<4x32x128xf32, #tpu.memory_space<vmem>>, %arg23: memref<4x1x32xf32, #tpu.memory_space<vmem>>, %arg24: memref<1x32xf32, #tpu.memory_space<vmem>>, %arg25: memref<1x32xf32, #tpu.memory_space<vmem>>, %arg26: memref<1x2x32xf32, #tpu.memory_space<vmem>>) attributes {dimension_semantics = [#tpu.dimension_semantics<parallel>], iteration_bounds = array<i64: 1>, scalar_prefetch = 0 : i64, scratch_operands = 0 : i64, tpu.core_type = #tpu.core_type<tc>, window_params = [{transform_indices = @transform_0, window_bounds = array<i64: 2, 9, 32>}, {pipeline_mode = #tpu.pipeline_mode<synchronous>, transform_indices = @transform_1, window_bounds = array<i64: 2, 18, 9>}, {pipeline_mode = #tpu.pipeline_mode<synchronous>, transform_indices = @transform_2, window_bounds = array<i64: 144, 144>}, {pipeline_mode = #tpu.pipeline_mode<synchronous>, transform_indices = @transform_3, window_bounds = array<i64: 144, 18>}, {pipeline_mode = #tpu.pipeline_mode<synchronous>, transform_indices = @transform_4, window_bounds = array<i64: 144, 32>}, {pipeline_mode = #tpu.pipeline_mode<synchronous>, transform_indices = @transform_5, window_bounds = array<i64: 18, 144>}, {pipeline_mode = #tpu.pipeline_mode<synchronous>, transform_indices = @transform_6, window_bounds = array<i64: 2, 18>}, {pipeline_mode = #tpu.pipeline_mode<synchronous>, transform_indices = @transform_7, window_bounds = array<i64: 4, 32, 32>}, {pipeline_mode = #tpu.pipeline_mode<synchronous>, transform_indices = @transform_8, window_bounds = array<i64: 4, 1, 32>}, {pipeline_mode = #tpu.pipeline_mode<synchronous>, transform_indices = @transform_9, window_bounds = array<i64: 4, 32, 32>}, {pipeline_mode = #tpu.pipeline_mode<synchronous>, transform_indices = @transform_10, window_bounds = array<i64: 4, 1, 32>}, {pipeline_mode = #tpu.pipeline_mode<synchronous>, transform_indices = @transform_11, window_bounds = array<i64: 4, 32, 32>}, {pipeline_mode = #tpu.pipeline_mode<synchronous>, transform_indices = @transform_12, window_bounds = array<i64: 4, 1, 32>}, {pipeline_mode = #tpu.pipeline_mode<synchronous>, transform_indices = @transform_13, window_bounds = array<i64: 4, 32, 32>}, {pipeline_mode = #tpu.pipeline_mode<synchronous>, transform_indices = @transform_14, window_bounds = array<i64: 4, 1, 32>}, {pipeline_mode = #tpu.pipeline_mode<synchronous>, transform_indices = @transform_15, window_bounds = array<i64: 4, 1, 32>}, {pipeline_mode = #tpu.pipeline_mode<synchronous>, transform_indices = @transform_16, window_bounds = array<i64: 4, 1, 32>}, {pipeline_mode = #tpu.pipeline_mode<synchronous>, transform_indices = @transform_17, window_bounds = array<i64: 4, 1, 32>}, {pipeline_mode = #tpu.pipeline_mode<synchronous>, transform_indices = @transform_18, window_bounds = array<i64: 4, 1, 32>}, {pipeline_mode = #tpu.pipeline_mode<synchronous>, transform_indices = @transform_19, window_bounds = array<i64: 4, 128, 32>}, {pipeline_mode = #tpu.pipeline_mode<synchronous>, transform_indices = @transform_20, window_bounds = array<i64: 4, 1, 128>}, {pipeline_mode = #tpu.pipeline_mode<synchronous>, transform_indices = @transform_21, window_bounds = array<i64: 4, 32, 128>}, {pipeline_mode = #tpu.pipeline_mode<synchronous>, transform_indices = @transform_22, window_bounds = array<i64: 4, 1, 32>}, {pipeline_mode = #tpu.pipeline_mode<synchronous>, transform_indices = @transform_23, window_bounds = array<i64: 1, 32>}, {pipeline_mode = #tpu.pipeline_mode<synchronous>, transform_indices = @transform_24, window_bounds = array<i64: 1, 32>}, {transform_indices = @transform_25, window_bounds = array<i64: 1, 2, 32>}]} {
    %c0 = arith.constant 0 : index
    %c0_0 = arith.constant 0 : index
    %c0_1 = arith.constant 0 : index
    %0 = vector.load %arg2[%c0, %c0_0, %c0_1] : memref<2x18x9xf32, #tpu.memory_space<vmem>>, vector<1x18x9xf32>
    %1 = vector.shape_cast %0 : vector<1x18x9xf32> to vector<18x9xf32>
    %c0_2 = arith.constant 0 : index
    %c0_3 = arith.constant 0 : index
    %c0_4 = arith.constant 0 : index
    %2 = vector.load %arg1[%c0_2, %c0_3, %c0_4] : memref<2x9x32xf32, #tpu.memory_space<vmem>>, vector<1x9x32xf32>
    %3 = vector.shape_cast %2 : vector<1x9x32xf32> to vector<9x32xf32>
    %cst = arith.constant dense<0.000000e+00> : vector<18x32xf32>
    %4 = tpu.matmul %1, %3, %cst {dimension_numbers = #tpu.dot_dimension_numbers<[1], [0], [0], [1], [0, 0, 1, 1], [], []>} : vector<18x9xf32>, vector<9x32xf32>, vector<18x32xf32> -> vector<18x32xf32>
    %c1 = arith.constant 1 : index
    %c0_5 = arith.constant 0 : index
    %c0_6 = arith.constant 0 : index
    %5 = vector.load %arg2[%c1, %c0_5, %c0_6] : memref<2x18x9xf32, #tpu.memory_space<vmem>>, vector<1x18x9xf32>
    %6 = vector.shape_cast %5 : vector<1x18x9xf32> to vector<18x9xf32>
    %c1_7 = arith.constant 1 : index
    %c0_8 = arith.constant 0 : index
    %c0_9 = arith.constant 0 : index
    %7 = vector.load %arg1[%c1_7, %c0_8, %c0_9] : memref<2x9x32xf32, #tpu.memory_space<vmem>>, vector<1x9x32xf32>
    %8 = vector.shape_cast %7 : vector<1x9x32xf32> to vector<9x32xf32>
    %cst_10 = arith.constant dense<0.000000e+00> : vector<18x32xf32>
    %9 = tpu.matmul %6, %8, %cst_10 {dimension_numbers = #tpu.dot_dimension_numbers<[1], [0], [0], [1], [0, 0, 1, 1], [], []>} : vector<18x9xf32>, vector<9x32xf32>, vector<18x32xf32> -> vector<18x32xf32>
    %10 = arith.addf %4, %9 : vector<18x32xf32>
    %c0_i32 = arith.constant 0 : i32
    %c4_i32 = arith.constant 4 : i32
    %11 = arith.addi %c0_i32, %c4_i32 : i32
    %c1_i32 = arith.constant 1 : i32
    %12 = scf.for %arg27 = %c0_i32 to %11 step %c1_i32 iter_args(%arg28 = %10) -> (vector<18x32xf32>)  : i32 {
      %42 = arith.index_cast %arg27 : i32 to index
      %c0_27 = arith.constant 0 : index
      %c0_28 = arith.constant 0 : index
      %43 = vector.load %arg16[%42, %c0_27, %c0_28] : memref<4x1x32xf32, #tpu.memory_space<vmem>>, vector<1x1x32xf32>
      %44 = vector.shape_cast %43 : vector<1x1x32xf32> to vector<1x32xf32>
      %45 = arith.index_cast %arg27 : i32 to index
      %c0_29 = arith.constant 0 : index
      %c0_30 = arith.constant 0 : index
      %46 = vector.load %arg17[%45, %c0_29, %c0_30] : memref<4x1x32xf32, #tpu.memory_space<vmem>>, vector<1x1x32xf32>
      %47 = vector.shape_cast %46 : vector<1x1x32xf32> to vector<1x32xf32>
      %cst_31 = arith.constant dense<0.000000e+00> : vector<18xf32>
      %48 = vector.multi_reduction <add>, %arg28, %cst_31 [1] : vector<18x32xf32> to vector<18xf32>
      %49 = vector.shape_cast %48 : vector<18xf32> to vector<18x1xf32>
      %cst_32 = arith.constant 3.200000e+01 : f32
      %50 = vector.broadcast %cst_32 : f32 to vector<18x1xf32>
      %51 = arith.divf %49, %50 : vector<18x1xf32>
      %52 = vector.broadcast %51 : vector<18x1xf32> to vector<18x32xf32>
      %53 = arith.subf %arg28, %52 : vector<18x32xf32>
      %54 = arith.mulf %53, %53 : vector<18x32xf32>
      %cst_33 = arith.constant dense<0.000000e+00> : vector<18xf32>
      %55 = vector.multi_reduction <add>, %54, %cst_33 [1] : vector<18x32xf32> to vector<18xf32>
      %56 = vector.shape_cast %55 : vector<18xf32> to vector<18x1xf32>
      %cst_34 = arith.constant 3.200000e+01 : f32
      %57 = vector.broadcast %cst_34 : f32 to vector<18x1xf32>
      %58 = arith.divf %56, %57 : vector<18x1xf32>
      %59 = vector.broadcast %51 : vector<18x1xf32> to vector<18x32xf32>
      %60 = arith.subf %arg28, %59 : vector<18x32xf32>
      %cst_35 = arith.constant 9.99999974E-6 : f32
      %61 = vector.broadcast %cst_35 : f32 to vector<18x1xf32>
      %62 = arith.addf %58, %61 : vector<18x1xf32>
      %63 = math.rsqrt %62 : vector<18x1xf32>
      %64 = vector.broadcast %63 : vector<18x1xf32> to vector<18x32xf32>
      %65 = arith.mulf %60, %64 : vector<18x32xf32>
      %66 = vector.broadcast %44 : vector<1x32xf32> to vector<18x32xf32>
      %67 = arith.mulf %65, %66 : vector<18x32xf32>
      %68 = vector.broadcast %47 : vector<1x32xf32> to vector<18x32xf32>
      %69 = arith.addf %67, %68 : vector<18x32xf32>
      %c0_36 = arith.constant 0 : index
      %c0_37 = arith.constant 0 : index
      %70 = vector.load %arg4[%c0_36, %c0_37] : memref<144x18xf32, #tpu.memory_space<vmem>>, vector<144x18xf32>
      %cst_38 = arith.constant dense<0.000000e+00> : vector<144x32xf32>
      %71 = tpu.matmul %70, %69, %cst_38 {dimension_numbers = #tpu.dot_dimension_numbers<[1], [0], [0], [1], [0, 0, 1, 1], [], []>} : vector<144x18xf32>, vector<18x32xf32>, vector<144x32xf32> -> vector<144x32xf32>
      %72 = arith.index_cast %arg27 : i32 to index
      %c0_39 = arith.constant 0 : index
      %c0_40 = arith.constant 0 : index
      %73 = vector.load %arg8[%72, %c0_39, %c0_40] : memref<4x32x32xf32, #tpu.memory_space<vmem>>, vector<1x32x32xf32>
      %74 = vector.shape_cast %73 : vector<1x32x32xf32> to vector<32x32xf32>
      %cst_41 = arith.constant dense<0.000000e+00> : vector<144x32xf32>
      %75 = tpu.matmul %71, %74, %cst_41 {dimension_numbers = #tpu.dot_dimension_numbers<[1], [1], [0], [0], [0, 0, 1, 0], [], []>} : vector<144x32xf32>, vector<32x32xf32>, vector<144x32xf32> -> vector<144x32xf32>
      %76 = arith.index_cast %arg27 : i32 to index
      %c0_42 = arith.constant 0 : index
      %c0_43 = arith.constant 0 : index
      %77 = vector.load %arg9[%76, %c0_42, %c0_43] : memref<4x1x32xf32, #tpu.memory_space<vmem>>, vector<1x1x32xf32>
      %78 = vector.shape_cast %77 : vector<1x1x32xf32> to vector<1x32xf32>
      %79 = vector.broadcast %78 : vector<1x32xf32> to vector<144x32xf32>
      %80 = arith.addf %75, %79 : vector<144x32xf32>
      %81 = arith.index_cast %arg27 : i32 to index
      %c0_44 = arith.constant 0 : index
      %c0_45 = arith.constant 0 : index
      %82 = vector.load %arg10[%81, %c0_44, %c0_45] : memref<4x32x32xf32, #tpu.memory_space<vmem>>, vector<1x32x32xf32>
      %83 = vector.shape_cast %82 : vector<1x32x32xf32> to vector<32x32xf32>
      %cst_46 = arith.constant dense<0.000000e+00> : vector<144x32xf32>
      %84 = tpu.matmul %71, %83, %cst_46 {dimension_numbers = #tpu.dot_dimension_numbers<[1], [1], [0], [0], [0, 0, 1, 0], [], []>} : vector<144x32xf32>, vector<32x32xf32>, vector<144x32xf32> -> vector<144x32xf32>
      %85 = arith.index_cast %arg27 : i32 to index
      %c0_47 = arith.constant 0 : index
      %c0_48 = arith.constant 0 : index
      %86 = vector.load %arg11[%85, %c0_47, %c0_48] : memref<4x1x32xf32, #tpu.memory_space<vmem>>, vector<1x1x32xf32>
      %87 = vector.shape_cast %86 : vector<1x1x32xf32> to vector<1x32xf32>
      %88 = vector.broadcast %87 : vector<1x32xf32> to vector<144x32xf32>
      %89 = arith.addf %84, %88 : vector<144x32xf32>
      %c0_49 = arith.constant 0 : index
      %c0_50 = arith.constant 0 : index
      %90 = vector.load %arg5[%c0_49, %c0_50] : memref<144x32xf32, #tpu.memory_space<vmem>>, vector<144x32xf32>
      %91 = arith.mulf %89, %90 : vector<144x32xf32>
      %92 = arith.index_cast %arg27 : i32 to index
      %c0_51 = arith.constant 0 : index
      %c0_52 = arith.constant 0 : index
      %93 = vector.load %arg12[%92, %c0_51, %c0_52] : memref<4x32x32xf32, #tpu.memory_space<vmem>>, vector<1x32x32xf32>
      %94 = vector.shape_cast %93 : vector<1x32x32xf32> to vector<32x32xf32>
      %cst_53 = arith.constant dense<0.000000e+00> : vector<144x32xf32>
      %95 = tpu.matmul %71, %94, %cst_53 {dimension_numbers = #tpu.dot_dimension_numbers<[1], [1], [0], [0], [0, 0, 1, 0], [], []>} : vector<144x32xf32>, vector<32x32xf32>, vector<144x32xf32> -> vector<144x32xf32>
      %96 = arith.index_cast %arg27 : i32 to index
      %c0_54 = arith.constant 0 : index
      %c0_55 = arith.constant 0 : index
      %97 = vector.load %arg13[%96, %c0_54, %c0_55] : memref<4x1x32xf32, #tpu.memory_space<vmem>>, vector<1x1x32xf32>
      %98 = vector.shape_cast %97 : vector<1x1x32xf32> to vector<1x32xf32>
      %99 = vector.broadcast %98 : vector<1x32xf32> to vector<144x32xf32>
      %100 = arith.addf %95, %99 : vector<144x32xf32>
      %c0_56 = arith.constant 0 : index
      %c0_57 = arith.constant 0 : index
      %101 = vector.load %arg5[%c0_56, %c0_57] : memref<144x32xf32, #tpu.memory_space<vmem>>, vector<144x32xf32>
      %102 = arith.mulf %100, %101 : vector<144x32xf32>
      %cst_58 = arith.constant dense<0.000000e+00> : vector<144x144xf32>
      %103 = tpu.matmul %80, %91, %cst_58 {dimension_numbers = #tpu.dot_dimension_numbers<[1], [1], [0], [0], [0, 0, 1, 0], [], []>} : vector<144x32xf32>, vector<144x32xf32>, vector<144x144xf32> -> vector<144x144xf32>
      %c0_59 = arith.constant 0 : index
      %c0_60 = arith.constant 0 : index
      %104 = vector.load %arg3[%c0_59, %c0_60] : memref<144x144xf32, #tpu.memory_space<vmem>>, vector<144x144xf32>
      %105 = arith.addf %103, %104 : vector<144x144xf32>
      %cst_61 = arith.constant dense<0xFF800000> : vector<144xf32>
      %106 = vector.multi_reduction <maximumf>, %105, %cst_61 [1] : vector<144x144xf32> to vector<144xf32>
      %107 = vector.shape_cast %106 : vector<144xf32> to vector<144x1xf32>
      %108 = vector.broadcast %107 : vector<144x1xf32> to vector<144x144xf32>
      %109 = arith.subf %105, %108 : vector<144x144xf32>
      %110 = math.exp %109 : vector<144x144xf32>
      %cst_62 = arith.constant dense<0.000000e+00> : vector<144xf32>
      %111 = vector.multi_reduction <add>, %110, %cst_62 [1] : vector<144x144xf32> to vector<144xf32>
      %112 = vector.shape_cast %111 : vector<144xf32> to vector<144x1xf32>
      %113 = tpu.reciprocal %112 : vector<144x1xf32> -> vector<144x1xf32>
      %114 = vector.broadcast %113 : vector<144x1xf32> to vector<144x144xf32>
      %115 = arith.mulf %110, %114 : vector<144x144xf32>
      %cst_63 = arith.constant dense<0.000000e+00> : vector<144x32xf32>
      %116 = tpu.matmul %115, %102, %cst_63 {dimension_numbers = #tpu.dot_dimension_numbers<[1], [0], [0], [1], [0, 0, 1, 1], [], []>} : vector<144x144xf32>, vector<144x32xf32>, vector<144x32xf32> -> vector<144x32xf32>
      %c0_64 = arith.constant 0 : index
      %c0_65 = arith.constant 0 : index
      %117 = vector.load %arg6[%c0_64, %c0_65] : memref<18x144xf32, #tpu.memory_space<vmem>>, vector<18x144xf32>
      %cst_66 = arith.constant dense<0.000000e+00> : vector<18x32xf32>
      %118 = tpu.matmul %117, %116, %cst_66 {dimension_numbers = #tpu.dot_dimension_numbers<[1], [0], [0], [1], [0, 0, 1, 1], [], []>} : vector<18x144xf32>, vector<144x32xf32>, vector<18x32xf32> -> vector<18x32xf32>
      %119 = arith.index_cast %arg27 : i32 to index
      %c0_67 = arith.constant 0 : index
      %c0_68 = arith.constant 0 : index
      %120 = vector.load %arg14[%119, %c0_67, %c0_68] : memref<4x32x32xf32, #tpu.memory_space<vmem>>, vector<1x32x32xf32>
      %121 = vector.shape_cast %120 : vector<1x32x32xf32> to vector<32x32xf32>
      %cst_69 = arith.constant dense<0.000000e+00> : vector<18x32xf32>
      %122 = tpu.matmul %118, %121, %cst_69 {dimension_numbers = #tpu.dot_dimension_numbers<[1], [1], [0], [0], [0, 0, 1, 0], [], []>} : vector<18x32xf32>, vector<32x32xf32>, vector<18x32xf32> -> vector<18x32xf32>
      %123 = arith.addf %arg28, %122 : vector<18x32xf32>
      %124 = arith.index_cast %arg27 : i32 to index
      %c0_70 = arith.constant 0 : index
      %c0_71 = arith.constant 0 : index
      %125 = vector.load %arg15[%124, %c0_70, %c0_71] : memref<4x1x32xf32, #tpu.memory_space<vmem>>, vector<1x1x32xf32>
      %126 = vector.shape_cast %125 : vector<1x1x32xf32> to vector<1x32xf32>
      %127 = vector.broadcast %126 : vector<1x32xf32> to vector<18x32xf32>
      %128 = arith.addf %123, %127 : vector<18x32xf32>
      %129 = arith.index_cast %arg27 : i32 to index
      %c0_72 = arith.constant 0 : index
      %c0_73 = arith.constant 0 : index
      %130 = vector.load %arg18[%129, %c0_72, %c0_73] : memref<4x1x32xf32, #tpu.memory_space<vmem>>, vector<1x1x32xf32>
      %131 = vector.shape_cast %130 : vector<1x1x32xf32> to vector<1x32xf32>
      %132 = arith.index_cast %arg27 : i32 to index
      %c0_74 = arith.constant 0 : index
      %c0_75 = arith.constant 0 : index
      %133 = vector.load %arg19[%132, %c0_74, %c0_75] : memref<4x1x32xf32, #tpu.memory_space<vmem>>, vector<1x1x32xf32>
      %134 = vector.shape_cast %133 : vector<1x1x32xf32> to vector<1x32xf32>
      %cst_76 = arith.constant dense<0.000000e+00> : vector<18xf32>
      %135 = vector.multi_reduction <add>, %128, %cst_76 [1] : vector<18x32xf32> to vector<18xf32>
      %136 = vector.shape_cast %135 : vector<18xf32> to vector<18x1xf32>
      %cst_77 = arith.constant 3.200000e+01 : f32
      %137 = vector.broadcast %cst_77 : f32 to vector<18x1xf32>
      %138 = arith.divf %136, %137 : vector<18x1xf32>
      %139 = vector.broadcast %138 : vector<18x1xf32> to vector<18x32xf32>
      %140 = arith.subf %128, %139 : vector<18x32xf32>
      %141 = arith.mulf %140, %140 : vector<18x32xf32>
      %cst_78 = arith.constant dense<0.000000e+00> : vector<18xf32>
      %142 = vector.multi_reduction <add>, %141, %cst_78 [1] : vector<18x32xf32> to vector<18xf32>
      %143 = vector.shape_cast %142 : vector<18xf32> to vector<18x1xf32>
      %cst_79 = arith.constant 3.200000e+01 : f32
      %144 = vector.broadcast %cst_79 : f32 to vector<18x1xf32>
      %145 = arith.divf %143, %144 : vector<18x1xf32>
      %146 = vector.broadcast %138 : vector<18x1xf32> to vector<18x32xf32>
      %147 = arith.subf %128, %146 : vector<18x32xf32>
      %cst_80 = arith.constant 9.99999974E-6 : f32
      %148 = vector.broadcast %cst_80 : f32 to vector<18x1xf32>
      %149 = arith.addf %145, %148 : vector<18x1xf32>
      %150 = math.rsqrt %149 : vector<18x1xf32>
      %151 = vector.broadcast %150 : vector<18x1xf32> to vector<18x32xf32>
      %152 = arith.mulf %147, %151 : vector<18x32xf32>
      %153 = vector.broadcast %131 : vector<1x32xf32> to vector<18x32xf32>
      %154 = arith.mulf %152, %153 : vector<18x32xf32>
      %155 = vector.broadcast %134 : vector<1x32xf32> to vector<18x32xf32>
      %156 = arith.addf %154, %155 : vector<18x32xf32>
      %157 = arith.index_cast %arg27 : i32 to index
      %c0_81 = arith.constant 0 : index
      %c0_82 = arith.constant 0 : index
      %158 = vector.load %arg20[%157, %c0_81, %c0_82] : memref<4x128x32xf32, #tpu.memory_space<vmem>>, vector<1x128x32xf32>
      %159 = vector.shape_cast %158 : vector<1x128x32xf32> to vector<128x32xf32>
      %cst_83 = arith.constant dense<0.000000e+00> : vector<18x128xf32>
      %160 = tpu.matmul %156, %159, %cst_83 {dimension_numbers = #tpu.dot_dimension_numbers<[1], [1], [0], [0], [0, 0, 1, 0], [], []>} : vector<18x32xf32>, vector<128x32xf32>, vector<18x128xf32> -> vector<18x128xf32>
      %161 = arith.index_cast %arg27 : i32 to index
      %c0_84 = arith.constant 0 : index
      %c0_85 = arith.constant 0 : index
      %162 = vector.load %arg21[%161, %c0_84, %c0_85] : memref<4x1x128xf32, #tpu.memory_space<vmem>>, vector<1x1x128xf32>
      %163 = vector.shape_cast %162 : vector<1x1x128xf32> to vector<1x128xf32>
      %164 = vector.broadcast %163 : vector<1x128xf32> to vector<18x128xf32>
      %165 = arith.addf %160, %164 : vector<18x128xf32>
      %cst_86 = arith.constant 0.000000e+00 : f32
      %166 = vector.broadcast %cst_86 : f32 to vector<18x128xf32>
      %167 = arith.maximumf %165, %166 : vector<18x128xf32>
      %168 = arith.index_cast %arg27 : i32 to index
      %c0_87 = arith.constant 0 : index
      %c0_88 = arith.constant 0 : index
      %169 = vector.load %arg22[%168, %c0_87, %c0_88] : memref<4x32x128xf32, #tpu.memory_space<vmem>>, vector<1x32x128xf32>
      %170 = vector.shape_cast %169 : vector<1x32x128xf32> to vector<32x128xf32>
      %cst_89 = arith.constant dense<0.000000e+00> : vector<18x32xf32>
      %171 = tpu.matmul %167, %170, %cst_89 {dimension_numbers = #tpu.dot_dimension_numbers<[1], [1], [0], [0], [0, 0, 1, 0], [], []>} : vector<18x128xf32>, vector<32x128xf32>, vector<18x32xf32> -> vector<18x32xf32>
      %172 = arith.addf %128, %171 : vector<18x32xf32>
      %173 = arith.index_cast %arg27 : i32 to index
      %c0_90 = arith.constant 0 : index
      %c0_91 = arith.constant 0 : index
      %174 = vector.load %arg23[%173, %c0_90, %c0_91] : memref<4x1x32xf32, #tpu.memory_space<vmem>>, vector<1x1x32xf32>
      %175 = vector.shape_cast %174 : vector<1x1x32xf32> to vector<1x32xf32>
      %176 = vector.broadcast %175 : vector<1x32xf32> to vector<18x32xf32>
      %177 = arith.addf %172, %176 : vector<18x32xf32>
      scf.yield %177 : vector<18x32xf32>
    }
    %c4_i32_11 = arith.constant 4 : i32
    %c0_12 = arith.constant 0 : index
    %c0_13 = arith.constant 0 : index
    %13 = vector.load %arg7[%c0_12, %c0_13] : memref<2x18xf32, #tpu.memory_space<vmem>>, vector<2x18xf32>
    %cst_14 = arith.constant dense<0.000000e+00> : vector<2x32xf32>
    %14 = tpu.matmul %13, %12, %cst_14 {dimension_numbers = #tpu.dot_dimension_numbers<[1], [0], [0], [1], [0, 0, 1, 1], [], []>} : vector<2x18xf32>, vector<18x32xf32>, vector<2x32xf32> -> vector<2x32xf32>
    %c0_15 = arith.constant 0 : index
    %c0_16 = arith.constant 0 : index
    %15 = vector.load %arg24[%c0_15, %c0_16] : memref<1x32xf32, #tpu.memory_space<vmem>>, vector<1x32xf32>
    %c0_17 = arith.constant 0 : index
    %c0_18 = arith.constant 0 : index
    %16 = vector.load %arg25[%c0_17, %c0_18] : memref<1x32xf32, #tpu.memory_space<vmem>>, vector<1x32xf32>
    %cst_19 = arith.constant dense<0.000000e+00> : vector<2xf32>
    %17 = vector.multi_reduction <add>, %14, %cst_19 [1] : vector<2x32xf32> to vector<2xf32>
    %18 = vector.shape_cast %17 : vector<2xf32> to vector<2x1xf32>
    %cst_20 = arith.constant 3.200000e+01 : f32
    %19 = vector.broadcast %cst_20 : f32 to vector<2x1xf32>
    %20 = arith.divf %18, %19 : vector<2x1xf32>
    %21 = vector.broadcast %20 : vector<2x1xf32> to vector<2x32xf32>
    %22 = arith.subf %14, %21 : vector<2x32xf32>
    %23 = arith.mulf %22, %22 : vector<2x32xf32>
    %cst_21 = arith.constant dense<0.000000e+00> : vector<2xf32>
    %24 = vector.multi_reduction <add>, %23, %cst_21 [1] : vector<2x32xf32> to vector<2xf32>
    %25 = vector.shape_cast %24 : vector<2xf32> to vector<2x1xf32>
    %cst_22 = arith.constant 3.200000e+01 : f32
    %26 = vector.broadcast %cst_22 : f32 to vector<2x1xf32>
    %27 = arith.divf %25, %26 : vector<2x1xf32>
    %28 = vector.broadcast %20 : vector<2x1xf32> to vector<2x32xf32>
    %29 = arith.subf %14, %28 : vector<2x32xf32>
    %cst_23 = arith.constant 9.99999974E-6 : f32
    %30 = vector.broadcast %cst_23 : f32 to vector<2x1xf32>
    %31 = arith.addf %27, %30 : vector<2x1xf32>
    %32 = math.rsqrt %31 : vector<2x1xf32>
    %33 = vector.broadcast %32 : vector<2x1xf32> to vector<2x32xf32>
    %34 = arith.mulf %29, %33 : vector<2x32xf32>
    %35 = vector.broadcast %15 : vector<1x32xf32> to vector<2x32xf32>
    %36 = arith.mulf %34, %35 : vector<2x32xf32>
    %37 = vector.broadcast %16 : vector<1x32xf32> to vector<2x32xf32>
    %38 = arith.addf %36, %37 : vector<2x32xf32>
    %c0_24 = arith.constant 0 : index
    %c0_25 = arith.constant 0 : index
    %c0_26 = arith.constant 0 : index
    %39 = vector.load %arg26[%c0_24, %c0_25, %c0_26] : memref<1x2x32xf32, #tpu.memory_space<vmem>>, vector<1x2x32xf32>
    %40 = vector.shape_cast %39 : vector<1x2x32xf32> to vector<2x32xf32>
    %41 = vector.shape_cast %38 : vector<2x32xf32> to vector<1x2x32xf32>
    tpu.vector_store %arg26[%c0_24, %c0_25, %c0_26], %41 {strides = array<i32>} : memref<1x2x32xf32, #tpu.memory_space<vmem>>, vector<1x2x32xf32>,
    return
  }
  func.func @transform_0(%arg0: i32) -> (i32, i32, i32) {
    %c0_i32 = arith.constant 0 : i32
    %c0_i32_0 = arith.constant 0 : i32
    %c0_i32_1 = arith.constant 0 : i32
    return %arg0, %c0_i32, %c0_i32_0 : i32, i32, i32
  }
  func.func @transform_1(%arg0: i32) -> (i32, i32, i32) {
    %c0_i32 = arith.constant 0 : i32
    %c0_i32_0 = arith.constant 0 : i32
    %c0_i32_1 = arith.constant 0 : i32
    %c0_i32_2 = arith.constant 0 : i32
    return %c0_i32, %c0_i32_0, %c0_i32_1 : i32, i32, i32
  }
  func.func @transform_2(%arg0: i32) -> (i32, i32) {
    %c0_i32 = arith.constant 0 : i32
    %c0_i32_0 = arith.constant 0 : i32
    %c0_i32_1 = arith.constant 0 : i32
    return %c0_i32, %c0_i32_0 : i32, i32
  }
  func.func @transform_3(%arg0: i32) -> (i32, i32) {
    %c0_i32 = arith.constant 0 : i32
    %c0_i32_0 = arith.constant 0 : i32
    %c0_i32_1 = arith.constant 0 : i32
    return %c0_i32, %c0_i32_0 : i32, i32
  }
  func.func @transform_4(%arg0: i32) -> (i32, i32) {
    %c0_i32 = arith.constant 0 : i32
    %c0_i32_0 = arith.constant 0 : i32
    %c0_i32_1 = arith.constant 0 : i32
    return %c0_i32, %c0_i32_0 : i32, i32
  }
  func.func @transform_5(%arg0: i32) -> (i32, i32) {
    %c0_i32 = arith.constant 0 : i32
    %c0_i32_0 = arith.constant 0 : i32
    %c0_i32_1 = arith.constant 0 : i32
    return %c0_i32, %c0_i32_0 : i32, i32
  }
  func.func @transform_6(%arg0: i32) -> (i32, i32) {
    %c0_i32 = arith.constant 0 : i32
    %c0_i32_0 = arith.constant 0 : i32
    %c0_i32_1 = arith.constant 0 : i32
    return %c0_i32, %c0_i32_0 : i32, i32
  }
  func.func @transform_7(%arg0: i32) -> (i32, i32, i32) {
    %c0_i32 = arith.constant 0 : i32
    %c0_i32_0 = arith.constant 0 : i32
    %c0_i32_1 = arith.constant 0 : i32
    %c0_i32_2 = arith.constant 0 : i32
    return %c0_i32, %c0_i32_0, %c0_i32_1 : i32, i32, i32
  }
  func.func @transform_8(%arg0: i32) -> (i32, i32, i32) {
    %c0_i32 = arith.constant 0 : i32
    %c0_i32_0 = arith.constant 0 : i32
    %c0_i32_1 = arith.constant 0 : i32
    %c0_i32_2 = arith.constant 0 : i32
    return %c0_i32, %c0_i32_0, %c0_i32_1 : i32, i32, i32
  }
  func.func @transform_9(%arg0: i32) -> (i32, i32, i32) {
    %c0_i32 = arith.constant 0 : i32
    %c0_i32_0 = arith.constant 0 : i32
    %c0_i32_1 = arith.constant 0 : i32
    %c0_i32_2 = arith.constant 0 : i32
    return %c0_i32, %c0_i32_0, %c0_i32_1 : i32, i32, i32
  }
  func.func @transform_10(%arg0: i32) -> (i32, i32, i32) {
    %c0_i32 = arith.constant 0 : i32
    %c0_i32_0 = arith.constant 0 : i32
    %c0_i32_1 = arith.constant 0 : i32
    %c0_i32_2 = arith.constant 0 : i32
    return %c0_i32, %c0_i32_0, %c0_i32_1 : i32, i32, i32
  }
  func.func @transform_11(%arg0: i32) -> (i32, i32, i32) {
    %c0_i32 = arith.constant 0 : i32
    %c0_i32_0 = arith.constant 0 : i32
    %c0_i32_1 = arith.constant 0 : i32
    %c0_i32_2 = arith.constant 0 : i32
    return %c0_i32, %c0_i32_0, %c0_i32_1 : i32, i32, i32
  }
  func.func @transform_12(%arg0: i32) -> (i32, i32, i32) {
    %c0_i32 = arith.constant 0 : i32
    %c0_i32_0 = arith.constant 0 : i32
    %c0_i32_1 = arith.constant 0 : i32
    %c0_i32_2 = arith.constant 0 : i32
    return %c0_i32, %c0_i32_0, %c0_i32_1 : i32, i32, i32
  }
  func.func @transform_13(%arg0: i32) -> (i32, i32, i32) {
    %c0_i32 = arith.constant 0 : i32
    %c0_i32_0 = arith.constant 0 : i32
    %c0_i32_1 = arith.constant 0 : i32
    %c0_i32_2 = arith.constant 0 : i32
    return %c0_i32, %c0_i32_0, %c0_i32_1 : i32, i32, i32
  }
  func.func @transform_14(%arg0: i32) -> (i32, i32, i32) {
    %c0_i32 = arith.constant 0 : i32
    %c0_i32_0 = arith.constant 0 : i32
    %c0_i32_1 = arith.constant 0 : i32
    %c0_i32_2 = arith.constant 0 : i32
    return %c0_i32, %c0_i32_0, %c0_i32_1 : i32, i32, i32
  }
  func.func @transform_15(%arg0: i32) -> (i32, i32, i32) {
    %c0_i32 = arith.constant 0 : i32
    %c0_i32_0 = arith.constant 0 : i32
    %c0_i32_1 = arith.constant 0 : i32
    %c0_i32_2 = arith.constant 0 : i32
    return %c0_i32, %c0_i32_0, %c0_i32_1 : i32, i32, i32
  }
  func.func @transform_16(%arg0: i32) -> (i32, i32, i32) {
    %c0_i32 = arith.constant 0 : i32
    %c0_i32_0 = arith.constant 0 : i32
    %c0_i32_1 = arith.constant 0 : i32
    %c0_i32_2 = arith.constant 0 : i32
    return %c0_i32, %c0_i32_0, %c0_i32_1 : i32, i32, i32
  }
  func.func @transform_17(%arg0: i32) -> (i32, i32, i32) {
    %c0_i32 = arith.constant 0 : i32
    %c0_i32_0 = arith.constant 0 : i32
    %c0_i32_1 = arith.constant 0 : i32
    %c0_i32_2 = arith.constant 0 : i32
    return %c0_i32, %c0_i32_0, %c0_i32_1 : i32, i32, i32
  }
  func.func @transform_18(%arg0: i32) -> (i32, i32, i32) {
    %c0_i32 = arith.constant 0 : i32
    %c0_i32_0 = arith.constant 0 : i32
    %c0_i32_1 = arith.constant 0 : i32
    %c0_i32_2 = arith.constant 0 : i32
    return %c0_i32, %c0_i32_0, %c0_i32_1 : i32, i32, i32
  }
  func.func @transform_19(%arg0: i32) -> (i32, i32, i32) {
    %c0_i32 = arith.constant 0 : i32
    %c0_i32_0 = arith.constant 0 : i32
    %c0_i32_1 = arith.constant 0 : i32
    %c0_i32_2 = arith.constant 0 : i32
    return %c0_i32, %c0_i32_0, %c0_i32_1 : i32, i32, i32
  }
  func.func @transform_20(%arg0: i32) -> (i32, i32, i32) {
    %c0_i32 = arith.constant 0 : i32
    %c0_i32_0 = arith.constant 0 : i32
    %c0_i32_1 = arith.constant 0 : i32
    %c0_i32_2 = arith.constant 0 : i32
    return %c0_i32, %c0_i32_0, %c0_i32_1 : i32, i32, i32
  }
  func.func @transform_21(%arg0: i32) -> (i32, i32, i32) {
    %c0_i32 = arith.constant 0 : i32
    %c0_i32_0 = arith.constant 0 : i32
    %c0_i32_1 = arith.constant 0 : i32
    %c0_i32_2 = arith.constant 0 : i32
    return %c0_i32, %c0_i32_0, %c0_i32_1 : i32, i32, i32
  }
  func.func @transform_22(%arg0: i32) -> (i32, i32, i32) {
    %c0_i32 = arith.constant 0 : i32
    %c0_i32_0 = arith.constant 0 : i32
    %c0_i32_1 = arith.constant 0 : i32
    %c0_i32_2 = arith.constant 0 : i32
    return %c0_i32, %c0_i32_0, %c0_i32_1 : i32, i32, i32
  }
  func.func @transform_23(%arg0: i32) -> (i32, i32) {
    %c0_i32 = arith.constant 0 : i32
    %c0_i32_0 = arith.constant 0 : i32
    %c0_i32_1 = arith.constant 0 : i32
    return %c0_i32, %c0_i32_0 : i32, i32
  }
  func.func @transform_24(%arg0: i32) -> (i32, i32) {
    %c0_i32 = arith.constant 0 : i32
    %c0_i32_0 = arith.constant 0 : i32
    %c0_i32_1 = arith.constant 0 : i32
    return %c0_i32, %c0_i32_0 : i32, i32
  }
  func.func @transform_25(%arg0: i32) -> (i32, i32, i32) {
    %c0_i32 = arith.constant 0 : i32
    %c0_i32_0 = arith.constant 0 : i32
    %c0_i32_1 = arith.constant 0 : i32
    return %arg0, %c0_i32, %c0_i32_0 : i32, i32, i32
  }
}

</mosaic_0001>

<bundles_post_ra>
// kernel: temporal_encoder_forward.1
= control target key start
LH: loop header
LB: loop body
LE: loop exit
PB: predicated region body
PF: predicated region fallthrough
CT: control target
= control target key end

     0   :  { %s4159_s0 = inlined_call_operand.vmem [shape: f32[2,9,32], index: 0, kind: input, shape index: {}]   ;;  %s4160_s1 = inlined_call_operand.vmem [shape: f32[2,18,9], index: 1, kind: input, shape index: {}]   ;;  %s4161_s2 = inlined_call_operand.vmem [shape: f32[144,144], index: 2, kind: input, shape index: {}]   ;;  %s4162_s3 = inlined_call_operand.vmem [shape: f32[144,18], index: 3, kind: input, shape index: {}]   ;;  %s4163_s4 = inlined_call_operand.vmem [shape: f32[144,32], index: 4, kind: input, shape index: {}]   ;;  %s4164_s5 = inlined_call_operand.vmem [shape: f32[18,144], index: 5, kind: input, shape index: {}]   ;;  %s4165_s6 = inlined_call_operand.vmem [shape: f32[2,18], index: 6, kind: input, shape index: {}]   ;;  %s4166_s7 = inlined_call_operand.vmem [shape: f32[4,32,32], index: 7, kind: input, shape index: {}]   ;;  %s4167_s8 = inlined_call_operand.vmem [shape: f32[4,1,32], index: 8, kind: input, shape index: {}]   ;;  %s4168_s9 = inlined_call_operand.vmem [shape: f32[4,32,32], index: 9, kind: input, shape index: {}]   ;;  %s4169_s10 = inlined_call_operand.vmem [shape: f32[4,1,32], index: 10, kind: input, shape index: {}]   ;;  %s4170_s11 = inlined_call_operand.vmem [shape: f32[4,32,32], index: 11, kind: input, shape index: {}]   ;;  %s4171_s12 = inlined_call_operand.vmem [shape: f32[4,1,32], index: 12, kind: input, shape index: {}]   ;;  %s4172_s13 = inlined_call_operand.vmem [shape: f32[4,32,32], index: 13, kind: input, shape index: {}]   ;;  %s4173_s14 = inlined_call_operand.vmem [shape: f32[4,1,32], index: 14, kind: input, shape index: {}]   ;;  %s4174_s15 = inlined_call_operand.vmem [shape: f32[4,1,32], index: 15, kind: input, shape index: {}]   ;;  %s4175_s16 = inlined_call_operand.vmem [shape: f32[4,1,32], index: 16, kind: input, shape index: {}]   ;;  %s4176_s17 = inlined_call_operand.vmem [shape: f32[4,1,32], index: 17, kind: input, shape index: {}]   ;;  %s4177_s18 = inlined_call_operand.vmem [shape: f32[4,1,32], index: 18, kind: input, shape index: {}]   ;;  %s4178_s19 = inlined_call_operand.vmem [shape: f32[4,128,32], index: 19, kind: input, shape index: {}]   ;;  %s4179_s20 = inlined_call_operand.vmem [shape: f32[4,1,128], index: 20, kind: input, shape index: {}]   ;;  %s4180_s21 = inlined_call_operand.vmem [shape: f32[4,32,128], index: 21, kind: input, shape index: {}]   ;;  %s4181_s22 = inlined_call_operand.vmem [shape: f32[4,1,32], index: 22, kind: input, shape index: {}]   ;;  %s4182_s23 = inlined_call_operand.vmem [shape: f32[1,32], index: 23, kind: input, shape index: {}]   ;;  %s4183_s24 = inlined_call_operand.vmem [shape: f32[1,32], index: 24, kind: input, shape index: {}]   ;;  %s4184_s25 = inlined_call_operand.hbm [shape: f32[1,2,32], index: 25, kind: output, shape index: {}]  }
   0x1   :  { %4193 = sst [smem:[#allocation5_spill]] %s4159_s0 }
   0x2   :  { %4194 = sst [smem:[#allocation6_spill]] %s4160_s1 }
   0x3   :  { %4195 = sst [smem:[#allocation7_spill]] %s4161_s2 }
   0x4   :  { %4196 = sst [smem:[#allocation8_spill]] %s4162_s3 }
   0x5   :  { %4197 = sst [smem:[#allocation9_spill]] %s4163_s4 }
   0x6   :  { %4198 = sst [smem:[#allocation10_spill]] %s4164_s5 }
   0x7   :  { %4199 = sst [smem:[#allocation11_spill]] %s4165_s6 }
   0x8   :  { %4200 = sst [smem:[#allocation12_spill]] %s4166_s7 }
   0x9   :  { %4201 = sst [smem:[#allocation13_spill]] %s4167_s8 }
   0xa   :  { %4202 = sst [smem:[#allocation14_spill]] %s4168_s9 }
   0xb   :  { %4203 = sst [smem:[#allocation15_spill]] %s4174_s15 }
   0xc   :  { %s4204_s6 = sld [smem:[#allocation5_spill]]  ;;  %vm103_vm0 = vcmask 1040384   ;;  %vm93_vm1 = vcmask 72704  }
   0xd   :  { %s4205_s28 = sld [smem:[#allocation6_spill]] }
  0x12   :  { %v2319_v0 = vld [vmem:[%s4204_s6 + $0x18] sm:$0x1]  ;;  %v85_v1 = vld [vmem:[%s4204_s6 + $0x8] sm:$0x1]  ;;  %v2318_v2 = vld [vmem:[%s4204_s6 + $0x10] sm:$0xff] }
  0x13   :  { %2518 = vmatpush.msk.msra.mxu2 %vm103_vm0, %v2319_v0  ;;  %2520 = vmatpush.msk.msra.mxu3 %vm103_vm0, %v85_v1  ;;  %v84_v3 = vld [vmem:[%s4204_s6] sm:$0xff]  ;;  %v82_v5 = vld [vmem:[%s4205_s28 + $0x8] sm:$0xff] }
  0x14   :  { %v2316_v4 = vld [vmem:[%s4205_s28 + $0x20] sm:$0xff] }
  0x15   :  { %30 = vsyncpa [#allocation3], 0  ;;  %2320 = vmatpush.msk.msra.mxu0 %vm103_vm0, %v2319_v0  ;;  %2324 = vmatpush.msk.msra.mxu1 %vm103_vm0, %v85_v1  ;;  %v2315_v6 = vld [vmem:[%s4205_s28 + $0x18] sm:$0xff]  ;;  %v81_v7 = vld [vmem:[%s4205_s28] sm:$0xff]  ;;  %s2940_s1 = smov 0  }
  0x16   :  { %2519 = vmatpush.msra.mxu2 %v2318_v2  ;;  %2521 = vmatpush.msra.mxu3 %v84_v3  ;;  %v2317_v8 = vld [vmem:[%s4205_s28 + $0x28] sm:$0x3]  ;;  %v83_v9 = vld [vmem:[%s4205_s28 + $0x10] sm:$0x3] }
  0x17   :  { %2322 = vmatmul.msk.f32.vlgmr.msra.gmra.mxu2 %vm93_vm1, %v2316_v4  ;;  %2326 = vmatmul.msk.f32.vlgmr.msra.gmra.mxu3 %vm93_vm1, %v82_v5 }
  0x18   :  { %122 = vmatpush.msra.mxu0 %v2318_v2  ;;  %160 = vmatpush.msra.mxu1 %v84_v3 }
  0x19   :  { %2321 = vmatmul.msk.f32.vlgmr.msra.gmra.mxu0 %vm93_vm1, %v2315_v6  ;;  %2325 = vmatmul.msk.f32.vlgmr.msra.gmra.mxu1 %vm93_vm1, %v81_v7 }
  0x1f   :  { %2323 = vmatmul.msk.f32.gmra.mxu2 %vm93_vm1, %v2317_v8  ;;  %2327 = vmatmul.msk.f32.gmra.mxu3 %vm93_vm1, %v83_v9 }
  0x96   :  { %v124_v10 = vpop.f32.mrf.mxu0  ;;  %v162_v11 = vpop.f32.mrf.mxu1 }
  0x97   :  { %v163_v12 = vadd.f32 %v162_v11, %v124_v10  }
  0x9a   :  { %v127_v13 = vpop.f32.mrf.mxu2  ;;  %v165_v14 = vpop.f32.mrf.mxu3 }
  0x9b   :  { %v166_v15 = vadd.f32 %v165_v14, %v127_v13  }
  0xa2   :  { %v130_v16 = vpop.f32.mrf.mxu2  ;;  %v168_v17 = vpop.f32.mrf.mxu3 }
  0xa3   :  { %v169_v18 = vadd.f32 %v168_v17, %v130_v16  }
  0xa4 LB: > { %vm191_vm2 = vcmask 254976   ;;  %vm184_vm3 = vcmask 261120   ;;  %v2766_v22 = vmov 32.0   ;;  %s4206_s15 = sld [smem:[#allocation15_spill]]  ;;  %s182_s5 = scalar_lea.vmem %s4175_s16, %s2764_s1  ;;  %vm344_vm9 = vcmask 1041408   ;;  %s2764_s1 = sphi %s2940_s1, %s176_s1   ;;  %v2760_v12 = vphi %v163_v12, %v4216_v12   ;;  %v2756_v15 = vphi %v166_v15, %v4215_v15   ;;  %v2752_v18 = vphi %v169_v18, %v4214_v18  }
  0xa5   : > { %v192_v19 = vsel %vm191_vm2, %v2752_v18, 0.0  ;;  %v185_v20 = vsel %vm184_vm3, %v2760_v12, 0.0  ;;  %v188_v21 = vsel %vm184_vm3, %v2756_v15, 0.0  ;;  %2582 = vrcp.f32 %v2766_v22  ;;  %v2573_v1 = vld [vmem:[%s182_s5] ss:$0 sm:$0xff]  ;;  %s4207_s2 = sld [smem:[#allocation8_spill]]  ;;  %s572_s5 = scalar_lea.vmem %s4169_s10, %s2764_s1 }
  0xa6   : > { %193 = vadd.xlane.f32.xlu0 %v192_v19  ;;  %186 = vadd.xlane.f32.xlu1 %v185_v20  ;;  %vm289_vm15 = vcmask 146432   ;;  %s3025_s3 = sshll.u32 %s2764_s1, 5  ;;  %s4208_s27 = sld [smem:[#allocation12_spill]]  ;;  %vm1093_vm0 = vcmask 130048  }
  0xa7   : > { %s4209_s29 = sld [smem:[#allocation14_spill]]  ;;  %s1897_s9 = scalar_lea.vmem %s4172_s13, %s3025_s3 }
  0xa8   : > { %s4210_s8 = sld [smem:[#allocation13_spill]]  ;;  %s1960_s30 = scalar_lea.vmem %s4176_s17, %s2764_s1 }
  0xa9   : > { %s4212_s0 = sld [smem:[#allocation7_spill]]  ;;  %s1962_s26 = scalar_lea.vmem %s4177_s18, %s2764_s1 }
  0xaa   : > { %s180_s4 = scalar_lea.vmem %s4206_s15, %s2764_s1  ;;  %s696_s15 = scalar_lea.vmem %s4170_s11, %s3025_s3 }
  0xab   : > { %v2583_v23 = vpop.eup %2582  ;;  %v2572_v61 = vld [vmem:[%s180_s4] ss:$0 sm:$0xff]  ;;  %s2496_s28 = sshll.u32 %s2764_s1, 7 }
  0xac   : > { %v196_v24 = vmul.f32 32.0, %v2583_v23  ;;  %vm200_vm4 = vweird.f32 %v2583_v23  ;;  %s420_s4 = scalar_lea.vmem %s4208_s27, %s3025_s3 }
  0xad   : > { %s567_s6 = scalar_lea.vmem %s4209_s29, %s3025_s3  ;;  %s1952_s29 = scalar_lea.vmem %s4173_s14, %s2764_s1 }
  0xae   : > { %189 = vadd.xlane.f32.xlu0 %v188_v21  ;;  %v197_v25 = vsub.f32 1.0, %v196_v24  ;;  %v271_v24 = vld [vmem:[%s4207_s2] sm:$0xff]  ;;  %s425_s27 = scalar_lea.vmem %s4210_s8, %s2764_s1 }
  0xb0   : > { %v198_v26 = vmul.f32 %v2583_v23, %v197_v25  ;;  %v272_v25 = vld [vmem:[%s4207_s2 + $0x8] sm:$0xff] }
  0xb2   : > { %v199_v27 = vadd.f32 %v2583_v23, %v198_v26  ;;  %v273_v26 = vld [vmem:[%s4207_s2 + $0x10] sm:$0xff] }
  0xb4   : > { %v2960_v28 = vsel %vm200_vm4, %v2583_v23, %v199_v27  ;;  %v274_v27 = vld [vmem:[%s4207_s2 + $0x18] sm:$0xff] }
 0x119   : > { %v194_v29 = vpop.xlane.xlu0 %193  ;;  %v187_v33 = vpop.xlane.xlu1 %186 }
 0x11a   : > { %v204_v30 = vmul.f32 %v2960_v28, %v194_v29  ;;  %v202_v37 = vmul.f32 %v2960_v28, %v187_v33  ;;  %v275_v29 = vld [vmem:[%s4207_s2 + $0x20] sm:$0xff] }
 0x11b   : > { %v279_v33 = vld [vmem:[%s4207_s2 + $0x40] sm:$0xff] }
 0x11c   : > { %v207_v31 = vsub.f32 %v2752_v18, %v204_v30  ;;  %v2969_v39 = vsub.f32 %v2760_v12, %v202_v37  ;;  %v276_v30 = vld [vmem:[%s4207_s2 + $0x28] sm:$0xff]  ;;  %v700_v37 = vld [vmem:[%s696_s15 + $0x18] sm:$0xff] }
 0x11d   : > { %2392 = vmatpush.xpose.msk.msra.mxu3 %vm184_vm3, %v700_v37 }
 0x11e   : > { %v210_v32 = vmul.f32 %v207_v31, %v207_v31  ;;  %v208_v42 = vmul.f32 %v2969_v39, %v2969_v39 }
 0x120   : > { %v217_v34 = vsel %vm191_vm2, %v210_v32, 0.0  ;;  %v211_v43 = vsel %vm184_vm3, %v208_v42, 0.0  ;;  %v278_v32 = vld [vmem:[%s4207_s2 + $0x38] sm:$0xff]  ;;  %v422_v42 = vld [vmem:[%s420_s4 + $0x8] sm:$0xff] }
 0x121   : > { %218 = vadd.xlane.f32.xlu1 %v217_v34  ;;  %v190_v35 = vpop.xlane.xlu0 %189  ;;  %v280_v34 = vld [vmem:[%s4207_s2 + $0x48] sm:$0xff] }
 0x122   : > { %v203_v36 = vmul.f32 %v2960_v28, %v190_v35  ;;  %v424_v35 = vld [vmem:[%s420_s4 + $0x18] sm:$0xff] }
 0x123   : > { %2348 = vmatpush.xpose.msk.msra.mxu1 %vm184_vm3, %v424_v35 }
 0x124   : > { %v206_v38 = vsub.f32 %v2756_v15, %v203_v36  ;;  %v571_v36 = vld [vmem:[%s567_s6 + $0x18] sm:$0xff] }
 0x125   : > { %2370 = vmatpush.xpose.msk.msra.mxu2 %vm184_vm3, %v571_v36 }
 0x126   : > { %v209_v40 = vmul.f32 %v206_v38, %v206_v38 }
 0x128   : > { %v214_v41 = vsel %vm184_vm3, %v209_v40, 0.0  ;;  %v570_v40 = vld [vmem:[%s567_s6 + $0x10] sm:$0xff] }
 0x129   : > { %215 = vadd.xlane.f32.xlu2 %v214_v41  ;;  %v699_v41 = vld [vmem:[%s696_s15 + $0x10] sm:$0xff]  ;;  %2371 = vmatpush.xpose.msk.msra.mxu2 %vm184_vm3, %v570_v40 }
 0x12a   : > { %2393 = vmatpush.xpose.msk.msra.mxu3 %vm184_vm3, %v699_v41 }
 0x131   : > { %212 = vadd.xlane.f32.xlu2 %v211_v43  ;;  %v569_v43 = vld [vmem:[%s567_s6 + $0x8] sm:$0xff] }
 0x132   : > { %2372 = vmatpush.xpose.msk.msra.mxu2 %vm184_vm3, %v569_v43 }
 0x194   : > { %v219_v44 = vpop.xlane.xlu1 %218 }
 0x195   : > { %v222_v45 = vmul.f32 %v219_v44, %v2960_v28  ;;  %v698_v44 = vld [vmem:[%s696_s15 + $0x8] sm:$0xff] }
 0x196   : > { %2394 = vmatpush.xpose.msk.msra.mxu3 %vm184_vm3, %v698_v44 }
 0x197   : > { %v225_v46 = vadd.f32 1e-05, %v222_v45  ;;  %v282_v45 = vld [vmem:[%s4207_s2 + $0x58] sm:$0xff] }
 0x199   : > { %2584 = vrsqrt.f32 %v225_v46  ;;  %vm252_vm6 = vweird.f32 %v225_v46 }
 0x19c   : > { %v216_v47 = vpop.xlane.xlu2 %215 }
 0x19d   : > { %v221_v48 = vmul.f32 %v216_v47, %v2960_v28  ;;  %v568_v47 = vld [vmem:[%s567_s6] sm:$0xff]  ;;  %s4211_s6 = sld [smem:[#allocation9_spill]] }
 0x19e   : > { %2373 = vmatpush.xpose.msk.msra.mxu2 %vm184_vm3, %v568_v47 }
 0x19f   : > { %v2585_v49 = vpop.eup %2584  ;;  %v224_v50 = vadd.f32 1e-05, %v221_v48  ;;  %v697_v48 = vld [vmem:[%s696_s15] sm:$0xff]  ;;  %s701_s15 = scalar_lea.vmem %s4171_s12, %s2764_s1 }
 0x1a0   : > { %v247_v51 = vmul.f32 %v2585_v49, %v225_v46  ;;  %vm253_vm5 = vweird.f32 %v2585_v49  ;;  %v421_v46 = vld [vmem:[%s420_s4] sm:$0xff]  ;;  %2395 = vmatpush.xpose.msk.msra.mxu3 %vm184_vm3, %v697_v48 }
 0x1a1   : > { %2586 = vrsqrt.f32 %v224_v50  ;;  %vm254_vm7 = vmor %vm252_vm6, %vm253_vm5  ;;  %vm242_vm10 = vweird.f32 %v224_v50 }
 0x1a2   : > { %v248_v52 = vmul.f32 %v2585_v49, %v247_v51  ;;  %v285_v51 = vld [vmem:[%s4207_s2 + $0x70] sm:$0xff] }
 0x1a4   : > { %v249_v53 = vmul.f32 0.5, %v248_v52  ;;  %v213_v54 = vpop.xlane.xlu2 %212  ;;  %v286_v52 = vld [vmem:[%s4207_s2 + $0x78] sm:$0xff] }
 0x1a5   : > { %v220_v55 = vmul.f32 %v213_v54, %v2960_v28 }
 0x1a6   : > { %v250_v56 = vsub.f32 1.5, %v249_v53 }
 0x1a7   : > { %v2587_v57 = vpop.eup %2586  ;;  %v223_v58 = vadd.f32 1e-05, %v220_v55  ;;  %v287_v55 = vld [vmem:[%s4207_s2 + $0x80] sm:$0xff] }
 0x1a8   : > { %v251_v59 = vmul.f32 %v2585_v49, %v250_v56  ;;  %v237_v60 = vmul.f32 %v2587_v57, %v224_v50  ;;  %vm243_vm8 = vweird.f32 %v2587_v57  ;;  %v284_v50 = vld [vmem:[%s4207_s2 + $0x68] sm:$0xff] }
 0x1a9   : > { %2588 = vrsqrt.f32 %v223_v58  ;;  %vm244_vm11 = vmor %vm242_vm10, %vm243_vm8  ;;  %vm232_vm13 = vweird.f32 %v223_v58 }
 0x1aa   : > { %v238_v62 = vmul.f32 %v2587_v57, %v237_v60  ;;  %v255_v63 = vsel %vm254_vm7, %v2585_v49, %v251_v59  ;;  %v283_v49 = vld [vmem:[%s4207_s2 + $0x60] sm:$0xff] }
 0x1ab   : > { %v258_v0 = vmul.f32 %v255_v63, %v207_v31  ;;  %v277_v31 = vld [vmem:[%s4207_s2 + $0x30] sm:$0xff] }
 0x1ac   : > { %v239_v2 = vmul.f32 0.5, %v238_v62 }
 0x1ad   : > { %v264_v3 = vmul.f32 %v2572_v61, %v258_v0 }
 0x1ae   : > { %v240_v4 = vsub.f32 1.5, %v239_v2 }
 0x1af   : > { %v2589_v5 = vpop.eup %2588  ;;  %v270_v6 = vadd.f32 %v2573_v1, %v264_v3 }
 0x1b0   : > { %v241_v7 = vmul.f32 %v2587_v57, %v240_v4  ;;  %v227_v8 = vmul.f32 %v2589_v5, %v223_v58  ;;  %vm233_vm12 = vweird.f32 %v2589_v5 }
 0x1b1   : > { %2328 = vmatpush.msk.msra.mxu0 %vm344_vm9, %v270_v6  ;;  %vm234_vm14 = vmor %vm232_vm13, %vm233_vm12 }
 0x1b2   : > { %v228_v9 = vmul.f32 %v2589_v5, %v227_v8  ;;  %v245_v10 = vsel %vm244_vm11, %v2587_v57, %v241_v7  ;;  %v288_v57 = vld [vmem:[%s4207_s2 + $0x88] sm:$0xff] }
 0x1b3   : > { %v257_v11 = vmul.f32 %v245_v10, %v206_v38  ;;  %v281_v38 = vld [vmem:[%s4207_s2 + $0x50] sm:$0xff] }
 0x1b4   : > { %v229_v13 = vmul.f32 0.5, %v228_v9 }
 0x1b5   : > { %v263_v14 = vmul.f32 %v2572_v61, %v257_v11 }
 0x1b6   : > { %v230_v16 = vsub.f32 1.5, %v229_v13 }
 0x1b7   : > { %v269_v17 = vadd.f32 %v2573_v1, %v263_v14 }
 0x1b8   : > { %v231_v19 = vmul.f32 %v2589_v5, %v230_v16 }
 0x1b9   : > { %362 = vmatpush.msra.mxu0 %v269_v17 }
 0x1ba   : > { %v235_v20 = vsel %vm234_vm14, %v2589_v5, %v231_v19 }
 0x1bb   : > { %v256_v21 = vmul.f32 %v235_v20, %v2969_v39  ;;  %v423_v39 = vld [vmem:[%s420_s4 + $0x10] sm:$0xff] }
 0x1bc   : > { %2349 = vmatpush.xpose.msk.msra.mxu1 %vm184_vm3, %v423_v39 }
 0x1bd   : > { %v262_v22 = vmul.f32 %v2572_v61, %v256_v21 }
 0x1bf   : > { %v268_v23 = vadd.f32 %v2573_v1, %v262_v22 }
 0x1c0   : > { %2350 = vmatpush.xpose.msk.msra.mxu1 %vm184_vm3, %v422_v42 }
 0x1c1   : > { %363 = vmatpush.msra.mxu0 %v268_v23 }
 0x1c2   : > { %2329 = vmatmul.msk.f32.vlgmr.msra.gmra.mxu0 %vm289_vm15, %v271_v24 }
 0x1c4   : > { %2351 = vmatpush.xpose.msk.msra.mxu1 %vm184_vm3, %v421_v46 }
 0x1ca   : > { %2330 = vmatmul.msk.f32.gmra.mxu0 %vm289_vm15, %v272_v25 }
 0x1d2   : > { %2331 = vmatmul.msk.f32.gmra.mxu0 %vm289_vm15, %v273_v26 }
 0x1da   : > { %2332 = vmatmul.msk.f32.gmra.mxu0 %vm289_vm15, %v274_v27 }
 0x1e2   : > { %2333 = vmatmul.msk.f32.gmra.mxu0 %vm289_vm15, %v275_v29 }
 0x1ea   : > { %2334 = vmatmul.msk.f32.gmra.mxu0 %vm289_vm15, %v276_v30 }
 0x1f2   : > { %2335 = vmatmul.msk.f32.gmra.mxu0 %vm289_vm15, %v277_v31 }
 0x1fa   : > { %2336 = vmatmul.msk.f32.gmra.mxu0 %vm289_vm15, %v278_v32 }
 0x202   : > { %2337 = vmatmul.msk.f32.gmra.mxu0 %vm289_vm15, %v279_v33 }
 0x20a   : > { %2338 = vmatmul.msk.f32.gmra.mxu0 %vm289_vm15, %v280_v34 }
 0x212   : > { %2339 = vmatmul.msk.f32.gmra.mxu0 %vm289_vm15, %v281_v38 }
 0x21a   : > { %2340 = vmatmul.msk.f32.gmra.mxu0 %vm289_vm15, %v282_v45 }
 0x222   : > { %2341 = vmatmul.msk.f32.gmra.mxu0 %vm289_vm15, %v283_v49 }
 0x22a   : > { %2342 = vmatmul.msk.f32.gmra.mxu0 %vm289_vm15, %v284_v50 }
 0x232   : > { %2343 = vmatmul.msk.f32.gmra.mxu0 %vm289_vm15, %v285_v51 }
 0x23a   : > { %2344 = vmatmul.msk.f32.gmra.mxu0 %vm289_vm15, %v286_v52 }
 0x23f   : > { %v365_v53 = vpop.f32.mrf.mxu0 }
 0x240   : > { %2352 = vmatmul.msk.f32.vlgmr.msra.gmra.mxu1 %vm184_vm3, %v365_v53  ;;  %2374 = vmatmul.msk.f32.vlgmr.msra.gmra.mxu2 %vm184_vm3, %v365_v53 }
 0x241   : > { %2396 = vmatmul.msk.f32.vlgmr.msra.gmra.mxu3 %vm184_vm3, %v365_v53 }
 0x242   : > { %2345 = vmatmul.msk.f32.gmra.mxu0 %vm289_vm15, %v287_v55  ;;  %v3225_v55 = vld [vmem:[%s701_s15] ss:$0 sm:$0xff]  ;;  %s2060_s15 = scalar_lea.vmem %s4179_s20, %s2764_s1 }
 0x247   : > { %v368_v54 = vpop.f32.mrf.mxu0 }
 0x248   : > { %2353 = vmatmul.msk.f32.gmra.mxu1 %vm184_vm3, %v368_v54  ;;  %2375 = vmatmul.msk.f32.gmra.mxu2 %vm184_vm3, %v368_v54 }
 0x249   : > { %2397 = vmatmul.msk.f32.gmra.mxu3 %vm184_vm3, %v368_v54  ;;  %v3218_v54 = vld [vmem:[%s572_s5] ss:$0 sm:$0xff]  ;;  %s4213_s5 = sld [smem:[#allocation10_spill]] }
 0x24a   : > { %2346 = vmatmul.msk.f32.gmra.mxu0 %vm289_vm15, %v288_v57  ;;  %v675_v57 = vld [vmem:[%s4211_s6 + $0x78] sm:$0xff] }
 0x24f   : > { %v371_v56 = vpop.f32.mrf.mxu0 }
 0x250   : > { %2354 = vmatmul.msk.f32.gmra.mxu1 %vm184_vm3, %v371_v56  ;;  %2376 = vmatmul.msk.f32.gmra.mxu2 %vm184_vm3, %v371_v56 }
 0x251   : > { %2398 = vmatmul.msk.f32.gmra.mxu3 %vm184_vm3, %v371_v56 }
 0x257   : > { %v374_v58 = vpop.f32.mrf.mxu0 }
 0x258   : > { %2355 = vmatmul.msk.f32.gmra.mxu1 %vm184_vm3, %v374_v58  ;;  %2377 = vmatmul.msk.f32.gmra.mxu2 %vm184_vm3, %v374_v58 }
 0x259   : > { %2399 = vmatmul.msk.f32.gmra.mxu3 %vm184_vm3, %v374_v58 }
 0x25f   : > { %v377_v59 = vpop.f32.mrf.mxu0 }
 0x260   : > { %2356 = vmatmul.msk.f32.gmra.mxu1 %vm184_vm3, %v377_v59  ;;  %2378 = vmatmul.msk.f32.gmra.mxu2 %vm184_vm3, %v377_v59 }
 0x261   : > { %2400 = vmatmul.msk.f32.gmra.mxu3 %vm184_vm3, %v377_v59 }
 0x267   : > { %v380_v60 = vpop.f32.mrf.mxu0 }
 0x268   : > { %2357 = vmatmul.msk.f32.gmra.mxu1 %vm184_vm3, %v380_v60  ;;  %2379 = vmatmul.msk.f32.gmra.mxu2 %vm184_vm3, %v380_v60 }
 0x269   : > { %2401 = vmatmul.msk.f32.gmra.mxu3 %vm184_vm3, %v380_v60 }
 0x26f   : > { %v383_v61 = vpop.f32.mrf.mxu0 }
 0x270   : > { %2358 = vmatmul.msk.f32.gmra.mxu1 %vm184_vm3, %v383_v61  ;;  %2380 = vmatmul.msk.f32.gmra.mxu2 %vm184_vm3, %v383_v61 }
 0x271   : > { %2402 = vmatmul.msk.f32.gmra.mxu3 %vm184_vm3, %v383_v61 }
 0x277   : > { %v386_v62 = vpop.f32.mrf.mxu0 }
 0x278   : > { %2359 = vmatmul.msk.f32.gmra.mxu1 %vm184_vm3, %v386_v62  ;;  %2381 = vmatmul.msk.f32.gmra.mxu2 %vm184_vm3, %v386_v62 }
 0x279   : > { %2403 = vmatmul.msk.f32.gmra.mxu3 %vm184_vm3, %v386_v62 }
 0x27f   : > { %v389_v63 = vpop.f32.mrf.mxu0 }
 0x280   : > { %2360 = vmatmul.msk.f32.gmra.mxu1 %vm184_vm3, %v389_v63  ;;  %2382 = vmatmul.msk.f32.gmra.mxu2 %vm184_vm3, %v389_v63 }
 0x281   : > { %2404 = vmatmul.msk.f32.gmra.mxu3 %vm184_vm3, %v389_v63 }
 0x287   : > { %v392_v0 = vpop.f32.mrf.mxu0 }
 0x288   : > { %2361 = vmatmul.msk.f32.gmra.mxu1 %vm184_vm3, %v392_v0  ;;  %2383 = vmatmul.msk.f32.gmra.mxu2 %vm184_vm3, %v392_v0 }
 0x289   : > { %2405 = vmatmul.msk.f32.gmra.mxu3 %vm184_vm3, %v392_v0  ;;  %v674_v0 = vld [vmem:[%s4211_s6 + $0x70] sm:$0xff] }
 0x28f   : > { %v395_v1 = vpop.f32.mrf.mxu0 }
 0x290   : > { %2362 = vmatmul.msk.f32.gmra.mxu1 %vm184_vm3, %v395_v1  ;;  %2384 = vmatmul.msk.f32.gmra.mxu2 %vm184_vm3, %v395_v1 }
 0x291   : > { %2406 = vmatmul.msk.f32.gmra.mxu3 %vm184_vm3, %v395_v1 }
 0x297   : > { %v398_v2 = vpop.f32.mrf.mxu0 }
 0x298   : > { %2363 = vmatmul.msk.f32.gmra.mxu1 %vm184_vm3, %v398_v2  ;;  %2385 = vmatmul.msk.f32.gmra.mxu2 %vm184_vm3, %v398_v2 }
 0x299   : > { %2407 = vmatmul.msk.f32.gmra.mxu3 %vm184_vm3, %v398_v2 }
 0x29f   : > { %v401_v3 = vpop.f32.mrf.mxu0 }
 0x2a0   : > { %2364 = vmatmul.msk.f32.gmra.mxu1 %vm184_vm3, %v401_v3  ;;  %2386 = vmatmul.msk.f32.gmra.mxu2 %vm184_vm3, %v401_v3 }
 0x2a1   : > { %2408 = vmatmul.msk.f32.gmra.mxu3 %vm184_vm3, %v401_v3 }
 0x2a7   : > { %v404_v4 = vpop.f32.mrf.mxu0 }
 0x2a8   : > { %2365 = vmatmul.msk.f32.gmra.mxu1 %vm184_vm3, %v404_v4  ;;  %2387 = vmatmul.msk.f32.gmra.mxu2 %vm184_vm3, %v404_v4 }
 0x2a9   : > { %2409 = vmatmul.msk.f32.gmra.mxu3 %vm184_vm3, %v404_v4  ;;  %v673_v4 = vld [vmem:[%s4211_s6 + $0x68] sm:$0xff] }
 0x2af   : > { %v407_v5 = vpop.f32.mrf.mxu0 }
 0x2b0   : > { %2366 = vmatmul.msk.f32.gmra.mxu1 %vm184_vm3, %v407_v5  ;;  %2388 = vmatmul.msk.f32.gmra.mxu2 %vm184_vm3, %v407_v5 }
 0x2b1   : > { %2410 = vmatmul.msk.f32.gmra.mxu3 %vm184_vm3, %v407_v5 }
 0x2b7   : > { %v410_v6 = vpop.f32.mrf.mxu0 }
 0x2b8   : > { %2367 = vmatmul.msk.f32.gmra.mxu1 %vm184_vm3, %v410_v6  ;;  %2389 = vmatmul.msk.f32.gmra.mxu2 %vm184_vm3, %v410_v6 }
 0x2b9   : > { %2411 = vmatmul.msk.f32.gmra.mxu3 %vm184_vm3, %v410_v6 }
 0x2bd   : > { %v3161_v14 = vpop.f32.mrf.mxu1 }
 0x2bf   : > { %v413_v9 = vpop.f32.mrf.mxu0 }
 0x2c0   : > { %2390 = vmatmul.msk.f32.gmra.mxu2 %vm184_vm3, %v413_v9  ;;  %2368 = vmatmul.msk.f32.gmra.mxu1 %vm184_vm3, %v413_v9 }
 0x2c1   : > { %2412 = vmatmul.msk.f32.gmra.mxu3 %vm184_vm3, %v413_v9 }
 0x2c3   : > { %v3147_v7 = vpop.f32.mrf.mxu2 }
 0x2c4   : > { %v3149_v8 = vpop.f32.mrf.mxu3 }
 0x2c5   : > { %v3169_v20 = vpop.f32.mrf.mxu1 }
 0x2c7   : > { %v416_v13 = vpop.f32.mrf.mxu0 }
 0x2c8   : > { %2391 = vmatmul.msk.f32.gmra.mxu2 %vm184_vm3, %v416_v13  ;;  %2369 = vmatmul.msk.f32.gmra.mxu1 %vm184_vm3, %v416_v13 }
 0x2c9   : > { %2413 = vmatmul.msk.f32.gmra.mxu3 %vm184_vm3, %v416_v13 }
 0x2cb   : > { %v3154_v10 = vpop.f32.mrf.mxu2 }
 0x2cc   : > { %v3156_v11 = vpop.f32.mrf.mxu3 }
 0x2cd   : > { %v3177_v24 = vpop.f32.mrf.mxu1 }
 0x2d3   : > { %v3163_v16 = vpop.f32.mrf.mxu2 }
 0x2d4   : > { %v3165_v17 = vpop.f32.mrf.mxu3 }
 0x2d5   : > { %v3183_v27 = vpop.f32.mrf.mxu1 }
 0x2db   : > { %v3167_v19 = vpop.f32.mrf.mxu2 }
 0x2dc   : > { %v3171_v21 = vpop.f32.mrf.mxu3 }
 0x2dd   : > { %v3189_v31 = vpop.f32.mrf.mxu1 }
 0x2e3   : > { %v3173_v22 = vpop.f32.mrf.mxu2 }
 0x2e4   : > { %v3175_v23 = vpop.f32.mrf.mxu3 }
 0x2e5   : > { %v3197_v35 = vpop.f32.mrf.mxu1 }
 0x2eb   : > { %v3179_v25 = vpop.f32.mrf.mxu2 }
 0x2ec   : > { %v3181_v26 = vpop.f32.mrf.mxu3 }
 0x2ed   : > { %v3201_v39 = vpop.f32.mrf.mxu1 }
 0x2f3   : > { %v3185_v29 = vpop.f32.mrf.mxu2 }
 0x2f4   : > { %v3187_v30 = vpop.f32.mrf.mxu3 }
 0x2f5   : > { %v3205_v42 = vpop.f32.mrf.mxu1 }
 0x2fb   : > { %v3191_v32 = vpop.f32.mrf.mxu2 }
 0x2fc   : > { %v3193_v33 = vpop.f32.mrf.mxu3 }
 0x2fd   : > { %v3207_v45 = vpop.f32.mrf.mxu1 }
 0x303   : > { %v3195_v34 = vpop.f32.mrf.mxu2 }
 0x304   : > { %v759_v36 = vpop.f32.mrf.mxu3 }
 0x305   : > { %v3209_v49 = vpop.f32.mrf.mxu1 }
 0x30b   : > { %v3199_v37 = vpop.f32.mrf.mxu2 }
 0x30c   : > { %v762_v38 = vpop.f32.mrf.mxu3 }
 0x30d   : > { %v3211_v53 = vpop.f32.mrf.mxu1 }
 0x313   : > { %v3203_v40 = vpop.f32.mrf.mxu2 }
 0x314   : > { %v765_v41 = vpop.f32.mrf.mxu3 }
 0x315   : > { %v3238_v3 = vpop.f32.mrf.mxu1 }
 0x31b   : > { %v639_v43 = vpop.f32.mrf.mxu2 }
 0x31c   : > { %v768_v44 = vpop.f32.mrf.mxu3 }
 0x323   : > { %v642_v46 = vpop.f32.mrf.mxu2 }
 0x324   : > { %v771_v47 = vpop.f32.mrf.mxu3 }
 0x325   : > { %v772_v5 = vadd.f32 %v3225_v55, %v771_v47  ;;  %v671_v47 = vld [vmem:[%s4211_s6 + $0x58] sm:$0xff] }
 0x32b   : > { %v645_v48 = vpop.f32.mrf.mxu2 }
 0x32c   : > { %v774_v50 = vpop.f32.mrf.mxu3  ;;  %v646_v9 = vadd.f32 %v3218_v54, %v645_v48 }
 0x32d   : > { %v775_v1 = vadd.f32 %v3225_v55, %v774_v50  ;;  %v672_v50 = vld [vmem:[%s4211_s6 + $0x60] sm:$0xff] }
 0x32e   : > { %v801_v48 = vmul.f32 %v772_v5, %v672_v50 }
 0x333   : > { %v648_v51 = vpop.f32.mrf.mxu2 }
 0x334   : > { %v777_v52 = vpop.f32.mrf.mxu3  ;;  %v649_v62 = vadd.f32 %v3218_v54, %v648_v51  ;;  %v769_v51 = vadd.f32 %v3225_v55, %v768_v44  ;;  %v670_v44 = vld [vmem:[%s4211_s6 + $0x50] sm:$0xff] }
 0x335   : > { %v778_v60 = vadd.f32 %v3225_v55, %v777_v52  ;;  %v802_v52 = vmul.f32 %v775_v1, %v673_v4 }
 0x336   : > { %v692_v13 = vmul.f32 %v674_v0, %v649_v62  ;;  %v640_v62 = vadd.f32 %v3218_v54, %v639_v43  ;;  %v754_v43 = vadd.f32 %v3225_v55, %v3187_v30  ;;  %v665_v30 = vld [vmem:[%s4211_s6 + $0x28] sm:$0xff] }
 0x337   : > { %v803_v6 = vmul.f32 %v778_v60, %v674_v0  ;;  %v800_v60 = vmul.f32 %v769_v51, %v671_v47 }
 0x33b   : > { %v651_v56 = vpop.f32.mrf.mxu2 }
 0x33c   : > { %v652_v58 = vadd.f32 %v3218_v54, %v651_v56  ;;  %v780_v59 = vpop.f32.mrf.mxu3  ;;  %v766_v56 = vadd.f32 %v3225_v55, %v765_v41  ;;  %v669_v41 = vld [vmem:[%s4211_s6 + $0x48] sm:$0xff] }
 0x33d   : > { %v781_v61 = vadd.f32 %v3225_v55, %v780_v59  ;;  %v763_v59 = vadd.f32 %v3225_v55, %v762_v38  ;;  %v668_v38 = vld [vmem:[%s4211_s6 + $0x40] sm:$0xff] }
 0x33e   : > { %v693_v63 = vmul.f32 %v675_v57, %v652_v58  ;;  %v691_v58 = vmul.f32 %v673_v4, %v646_v9  ;;  %v689_v9 = vmul.f32 %v671_v47, %v640_v62  ;;  %v631_v62 = vadd.f32 %v3218_v54, %v3195_v34  ;;  %v661_v34 = vld [vmem:[%s4211_s6 + $0x8] sm:$0xff] }
 0x33f   : > { %v804_v2 = vmul.f32 %v781_v61, %v675_v57  ;;  %v643_v57 = vadd.f32 %v3218_v54, %v642_v46  ;;  %v760_v61 = vadd.f32 %v3225_v55, %v759_v36  ;;  %v799_v46 = vmul.f32 %v766_v56, %v670_v44  ;;  %v667_v36 = vld [vmem:[%s4211_s6 + $0x38] sm:$0xff] }
 0x340   : > { %2414 = vmatpush.xpose.msk.msrb.mxu0 %vm184_vm3, %v693_v63  ;;  %2522 = vmatpush.xpose.msk.msrb.mxu1 %vm184_vm3, %v693_v63  ;;  %v3269_v63 = vpop.f32.mrf.mxu1  ;;  %v798_v4 = vmul.f32 %v763_v59, %v669_v41 }
 0x341   : > { %1688 = vmatpush.msrb.mxu2 %v804_v2  ;;  %v690_v0 = vmul.f32 %v672_v50, %v643_v57  ;;  %v757_v2 = vadd.f32 %v3225_v55, %v3193_v33  ;;  %v797_v5 = vmul.f32 %v760_v61, %v668_v38  ;;  %v666_v33 = vld [vmem:[%s4211_s6 + $0x30] sm:$0xff] }
 0x342   : > { %v795_v51 = vmul.f32 %v754_v43, %v666_v33 }
 0x343   : > { %1689 = vmatpush.msrb.mxu2 %v803_v6  ;;  %v637_v6 = vadd.f32 %v3218_v54, %v3203_v40  ;;  %v796_v50 = vmul.f32 %v757_v2, %v667_v36  ;;  %v748_v40 = vadd.f32 %v3225_v55, %v3175_v23  ;;  %v739_v2 = vadd.f32 %v3225_v55, %v3156_v11 }
 0x344   : > { %2415 = vmatpush.xpose.msk.msrb.mxu0 %vm184_vm3, %v692_v13  ;;  %2523 = vmatpush.xpose.msk.msrb.mxu1 %vm184_vm3, %v692_v13  ;;  %v783_v1 = vpop.f32.mrf.mxu3  ;;  %v751_v13 = vadd.f32 %v3225_v55, %v3181_v26  ;;  %v664_v26 = vld [vmem:[%s4211_s6 + $0x20] sm:$0xff]  ;;  %v628_v11 = vadd.f32 %v3218_v54, %v3191_v32  ;;  %v622_v32 = vadd.f32 %v3218_v54, %v3179_v25 }
 0x345   : > { %1690 = vmatpush.msrb.mxu2 %v802_v52  ;;  %v634_v52 = vadd.f32 %v3218_v54, %v3199_v37  ;;  %v688_v47 = vmul.f32 %v670_v44, %v637_v6  ;;  %v663_v37 = vld [vmem:[%s4211_s6 + $0x18] sm:$0xff]  ;;  %v3321_v44 = vld [vmem:[%s4211_s6 + $0x88] sm:$0xff]  ;;  %v793_v61 = vmul.f32 %v748_v40, %v664_v26  ;;  %v660_v6 = vld [vmem:[%s4211_s6] sm:$0xff]  ;;  %v619_v40 = vadd.f32 %v3218_v54, %v3173_v22 }
 0x346   : > { %v794_v57 = vmul.f32 %v751_v13, %v665_v30  ;;  %v613_v22 = vadd.f32 %v3218_v54, %v3163_v16  ;;  %v607_v16 = vadd.f32 %v3218_v54, %v3147_v7 }
 0x347   : > { %1691 = vmatpush.msrb.mxu2 %v801_v48  ;;  %v745_v48 = vadd.f32 %v3225_v55, %v3171_v21  ;;  %v3316_v21 = vld [vmem:[%s4211_s6 + $0x80] sm:$0xff]  ;;  %v682_v25 = vmul.f32 %v664_v26, %v619_v40 }
 0x348   : > { %2416 = vmatpush.xpose.msk.msrb.mxu0 %vm184_vm3, %v691_v58  ;;  %2524 = vmatpush.xpose.msk.msrb.mxu1 %vm184_vm3, %v691_v58  ;;  %v784_v58 = vadd.f32 %v3225_v55, %v783_v1  ;;  %v3306_v59 = vpop.f32.mrf.mxu1  ;;  %v662_v1 = vld [vmem:[%s4211_s6 + $0x10] sm:$0xff] }
 0x349   : > { %1692 = vmatpush.msrb.mxu2 %v800_v60  ;;  %v742_v60 = vadd.f32 %v3225_v55, %v3165_v17 }
 0x34a   : > { %v805_v17 = vmul.f32 %v784_v58, %v3316_v21  ;;  %v678_v58 = vmul.f32 %v660_v6, %v607_v16  ;;  %v816_v16 = vld [vmem:[%s4212_s0 + $0x48] sm:$0xff] }
 0x34b   : > { %1693 = vmatpush.msrb.mxu2 %v799_v46  ;;  %v791_v43 = vmul.f32 %v742_v60, %v662_v1 }
 0x34c   : > { %2417 = vmatpush.xpose.msk.msrb.mxu0 %vm184_vm3, %v690_v0  ;;  %2525 = vmatpush.xpose.msk.msrb.mxu1 %vm184_vm3, %v690_v0  ;;  %v786_v56 = vpop.f32.mrf.mxu3  ;;  %v687_v0 = vmul.f32 %v669_v41, %v634_v52  ;;  %v736_v41 = vadd.f32 %v3225_v55, %v3149_v8  ;;  %v625_v8 = vadd.f32 %v3218_v54, %v3185_v29 }
 0x34d   : > { %1694 = vmatpush.msrb.mxu2 %v798_v4  ;;  %v787_v23 = vadd.f32 %v3225_v55, %v786_v56  ;;  %v792_v4 = vmul.f32 %v745_v48, %v663_v37  ;;  %v683_v29 = vmul.f32 %v665_v30, %v622_v32  ;;  %v616_v52 = vadd.f32 %v3218_v54, %v3167_v19  ;;  %v811_v32 = vld [vmem:[%s4212_s0 + $0x20] sm:$0xff] }
 0x34e   : > { %v789_v13 = vmul.f32 %v736_v41, %v660_v6  ;;  %v680_v19 = vmul.f32 %v662_v1, %v613_v22  ;;  %v813_v22 = vld [vmem:[%s4212_s0 + $0x30] sm:$0xff] }
 0x34f   : > { %1695 = vmatpush.msrb.mxu2 %v797_v5  ;;  %v806_v46 = vmul.f32 %v787_v23, %v3321_v44  ;;  %v686_v5 = vmul.f32 %v668_v38, %v631_v62  ;;  %v684_v38 = vmul.f32 %v666_v33, %v625_v8  ;;  %v681_v33 = vmul.f32 %v663_v37, %v616_v52  ;;  %v808_v62 = vld [vmem:[%s4212_s0 + $0x8] sm:$0xff] }
 0x350   : > { %2418 = vmatpush.xpose.msk.msrb.mxu0 %vm184_vm3, %v689_v9  ;;  %2526 = vmatpush.xpose.msk.msrb.mxu1 %vm184_vm3, %v689_v9  ;;  %v790_v9 = vmul.f32 %v739_v2, %v661_v34  ;;  %v3350_v55 = vpop.f32.mrf.mxu1 }
 0x351   : > { %1696 = vmatpush.msrb.mxu2 %v796_v50  ;;  %1773 = vmatpush.msrb.mxu3 %v806_v46  ;;  %v685_v50 = vmul.f32 %v667_v36, %v628_v11  ;;  %v654_v36 = vpop.f32.mrf.mxu2  ;;  %v809_v11 = vld [vmem:[%s4212_s0 + $0x10] sm:$0xff] }
 0x352   : > { %v655_v37 = vadd.f32 %v3218_v54, %v654_v36 }
 0x353   : > { %1697 = vmatpush.msrb.mxu2 %v795_v51  ;;  %1774 = vmatpush.msrb.mxu3 %v805_v17 }
 0x354   : > { %2419 = vmatpush.xpose.msk.msrb.mxu0 %vm184_vm3, %v688_v47  ;;  %2527 = vmatpush.xpose.msk.msrb.mxu1 %vm184_vm3, %v688_v47  ;;  %v610_v47 = vadd.f32 %v3218_v54, %v3154_v10  ;;  %v2574_v10 = vld [vmem:[%s425_s27] ss:$0 sm:$0xff]  ;;  %s4096_s27 = scalar_lea.vmem %s4180_s21, %s3025_s3 }
 0x355   : > { %1698 = vmatpush.msrb.mxu2 %v794_v57  ;;  %v514_v7 = vadd.f32 %v2574_v10, %v3161_v14  ;;  %v520_v14 = vadd.f32 %v2574_v10, %v3177_v24  ;;  %v532_v24 = vadd.f32 %v2574_v10, %v3201_v39  ;;  %v544_v39 = vadd.f32 %v2574_v10, %v3211_v53 }
 0x356   : > { %v679_v48 = vmul.f32 %v661_v34, %v610_v47  ;;  %v556_v53 = vadd.f32 %v2574_v10, %v3350_v55 }
 0x357   : > { %1699 = vmatpush.msrb.mxu2 %v793_v61  ;;  %v694_v61 = vmul.f32 %v3316_v21, %v655_v37  ;;  %v523_v21 = vadd.f32 %v2574_v10, %v3183_v27  ;;  %v535_v27 = vadd.f32 %v2574_v10, %v3205_v42  ;;  %v547_v42 = vadd.f32 %v2574_v10, %v3238_v3 }
 0x358   : > { %2420 = vmatpush.xpose.msk.msrb.mxu0 %vm184_vm3, %v687_v0  ;;  %2528 = vmatpush.xpose.msk.msrb.mxu1 %vm184_vm3, %v687_v0  ;;  %v3360_v51 = vpop.f32.mrf.mxu1  ;;  %v807_v0 = vld [vmem:[%s4212_s0] sm:$0xff] }
 0x359   : > { %1700 = vmatpush.msrb.mxu2 %v792_v4  ;;  %v657_v26 = vpop.f32.mrf.mxu2  ;;  %v559_v3 = vadd.f32 %v2574_v10, %v3360_v51 }
 0x35a   : > { %v658_v56 = vadd.f32 %v3218_v54, %v657_v26  ;;  %v517_v54 = vadd.f32 %v2574_v10, %v3169_v20  ;;  %v529_v20 = vadd.f32 %v2574_v10, %v3197_v35  ;;  %v541_v35 = vadd.f32 %v2574_v10, %v3209_v49 }
 0x35b   : > { %1701 = vmatpush.msrb.mxu2 %v791_v43  ;;  %v553_v49 = vadd.f32 %v2574_v10, %v3306_v59  ;;  %v810_v43 = vld [vmem:[%s4212_s0 + $0x18] sm:$0xff] }
 0x35c   : > { %2421 = vmatpush.xpose.msk.msrb.mxu0 %vm184_vm3, %v686_v5  ;;  %2529 = vmatpush.xpose.msk.msrb.mxu1 %vm184_vm3, %v686_v5  ;;  %v695_v57 = vmul.f32 %v3321_v44, %v658_v56  ;;  %v526_v44 = vadd.f32 %v2574_v10, %v3189_v31  ;;  %v538_v31 = vadd.f32 %v2574_v10, %v3207_v45 }
 0x35d   : > { %1702 = vmatpush.msrb.mxu2 %v790_v9  ;;  %v550_v45 = vadd.f32 %v2574_v10, %v3269_v63 }
 0x35f   : > { %1703 = vmatpush.msrb.mxu2 %v789_v13 }
 0x360   : > { %2422 = vmatpush.xpose.msk.msrb.mxu0 %vm184_vm3, %v685_v50  ;;  %2530 = vmatpush.xpose.msk.msrb.mxu1 %vm184_vm3, %v685_v50  ;;  %v3370_v30 = vpop.f32.mrf.mxu1  ;;  %v812_v50 = vld [vmem:[%s4212_s0 + $0x28] sm:$0xff] }
 0x361   : > { %v562_v59 = vadd.f32 %v2574_v10, %v3370_v30 }
 0x364   : > { %2423 = vmatpush.xpose.msk.msrb.mxu0 %vm184_vm3, %v684_v38  ;;  %2531 = vmatpush.xpose.msk.msrb.mxu1 %vm184_vm3, %v684_v38 }
 0x368   : > { %2424 = vmatpush.xpose.msk.msrb.mxu0 %vm184_vm3, %v683_v29  ;;  %2532 = vmatpush.xpose.msk.msrb.mxu1 %vm184_vm3, %v683_v29  ;;  %v564_v23 = vpop.f32.mrf.mxu1 }
 0x369   : > { %v3393_v60 = vadd.f32 %v2574_v10, %v564_v23 }
 0x36c   : > { %2425 = vmatpush.xpose.msk.msrb.mxu0 %vm184_vm3, %v682_v25  ;;  %2533 = vmatpush.xpose.msk.msrb.mxu1 %vm184_vm3, %v682_v25  ;;  %v814_v25 = vld [vmem:[%s4212_s0 + $0x38] sm:$0xff] }
 0x370   : > { %2426 = vmatpush.xpose.msk.msrb.mxu0 %vm184_vm3, %v681_v33  ;;  %2534 = vmatpush.xpose.msk.msrb.mxu1 %vm184_vm3, %v681_v33 }
 0x374   : > { %2427 = vmatpush.xpose.msk.msrb.mxu0 %vm184_vm3, %v680_v19  ;;  %2535 = vmatpush.xpose.msk.msrb.mxu1 %vm184_vm3, %v680_v19 }
 0x378   : > { %2428 = vmatpush.xpose.msk.msrb.mxu0 %vm184_vm3, %v679_v48  ;;  %2536 = vmatpush.xpose.msk.msrb.mxu1 %vm184_vm3, %v679_v48  ;;  %v815_v48 = vld [vmem:[%s4212_s0 + $0x40] sm:$0xff] }
 0x37c   : > { %2429 = vmatpush.xpose.msk.msrb.mxu0 %vm184_vm3, %v678_v58  ;;  %2537 = vmatpush.xpose.msk.msrb.mxu1 %vm184_vm3, %v678_v58 }
 0x37f   : > { %2430 = vmatmul.msk.f32.vlgmr.msrb.gmra.mxu0 %vm184_vm3, %v514_v7  ;;  %2447 = vmatmul.msk.f32.vlgmr.msrb.gmra.mxu1 %vm184_vm3, %v3393_v60 }
 0x380   : > { %2448 = vmatpush.xpose.msk.msra.mxu1 %vm184_vm3, %v695_v57 }
 0x384   : > { %2449 = vmatpush.xpose.msk.msra.mxu1 %vm184_vm3, %v694_v61  ;;  %v817_v61 = vld [vmem:[%s4212_s0 + $0x50] sm:$0xff] }
 0x387   : > { %2431 = vmatmul.msk.f32.gmra.mxu0 %vm184_vm3, %v517_v54  ;;  %2450 = vmatmul.msk.f32.vlgmr.msra.gmra.mxu1 %vm184_vm3, %v514_v7 }
 0x38f   : > { %2432 = vmatmul.msk.f32.gmra.mxu0 %vm184_vm3, %v520_v14  ;;  %2451 = vmatmul.msk.f32.gmra.mxu1 %vm184_vm3, %v517_v54 }
 0x397   : > { %2433 = vmatmul.msk.f32.gmra.mxu0 %vm184_vm3, %v523_v21  ;;  %2452 = vmatmul.msk.f32.gmra.mxu1 %vm184_vm3, %v520_v14 }
 0x39f   : > { %2434 = vmatmul.msk.f32.gmra.mxu0 %vm184_vm3, %v526_v44  ;;  %2453 = vmatmul.msk.f32.gmra.mxu1 %vm184_vm3, %v523_v21 }
 0x3a7   : > { %2435 = vmatmul.msk.f32.gmra.mxu0 %vm184_vm3, %v529_v20  ;;  %2454 = vmatmul.msk.f32.gmra.mxu1 %vm184_vm3, %v526_v44 }
 0x3af   : > { %2436 = vmatmul.msk.f32.gmra.mxu0 %vm184_vm3, %v532_v24  ;;  %2455 = vmatmul.msk.f32.gmra.mxu1 %vm184_vm3, %v529_v20 }
 0x3b7   : > { %2437 = vmatmul.msk.f32.gmra.mxu0 %vm184_vm3, %v535_v27  ;;  %2456 = vmatmul.msk.f32.gmra.mxu1 %vm184_vm3, %v532_v24 }
 0x3bf   : > { %2438 = vmatmul.msk.f32.gmra.mxu0 %vm184_vm3, %v538_v31  ;;  %2457 = vmatmul.msk.f32.gmra.mxu1 %vm184_vm3, %v535_v27  ;;  %v820_v27 = vld [vmem:[%s4212_s0 + $0x68] sm:$0xff] }
 0x3c7   : > { %2439 = vmatmul.msk.f32.gmra.mxu0 %vm184_vm3, %v541_v35  ;;  %2458 = vmatmul.msk.f32.gmra.mxu1 %vm184_vm3, %v538_v31  ;;  %v819_v31 = vld [vmem:[%s4212_s0 + $0x60] sm:$0xff] }
 0x3cf   : > { %2440 = vmatmul.msk.f32.gmra.mxu0 %vm184_vm3, %v544_v39  ;;  %2459 = vmatmul.msk.f32.gmra.mxu1 %vm184_vm3, %v541_v35 }
 0x3d7   : > { %2441 = vmatmul.msk.f32.gmra.mxu0 %vm184_vm3, %v547_v42  ;;  %2460 = vmatmul.msk.f32.gmra.mxu1 %vm184_vm3, %v544_v39 }
 0x3df   : > { %2442 = vmatmul.msk.f32.gmra.mxu0 %vm184_vm3, %v550_v45  ;;  %2461 = vmatmul.msk.f32.gmra.mxu1 %vm184_vm3, %v547_v42 }
 0x3e7   : > { %2443 = vmatmul.msk.f32.gmra.mxu0 %vm184_vm3, %v553_v49  ;;  %2462 = vmatmul.msk.f32.gmra.mxu1 %vm184_vm3, %v550_v45 }
 0x3ef   : > { %2444 = vmatmul.msk.f32.gmra.mxu0 %vm184_vm3, %v556_v53  ;;  %2463 = vmatmul.msk.f32.gmra.mxu1 %vm184_vm3, %v553_v49 }
 0x3f7   : > { %2445 = vmatmul.msk.f32.gmra.mxu0 %vm184_vm3, %v559_v3  ;;  %2464 = vmatmul.msk.f32.gmra.mxu1 %vm184_vm3, %v556_v53  ;;  %v822_v53 = vld [vmem:[%s4212_s0 + $0x78] sm:$0xff] }
 0x3fc   : > { %v968_v63 = vpop.f32.mrf.mxu0  ;;  %v3446_v46 = vpop.f32.mrf.mxu1 }
 0x3fd   : > { %v3459_v17 = vadd.f32 %v968_v63, %v807_v0 }
 0x3ff   : > { %2446 = vmatmul.msk.f32.gmra.mxu0 %vm184_vm3, %v562_v59  ;;  %2465 = vmatmul.msk.f32.gmra.mxu1 %vm184_vm3, %v559_v3  ;;  %v821_v3 = vld [vmem:[%s4212_s0 + $0x70] sm:$0xff] }
 0x404   : > { %v971_v1 = vpop.f32.mrf.mxu0  ;;  %v1039_v2 = vpop.f32.mrf.mxu1 }
 0x405   : > { %v3457_v4 = vadd.f32 %v1039_v2, %v808_v62  ;;  %v3473_v13 = vadd.f32 %v971_v1, %v809_v11 }
 0x407   : > { %2466 = vmatmul.msk.f32.gmra.mxu1 %vm184_vm3, %v562_v59  ;;  %v1094_v34 = vsel %vm1093_vm0, %v3457_v4, -inf }
 0x408   : > { %v1095_v41 = vmax.f32 %v3459_v17, %v1094_v34 }
 0x40a   : > { %1096 = vmax.xlane.f32.xlu0 %v1095_v41 }
 0x40c   : > { %v974_v5 = vpop.f32.mrf.mxu0  ;;  %v1042_v6 = vpop.f32.mrf.mxu1 }
 0x40d   : > { %v3471_v9 = vadd.f32 %v1042_v6, %v810_v43  ;;  %v3488_v51 = vadd.f32 %v974_v5, %v811_v32 }
 0x40f   : > { %2467 = vmatmul.msk.f32.gmra.mxu1 %vm184_vm3, %v3393_v60  ;;  %v1098_v8 = vsel %vm1093_vm0, %v3471_v9, -inf  ;;  %v818_v60 = vld [vmem:[%s4212_s0 + $0x58] sm:$0xff] }
 0x410   : > { %v1099_v55 = vmax.f32 %v3473_v13, %v1098_v8 }
 0x412   : > { %1100 = vmax.xlane.f32.xlu1 %v1099_v55 }
 0x414   : > { %v977_v38 = vpop.f32.mrf.mxu0  ;;  %v1045_v40 = vpop.f32.mrf.mxu1 }
 0x415   : > { %v3486_v29 = vadd.f32 %v1045_v40, %v812_v50  ;;  %v3501_v19 = vadd.f32 %v977_v38, %v813_v22 }
 0x417   : > { %v1102_v36 = vsel %vm1093_vm0, %v3486_v29, -inf }
 0x418   : > { %v1103_v52 = vmax.f32 %v3488_v51, %v1102_v36 }
 0x41a   : > { %1104 = vmax.xlane.f32.xlu2 %v1103_v52 }
 0x41c   : > { %v1048_v33 = vpop.f32.mrf.mxu1  ;;  %v980_v30 = vpop.f32.mrf.mxu0 }
 0x41d   : > { %v3499_v47 = vadd.f32 %v1048_v33, %v814_v25  ;;  %v3514_v58 = vadd.f32 %v980_v30, %v815_v48 }
 0x41f   : > { %v1106_v26 = vsel %vm1093_vm0, %v3499_v47, -inf }
 0x420   : > { %v1107_v56 = vmax.f32 %v3501_v19, %v1106_v26  ;;  %v823_v26 = vld [vmem:[%s4212_s0 + $0x80] sm:$0xff] }
 0x422   : > { %1108 = vmax.xlane.f32.xlu0 %v1107_v56 }
 0x424   : > { %v1051_v10 = vpop.f32.mrf.mxu1  ;;  %v983_v23 = vpop.f32.mrf.mxu0 }
 0x425   : > { %v3512_v57 = vadd.f32 %v1051_v10, %v816_v16  ;;  %v3527_v21 = vadd.f32 %v983_v23, %v817_v61  ;;  %v826_v61 = vld [vmem:[%s4212_s0 + $0x98] sm:$0xff] }
 0x427   : > { %v1110_v37 = vsel %vm1093_vm0, %v3512_v57, -inf }
 0x428   : > { %v1111_v7 = vmax.f32 %v3514_v58, %v1110_v37 }
 0x42a   : > { %1112 = vmax.xlane.f32.xlu1 %v1111_v7 }
 0x42c   : > { %v1054_v54 = vpop.f32.mrf.mxu1  ;;  %v986_v24 = vpop.f32.mrf.mxu0 }
 0x42d   : > { %v3525_v14 = vadd.f32 %v1054_v54, %v818_v60  ;;  %v3540_v42 = vadd.f32 %v986_v24, %v819_v31 }
 0x42f   : > { %v1114_v44 = vsel %vm1093_vm0, %v3525_v14, -inf }
 0x430   : > { %v1115_v20 = vmax.f32 %v3527_v21, %v1114_v44 }
 0x432   : > { %1116 = vmax.xlane.f32.xlu2 %v1115_v20 }
 0x434   : > { %v1057_v35 = vpop.f32.mrf.mxu1  ;;  %v989_v63 = vpop.f32.mrf.mxu0 }
 0x435   : > { %v3538_v39 = vadd.f32 %v1057_v35, %v820_v27  ;;  %v3553_v0 = vadd.f32 %v989_v63, %v821_v3  ;;  %v825_v27 = vld [vmem:[%s4212_s0 + $0x90] sm:$0xff] }
 0x437   : > { %v1118_v45 = vsel %vm1093_vm0, %v3538_v39, -inf }
 0x438   : > { %v1119_v49 = vmax.f32 %v3540_v42, %v1118_v45 }
 0x43a   : > { %1120 = vmax.xlane.f32.xlu0 %v1119_v49 }
 0x43c   : > { %v1060_v59 = vpop.f32.mrf.mxu1  ;;  %v992_v43 = vpop.f32.mrf.mxu0 }
 0x43d   : > { %v3551_v62 = vadd.f32 %v1060_v59, %v822_v53  ;;  %v3585_v60 = vadd.f32 %v992_v43, %v823_v26 }
 0x43f   : > { %v1122_v1 = vsel %vm1093_vm0, %v3551_v62, -inf }
 0x440   : > { %v1123_v2 = vmax.f32 %v3553_v0, %v1122_v1 }
 0x442   : > { %1124 = vmax.xlane.f32.xlu2 %v1123_v2  ;;  %v828_v2 = vld [vmem:[%s4212_s0 + $0xa8] sm:$0xff] }
 0x444   : > { %v1063_v34 = vpop.f32.mrf.mxu1  ;;  %v995_v36 = vpop.f32.mrf.mxu0 }
 0x445   : > { %v3607_v1 = vadd.f32 %v995_v36, %v825_v27 }
 0x44c   : > { %v1066_v55 = vpop.f32.mrf.mxu1  ;;  %v998_v54 = vpop.f32.mrf.mxu0 }
 0x44d   : > { %v3594_v20 = vadd.f32 %v1066_v55, %v826_v61 }
 0x44f   : > { %v1130_v63 = vsel %vm1093_vm0, %v3594_v20, -inf }
 0x47d   : > { %v1097_v41 = vpop.xlane.xlu0 %1096 }
 0x47e   : > { %v1166_v11 = vsub.f32 %v3459_v17, %v1097_v41  ;;  %v1167_v5 = vsub.f32 %v3457_v4, %v1097_v41  ;;  %v824_v4 = vld [vmem:[%s4212_s0 + $0x88] sm:$0xff]  ;;  %v1001_v41 = vpop.f32.mrf.mxu0 }
 0x47f   : > { %v3572_v33 = vadd.f32 %v1063_v34, %v824_v4  ;;  %v1131_v34 = vmax.f32 %v3607_v1, %v1130_v63 }
 0x480   : > { %v1202_v6 = vmul.f32 1.442695, %v1166_v11  ;;  %v1204_v8 = vmul.f32 1.442695, %v1167_v5  ;;  %v827_v5 = vld [vmem:[%s4212_s0 + $0xa0] sm:$0xff] }
 0x481   : > { %v1126_v37 = vsel %vm1093_vm0, %v3572_v33, -inf }
 0x482   : > { %2590 = vpow2.f32 %v1202_v6  ;;  %v1127_v44 = vmax.f32 %v3585_v60, %v1126_v37 }
 0x483   : > { %2592 = vpow2.f32 %v1204_v8 }
 0x485   : > { %v1101_v50 = vpop.xlane.xlu1 %1100 }
 0x486   : > { %v1168_v32 = vsub.f32 %v3473_v13, %v1101_v50  ;;  %v1169_v38 = vsub.f32 %v3471_v9, %v1101_v50  ;;  %v1069_v9 = vpop.f32.mrf.mxu1  ;;  %v1004_v26 = vpop.f32.mrf.mxu0 }
 0x487   : > { %v3616_v43 = vadd.f32 %v1069_v9, %v828_v2 }
 0x488   : > { %v3562_v40 = vpop.eup %2590  ;;  %v1206_v52 = vmul.f32 1.442695, %v1168_v32  ;;  %v1208_v25 = vmul.f32 1.442695, %v1169_v38 }
 0x489   : > { %v3564_v22 = vpop.eup %2592  ;;  %v1134_v38 = vsel %vm1093_vm0, %v3616_v43, -inf }
 0x48a   : > { %2594 = vpow2.f32 %v1206_v52  ;;  %v1274_v17 = vsel %vm1093_vm0, %v3564_v22, 0.0  ;;  %v3629_v52 = vadd.f32 %v998_v54, %v827_v5 }
 0x48b   : > { %2596 = vpow2.f32 %v1208_v25  ;;  %v1275_v13 = vadd.f32 %v3562_v40, %v1274_v17  ;;  %v830_v25 = vld [vmem:[%s4212_s0 + $0xb8] sm:$0xff] }
 0x48d   : > { %1276 = vadd.xlane.f32.xlu1 %v1275_v13  ;;  %v1105_v30 = vpop.xlane.xlu2 %1104 }
 0x48e   : > { %v1170_v56 = vsub.f32 %v3488_v51, %v1105_v30  ;;  %v1171_v16 = vsub.f32 %v3486_v29, %v1105_v30  ;;  %v1072_v45 = vpop.f32.mrf.mxu1  ;;  %v829_v30 = vld [vmem:[%s4212_s0 + $0xb0] sm:$0xff]  ;;  %v1007_v63 = vpop.f32.mrf.mxu0 }
 0x48f   : > { %v3638_v13 = vadd.f32 %v1072_v45, %v830_v25 }
 0x490   : > { %v3579_v48 = vpop.eup %2594  ;;  %v1210_v10 = vmul.f32 1.442695, %v1170_v56  ;;  %v1212_v23 = vmul.f32 1.442695, %v1171_v16 }
 0x491   : > { %v3583_v7 = vpop.eup %2596  ;;  %v1138_v61 = vsel %vm1093_vm0, %v3638_v13, -inf }
 0x492   : > { %2598 = vpow2.f32 %v1210_v10  ;;  %v1278_v29 = vsel %vm1093_vm0, %v3583_v7, 0.0 }
 0x493   : > { %2600 = vpow2.f32 %v1212_v23  ;;  %v1279_v51 = vadd.f32 %v3579_v48, %v1278_v29  ;;  %v3651_v29 = vadd.f32 %v1001_v41, %v829_v30 }
 0x495   : > { %1280 = vadd.xlane.f32.xlu0 %v1279_v51  ;;  %1128 = vmax.xlane.f32.xlu1 %v1127_v44  ;;  %v1109_v24 = vpop.xlane.xlu0 %1108  ;;  %v832_v51 = vld [vmem:[%s4212_s0 + $0xc8] sm:$0xff] }
 0x496   : > { %v1172_v31 = vsub.f32 %v3501_v19, %v1109_v24  ;;  %v1173_v35 = vsub.f32 %v3499_v47, %v1109_v24  ;;  %v1075_v4 = vpop.f32.mrf.mxu1  ;;  %v1139_v24 = vmax.f32 %v3651_v29, %v1138_v61 }
 0x497   : > { %v3660_v27 = vadd.f32 %v1075_v4, %v832_v51 }
 0x498   : > { %v3601_v49 = vpop.eup %2598  ;;  %v1214_v53 = vmul.f32 1.442695, %v1172_v31  ;;  %v1216_v3 = vmul.f32 1.442695, %v1173_v35  ;;  %v831_v35 = vld [vmem:[%s4212_s0 + $0xc0] sm:$0xff] }
 0x499   : > { %v3605_v59 = vpop.eup %2600  ;;  %v3673_v41 = vadd.f32 %v1004_v26, %v831_v35  ;;  %v836_v26 = vld [vmem:[%s4212_s0 + $0xe8] sm:$0xff] }
 0x49a   : > { %2602 = vpow2.f32 %v1214_v53  ;;  %v1282_v47 = vsel %vm1093_vm0, %v3605_v59, 0.0 }
 0x49b   : > { %2604 = vpow2.f32 %v1216_v3  ;;  %v1283_v19 = vadd.f32 %v3601_v49, %v1282_v47 }
 0x49d   : > { %1284 = vadd.xlane.f32.xlu2 %v1283_v19  ;;  %1132 = vmax.xlane.f32.xlu0 %v1131_v34  ;;  %v1113_v11 = vpop.xlane.xlu1 %1112  ;;  %v1142_v19 = vsel %vm1093_vm0, %v3660_v27, -inf }
 0x49e   : > { %v1174_v6 = vsub.f32 %v3514_v58, %v1113_v11  ;;  %v1175_v8 = vsub.f32 %v3512_v57, %v1113_v11  ;;  %v1135_v58 = vmax.f32 %v3629_v52, %v1134_v38  ;;  %v834_v11 = vld [vmem:[%s4212_s0 + $0xd8] sm:$0xff]  ;;  %v1143_v5 = vmax.f32 %v3673_v41, %v1142_v19 }
 0x4a0   : > { %v3623_v55 = vpop.eup %2602  ;;  %v1218_v50 = vmul.f32 1.442695, %v1174_v6  ;;  %v1220_v32 = vmul.f32 1.442695, %v1175_v8 }
 0x4a1   : > { %v3627_v36 = vpop.eup %2604 }
 0x4a2   : > { %2606 = vpow2.f32 %v1218_v50  ;;  %v1286_v57 = vsel %vm1093_vm0, %v3627_v36, 0.0 }
 0x4a3   : > { %2608 = vpow2.f32 %v1220_v32  ;;  %v1287_v17 = vadd.f32 %v3623_v55, %v1286_v57  ;;  %v833_v32 = vld [vmem:[%s4212_s0 + $0xd0] sm:$0xff] }
 0x4a4   : > { %v3695_v30 = vadd.f32 %v1007_v63, %v833_v32 }
 0x4a5   : > { %1136 = vmax.xlane.f32.xlu2 %v1135_v58  ;;  %1288 = vadd.xlane.f32.xlu1 %v1287_v17  ;;  %v1117_v9 = vpop.xlane.xlu2 %1116 }
 0x4a6   : > { %v1176_v56 = vsub.f32 %v3527_v21, %v1117_v9  ;;  %v1177_v16 = vsub.f32 %v3525_v14, %v1117_v9  ;;  %v1078_v14 = vpop.f32.mrf.mxu1 }
 0x4a7   : > { %v3682_v6 = vadd.f32 %v1078_v14, %v834_v11  ;;  %v840_v11 = vld [vmem:[%s4212_s0 + $0x108] sm:$0xff] }
 0x4a8   : > { %v3645_v10 = vpop.eup %2606  ;;  %v1222_v23 = vmul.f32 1.442695, %v1176_v56  ;;  %v1224_v37 = vmul.f32 1.442695, %v1177_v16  ;;  %v1010_v56 = vpop.f32.mrf.mxu0 }
 0x4a9   : > { %v3649_v54 = vpop.eup %2608  ;;  %v1146_v17 = vsel %vm1093_vm0, %v3682_v6, -inf }
 0x4aa   : > { %2610 = vpow2.f32 %v1222_v23  ;;  %v1290_v21 = vsel %vm1093_vm0, %v3649_v54, 0.0 }
 0x4ab   : > { %2612 = vpow2.f32 %v1224_v37  ;;  %v1291_v44 = vadd.f32 %v3645_v10, %v1290_v21  ;;  %v835_v37 = vld [vmem:[%s4212_s0 + $0xe0] sm:$0xff] }
 0x4ad   : > { %1292 = vadd.xlane.f32.xlu0 %v1291_v44  ;;  %1140 = vmax.xlane.f32.xlu1 %v1139_v24  ;;  %v1121_v31 = vpop.xlane.xlu0 %1120  ;;  %v3715_v44 = vadd.f32 %v1010_v56, %v835_v37  ;;  %v838_v24 = vld [vmem:[%s4212_s0 + $0xf8] sm:$0xff] }
 0x4ae   : > { %v1178_v45 = vsub.f32 %v3540_v42, %v1121_v31  ;;  %v1179_v53 = vsub.f32 %v3538_v39, %v1121_v31  ;;  %v1081_v8 = vpop.f32.mrf.mxu1 }
 0x4af   : > { %v3704_v23 = vadd.f32 %v1081_v8, %v836_v26  ;;  %v839_v8 = vld [vmem:[%s4212_s0 + $0x100] sm:$0xff] }
 0x4b0   : > { %v3667_v3 = vpop.eup %2610  ;;  %v1226_v2 = vmul.f32 1.442695, %v1178_v45  ;;  %v1228_v47 = vmul.f32 1.442695, %v1179_v53  ;;  %v1013_v53 = vpop.f32.mrf.mxu0 }
 0x4b1   : > { %v3671_v34 = vpop.eup %2612  ;;  %v1150_v21 = vsel %vm1093_vm0, %v3704_v23, -inf }
 0x4b2   : > { %2614 = vpow2.f32 %v1226_v2  ;;  %v1294_v39 = vsel %vm1093_vm0, %v3671_v34, 0.0  ;;  %v1151_v45 = vmax.f32 %v3715_v44, %v1150_v21  ;;  %v837_v2 = vld [vmem:[%s4212_s0 + $0xf0] sm:$0xff] }
 0x4b3   : > { %2616 = vpow2.f32 %v1228_v47  ;;  %v1295_v42 = vadd.f32 %v3667_v3, %v1294_v39  ;;  %v3731_v19 = vadd.f32 %v1013_v53, %v837_v2 }
 0x4b5   : > { %1296 = vadd.xlane.f32.xlu2 %v1295_v42  ;;  %1144 = vmax.xlane.f32.xlu0 %v1143_v5  ;;  %v1125_v50 = vpop.xlane.xlu2 %1124 }
 0x4b6   : > { %v1180_v38 = vsub.f32 %v3553_v0, %v1125_v50  ;;  %v1181_v25 = vsub.f32 %v3551_v62, %v1125_v50  ;;  %v1147_v0 = vmax.f32 %v3695_v30, %v1146_v17  ;;  %v1084_v61 = vpop.f32.mrf.mxu1 }
 0x4b7   : > { %v3724_v63 = vadd.f32 %v1084_v61, %v838_v24 }
 0x4b8   : > { %v3689_v4 = vpop.eup %2614  ;;  %v1230_v57 = vmul.f32 1.442695, %v1180_v38  ;;  %v1232_v58 = vmul.f32 1.442695, %v1181_v25  ;;  %v1016_v50 = vpop.f32.mrf.mxu0 }
 0x4b9   : > { %v3693_v9 = vpop.eup %2616  ;;  %v1154_v47 = vsel %vm1093_vm0, %v3724_v63, -inf  ;;  %v3744_v38 = vadd.f32 %v1016_v50, %v839_v8 }
 0x4ba   : > { %2618 = vpow2.f32 %v1230_v57  ;;  %v1298_v62 = vsel %vm1093_vm0, %v3693_v9, 0.0  ;;  %v1155_v42 = vmax.f32 %v3731_v19, %v1154_v47 }
 0x4bb   : > { %2620 = vpow2.f32 %v1232_v58  ;;  %v1299_v16 = vadd.f32 %v3689_v4, %v1298_v62 }
 0x4bd   : > { %1148 = vmax.xlane.f32.xlu2 %v1147_v0  ;;  %1300 = vadd.xlane.f32.xlu1 %v1299_v16 }
 0x4be   : > { %v1087_v39 = vpop.f32.mrf.mxu1 }
 0x4bf   : > { %v3737_v5 = vadd.f32 %v1087_v39, %v840_v11 }
 0x4c0   : > { %v3709_v51 = vpop.eup %2618 }
 0x4c1   : > { %v3713_v14 = vpop.eup %2620  ;;  %v1158_v32 = vsel %vm1093_vm0, %v3737_v5, -inf }
 0x4c2   : > { %v1302_v31 = vsel %vm1093_vm0, %v3713_v14, 0.0  ;;  %v1159_v25 = vmax.f32 %v3744_v38, %v1158_v32 }
 0x4c3   : > { %v1303_v35 = vadd.f32 %v3709_v51, %v1302_v31 }
 0x4c5   : > { %1304 = vadd.xlane.f32.xlu0 %v1303_v35  ;;  %1152 = vmax.xlane.f32.xlu1 %v1151_v45 }
 0x4cd   : > { %1156 = vmax.xlane.f32.xlu0 %v1155_v42 }
 0x4d5   : > { %1160 = vmax.xlane.f32.xlu0 %v1159_v25 }
 0x500   : > { %v1277_v57 = vpop.xlane.xlu1 %1276 }
 0x501   : > { %2622 = vrcp.f32 %v1277_v57  ;;  %v1357_v37 = vand.u32 2147483648, %v1277_v57  ;;  %v1355_v31 = vand.u32 2147483647, %v1277_v57  ;;  %vm1351_vm4 = vweird.f32 %v1277_v57 }
 0x503   : > { %v1358_v53 = vor.u32 1.1754944e-38, %v1357_v37  ;;  %vm1356_vm6 = vcmp.eq.f32.partialorder %v1355_v31, 8.507059e+37 }
 0x507   : > { %v2623_v58 = vpop.eup %2622 }
 0x508   : > { %v1347_v17 = vmul.f32 %v2623_v58, %v1277_v57  ;;  %v1129_v26 = vpop.xlane.xlu1 %1128  ;;  %v1281_v56 = vpop.xlane.xlu0 %1280  ;;  %vm1352_vm1 = vweird.f32 %v2623_v58 }
 0x509   : > { %v1182_v62 = vsub.f32 %v3585_v60, %v1129_v26  ;;  %v1183_v0 = vsub.f32 %v3572_v33, %v1129_v26  ;;  %2624 = vrcp.f32 %v1281_v56  ;;  %vm1353_vm5 = vmor %vm1351_vm4, %vm1352_vm1  ;;  %v1371_v26 = vand.u32 2147483648, %v1281_v56 }
 0x50a   : > { %v1348_v16 = vsub.f32 1.0, %v1347_v17  ;;  %vm1365_vm8 = vweird.f32 %v1281_v56 }
 0x50b   : > { %v1234_v61 = vmul.f32 1.442695, %v1182_v62  ;;  %v1236_v21 = vmul.f32 1.442695, %v1183_v0 }
 0x50c   : > { %v1349_v24 = vmul.f32 %v2623_v58, %v1348_v16  ;;  %v1372_v16 = vor.u32 1.1754944e-38, %v1371_v26 }
 0x50d   : > { %2626 = vpow2.f32 %v1234_v61 }
 0x50e   : > { %2628 = vpow2.f32 %v1236_v21  ;;  %v1350_v35 = vadd.f32 %v2623_v58, %v1349_v24 }
 0x50f   : > { %v2625_v45 = vpop.eup %2624 }
 0x510   : > { %v1361_v2 = vmul.f32 %v2625_v45, %v1281_v56  ;;  %v3749_v47 = vpop.xlane.xlu2 %1284  ;;  %v1133_v60 = vpop.xlane.xlu0 %1132  ;;  %v1354_v33 = vsel %vm1353_vm5, %v2623_v58, %v1350_v35  ;;  %vm1366_vm7 = vweird.f32 %v2625_v45 }
 0x511   : > { %2630 = vrcp.f32 %v3749_v47  ;;  %v1184_v11 = vsub.f32 %v3607_v1, %v1133_v60  ;;  %v1185_v39 = vsub.f32 %v3594_v20, %v1133_v60  ;;  %v1359_v42 = vsel %vm1356_vm6, %v1358_v53, %v1354_v33  ;;  %vm1367_vm10 = vmor %vm1365_vm8, %vm1366_vm7 }
 0x512   : > { %v1362_v8 = vsub.f32 1.0, %v1361_v2  ;;  %v1598_v50 = vmul.f32 %v3562_v40, %v1359_v42  ;;  %v1599_v32 = vmul.f32 %v3564_v22, %v1359_v42  ;;  %v1369_v1 = vand.u32 2147483647, %v1281_v56 }
 0x513   : > { %v3756_v25 = vpop.eup %2626  ;;  %v1238_v57 = vmul.f32 1.442695, %v1184_v11  ;;  %v1240_v17 = vmul.f32 1.442695, %v1185_v39  ;;  %v1385_v42 = vand.u32 2147483648, %v3749_v47  ;;  %vm1379_vm13 = vweird.f32 %v3749_v47 }
 0x514   : > { %v3758_v62 = vpop.eup %2628  ;;  %v1363_v58 = vmul.f32 %v2625_v45, %v1362_v8  ;;  %1704 = vmatmul.f32.vlgmr.msrb.gmra.mxu2 %v1598_v50  ;;  %2468 = vmatmul.msk.f32.vlgmr.msrb.gmra.mxu3 %vm1093_vm0, %v1599_v32  ;;  %vm1370_vm11 = vcmp.eq.f32.partialorder %v1369_v1, 8.507059e+37 }
 0x515   : > { %2632 = vpow2.f32 %v1238_v57  ;;  %v1306_v20 = vsel %vm1093_vm0, %v3758_v62, 0.0  ;;  %v1386_v32 = vor.u32 1.1754944e-38, %v1385_v42 }
 0x516   : > { %2634 = vpow2.f32 %v1240_v17  ;;  %v1307_v40 = vadd.f32 %v3756_v25, %v1306_v20  ;;  %v1364_v22 = vadd.f32 %v2625_v45, %v1363_v58 }
 0x517   : > { %v2631_v0 = vpop.eup %2630 }
 0x518   : > { %v1375_v37 = vmul.f32 %v2631_v0, %v3749_v47  ;;  %1308 = vadd.xlane.f32.xlu2 %v1307_v40  ;;  %v1137_v61 = vpop.xlane.xlu2 %1136  ;;  %v3765_v21 = vpop.xlane.xlu1 %1288  ;;  %v1368_v24 = vsel %vm1367_vm10, %v2625_v45, %v1364_v22  ;;  %vm1380_vm12 = vweird.f32 %v2631_v0 }
 0x519   : > { %v1186_v31 = vsub.f32 %v3629_v52, %v1137_v61  ;;  %v1187_v35 = vsub.f32 %v3616_v43, %v1137_v61  ;;  %2636 = vrcp.f32 %v3765_v21  ;;  %v1373_v53 = vsel %vm1370_vm11, %v1372_v16, %v1368_v24  ;;  %vm1381_vm14 = vmor %vm1379_vm13, %vm1380_vm12  ;;  %v1090_v22 = vpop.f32.mrf.mxu1 }
 0x51a   : > { %v1376_v2 = vsub.f32 1.0, %v1375_v37  ;;  %v1600_v56 = vmul.f32 %v3579_v48, %v1373_v53  ;;  %v1601_v60 = vmul.f32 %v3583_v7, %v1373_v53  ;;  %v1383_v43 = vand.u32 2147483647, %v3749_v47  ;;  %v842_v47 = vld [vmem:[%s4212_s0 + $0x118] sm:$0xff] }
 0x51b   : > { %v3772_v33 = vpop.eup %2632  ;;  %v1242_v11 = vmul.f32 1.442695, %v1186_v31  ;;  %v1244_v39 = vmul.f32 1.442695, %v1187_v35  ;;  %v1397_v53 = vand.u32 2147483647, %v3765_v21  ;;  %vm1393_vm5 = vweird.f32 %v3765_v21 }
 0x51c   : > { %v3775_v45 = vpop.eup %2634  ;;  %v1377_v8 = vmul.f32 %v2631_v0, %v1376_v2  ;;  %1707 = vmatmul.f32.gmra.mxu2 %v1600_v56  ;;  %2469 = vmatmul.msk.f32.gmra.mxu3 %vm1093_vm0, %v1601_v60  ;;  %vm1384_vm1 = vcmp.eq.f32.partialorder %v1383_v43, 8.507059e+37  ;;  %v3801_v2 = vadd.f32 %v1090_v22, %v842_v47 }
 0x51d   : > { %2638 = vpow2.f32 %v1242_v11  ;;  %v1310_v48 = vsel %vm1093_vm0, %v3775_v45, 0.0  ;;  %vm1398_vm7 = vcmp.eq.f32.partialorder %v1397_v53, 8.507059e+37 }
 0x51e   : > { %2640 = vpow2.f32 %v1244_v39  ;;  %v1311_v7 = vadd.f32 %v3772_v33, %v1310_v48  ;;  %v1378_v52 = vadd.f32 %v2631_v0, %v1377_v8  ;;  %v841_v39 = vld [vmem:[%s4212_s0 + $0x110] sm:$0xff]  ;;  %s4031_s0 = scalar_lea.vmem %s4178_s19, %s2496_s28  ;;  %s2185_s28 = scalar_lea.vmem %s4181_s22, %s2764_s1 }
 0x51f   : > { %v2637_v50 = vpop.eup %2636  ;;  %s176_s1 = sadd.s32 1, %s2764_s1  }
 0x520   : > { %v1389_v57 = vmul.f32 %v2637_v50, %v3765_v21  ;;  %1312 = vadd.xlane.f32.xlu1 %v1311_v7  ;;  %v1141_v17 = vpop.xlane.xlu1 %1140  ;;  %v3784_v26 = vpop.xlane.xlu0 %1292  ;;  %v1382_v58 = vsel %vm1381_vm14, %v2631_v0, %v1378_v52  ;;  %vm1394_vm4 = vweird.f32 %v2637_v50  ;;  %p173_p0 = scmp.ge.s32.totalorder %s176_s1, 4  }
 0x521   : > { %v1188_v1 = vsub.f32 %v3651_v29, %v1141_v17  ;;  %v1189_v20 = vsub.f32 %v3638_v13, %v1141_v17  ;;  %2642 = vrcp.f32 %v3784_v26  ;;  %v1387_v40 = vsel %vm1384_vm1, %v1386_v32, %v1382_v58  ;;  %vm1395_vm6 = vmor %vm1393_vm5, %vm1394_vm4  ;;  %s4217_s3 = sld [smem:[#allocation11_spill]] (%p173_p0)  ;;  %s2767_s14 = smov (%p173_p0), [#allocation2]  }
 0x522   : > { %v1390_v16 = vsub.f32 1.0, %v1389_v57  ;;  %v1602_v37 = vmul.f32 %v3601_v49, %v1387_v40  ;;  %v1603_v61 = vmul.f32 %v3605_v59, %v1387_v40  ;;  %v1399_v29 = vand.u32 2147483648, %v3765_v21  ;;  %s2268_s16 = sshll.u32 (%p173_p0), %s2767_s14, 4  ;;  %s2270_s19 = sshll.u32 (%p173_p0), %s4184_s25, 4  ;;  %s2269_s16 = int_to_ptr.vmem [resolvable:$true] %s2268_s16  ;;  %s2271_s19 = int_to_ptr.hbm [resolvable:$true] %s2270_s19 }
 0x523   : > { %v3794_v24 = vpop.eup %2638  ;;  %v1246_v0 = vmul.f32 1.442695, %v1188_v1  ;;  %v1248_v31 = vmul.f32 1.442695, %v1189_v20  ;;  %v1162_v58 = vsel %vm1093_vm0, %v3801_v2, -inf  ;;  %vm1407_vm10 = vweird.f32 %v3784_v26 }
 0x524   : > { %v3797_v13 = vpop.eup %2640  ;;  %v1391_v35 = vmul.f32 %v2637_v50, %v1390_v16  ;;  %1710 = vmatmul.f32.gmra.mxu2 %v1602_v37  ;;  %2470 = vmatmul.msk.f32.gmra.mxu3 %vm1093_vm0, %v1603_v61  ;;  %v1400_v11 = vor.u32 1.1754944e-38, %v1399_v29 }
 0x525   : > { %2644 = vpow2.f32 %v1246_v0  ;;  %v1314_v49 = vsel %vm1093_vm0, %v3797_v13, 0.0 }
 0x526   : > { %2646 = vpow2.f32 %v1248_v31  ;;  %v1315_v59 = vadd.f32 %v3794_v24, %v1314_v49  ;;  %v1392_v56 = vadd.f32 %v2637_v50, %v1391_v35 }
 0x527   : > { %v2643_v60 = vpop.eup %2642 }
 0x528   : > { %v1403_v42 = vmul.f32 %v2643_v60, %v3784_v26  ;;  %1316 = vadd.xlane.f32.xlu2 %v1315_v59  ;;  %v3811_v8 = vpop.xlane.xlu2 %1296  ;;  %v1145_v43 = vpop.xlane.xlu0 %1144  ;;  %v1396_v48 = vsel %vm1395_vm6, %v2637_v50, %v1392_v56  ;;  %v3823_v50 = vadd.f32 %v3446_v46, %v841_v39  ;;  %vm1408_vm8 = vweird.f32 %v2643_v60 }
 0x529   : > { %2648 = vrcp.f32 %v3811_v8  ;;  %v1190_v7 = vsub.f32 %v3673_v41, %v1145_v43  ;;  %v1191_v21 = vsub.f32 %v3660_v27, %v1145_v43  ;;  %v1401_v52 = vsel %vm1398_vm7, %v1400_v11, %v1396_v48  ;;  %vm1409_vm11 = vmor %vm1407_vm10, %vm1408_vm8 }
 0x52a   : > { %v1404_v32 = vsub.f32 1.0, %v1403_v42  ;;  %v1604_v57 = vmul.f32 %v3623_v55, %v1401_v52  ;;  %v1605_v17 = vmul.f32 %v3627_v36, %v1401_v52  ;;  %v1413_v55 = vand.u32 2147483648, %v3784_v26 }
 0x52b   : > { %v3820_v1 = vpop.eup %2644  ;;  %v1250_v20 = vmul.f32 1.442695, %v1190_v7  ;;  %v1252_v40 = vmul.f32 1.442695, %v1191_v21  ;;  %v1163_v27 = vmax.f32 %v3823_v50, %v1162_v58  ;;  %v1411_v46 = vand.u32 2147483647, %v3784_v26 }
 0x52c   : > { %v3825_v47 = vpop.eup %2646  ;;  %v1405_v41 = vmul.f32 %v2643_v60, %v1404_v32  ;;  %1713 = vmatmul.f32.gmra.mxu2 %v1604_v57  ;;  %2471 = vmatmul.msk.f32.gmra.mxu3 %vm1093_vm0, %v1605_v17  ;;  %v1414_v35 = vor.u32 1.1754944e-38, %v1413_v55  ;;  %v1425_v7 = vand.u32 2147483647, %v3811_v8  ;;  %vm1421_vm14 = vweird.f32 %v3811_v8 }
 0x52d   : > { %2650 = vpow2.f32 %v1250_v20  ;;  %v1318_v36 = vsel %vm1093_vm0, %v3825_v47, 0.0  ;;  %vm1412_vm12 = vcmp.eq.f32.partialorder %v1411_v46, 8.507059e+37 }
 0x52e   : > { %2652 = vpow2.f32 %v1252_v40  ;;  %v1319_v22 = vadd.f32 %v3820_v1, %v1318_v36  ;;  %v1406_v16 = vadd.f32 %v2643_v60, %v1405_v41  ;;  %vm1426_vm4 = vcmp.eq.f32.partialorder %v1425_v7, 8.507059e+37 }
 0x52f   : > { %v2649_v37 = vpop.eup %2648 }
 0x530   : > { %v1417_v61 = vmul.f32 %v2649_v37, %v3811_v8  ;;  %1320 = vadd.xlane.f32.xlu1 %v1319_v22  ;;  %1164 = vmax.xlane.f32.xlu2 %v1163_v27  ;;  %v1149_v0 = vpop.xlane.xlu2 %1148  ;;  %v3836_v31 = vpop.xlane.xlu1 %1300  ;;  %v1410_v29 = vsel %vm1409_vm11, %v2643_v60, %v1406_v16  ;;  %vm1422_vm13 = vweird.f32 %v2649_v37 }
 0x531   : > { %v1192_v53 = vsub.f32 %v3695_v30, %v1149_v0  ;;  %v1193_v49 = vsub.f32 %v3682_v6, %v1149_v0  ;;  %2654 = vrcp.f32 %v3836_v31  ;;  %v1415_v26 = vsel %vm1412_vm12, %v1414_v35, %v1410_v29  ;;  %vm1423_vm1 = vmor %vm1421_vm14, %vm1422_vm13 }
 0x532   : > { %v1418_v59 = vsub.f32 1.0, %v1417_v61  ;;  %v1606_v42 = vmul.f32 %v3645_v10, %v1415_v26  ;;  %v1607_v43 = vmul.f32 %v3649_v54, %v1415_v26  ;;  %v1427_v30 = vand.u32 2147483648, %v3811_v8 }
 0x533   : > { %v3841_v56 = vpop.eup %2650  ;;  %v1254_v11 = vmul.f32 1.442695, %v1192_v53  ;;  %v1256_v39 = vmul.f32 1.442695, %v1193_v49  ;;  %v1441_v8 = vand.u32 2147483648, %v3836_v31  ;;  %vm1435_vm6 = vweird.f32 %v3836_v31 }
 0x534   : > { %v3845_v48 = vpop.eup %2652  ;;  %v1419_v60 = vmul.f32 %v2649_v37, %v1418_v59  ;;  %1716 = vmatmul.f32.gmra.mxu2 %v1606_v42  ;;  %2472 = vmatmul.msk.f32.gmra.mxu3 %vm1093_vm0, %v1607_v43  ;;  %v1428_v58 = vor.u32 1.1754944e-38, %v1427_v30 }
 0x535   : > { %2656 = vpow2.f32 %v1254_v11  ;;  %v1322_v6 = vsel %vm1093_vm0, %v3845_v48, 0.0  ;;  %v1442_v29 = vor.u32 1.1754944e-38, %v1441_v8 }
 0x536   : > { %2658 = vpow2.f32 %v1256_v39  ;;  %v1323_v10 = vadd.f32 %v3841_v56, %v1322_v6  ;;  %v1420_v21 = vadd.f32 %v2649_v37, %v1419_v60 }
 0x537   : > { %v2655_v54 = vpop.eup %2654 }
 0x538   : > { %v1431_v52 = vmul.f32 %v2655_v54, %v3836_v31  ;;  %1324 = vadd.xlane.f32.xlu0 %v1323_v10  ;;  %v1153_v32 = vpop.xlane.xlu1 %1152  ;;  %v3855_v57 = vpop.xlane.xlu0 %1304  ;;  %v1424_v17 = vsel %vm1423_vm1, %v2649_v37, %v1420_v21  ;;  %vm1436_vm5 = vweird.f32 %v2655_v54 }
 0x539   : > { %v1194_v20 = vsub.f32 %v3715_v44, %v1153_v32  ;;  %v1195_v40 = vsub.f32 %v3704_v23, %v1153_v32  ;;  %2660 = vrcp.f32 %v3855_v57  ;;  %v1429_v55 = vsel %vm1426_vm4, %v1428_v58, %v1424_v17  ;;  %vm1437_vm7 = vmor %vm1435_vm6, %vm1436_vm5 }
 0x53a   : > { %v1432_v41 = vsub.f32 1.0, %v1431_v52  ;;  %v1608_v22 = vmul.f32 %v3667_v3, %v1429_v55  ;;  %v1609_v16 = vmul.f32 %v3671_v34, %v1429_v55  ;;  %v1439_v23 = vand.u32 2147483647, %v3836_v31 }
 0x53b   : > { %v3861_v36 = vpop.eup %2656  ;;  %v1258_v27 = vmul.f32 1.442695, %v1194_v20  ;;  %v1260_v46 = vmul.f32 1.442695, %v1195_v40  ;;  %v1455_v60 = vand.u32 2147483648, %v3855_v57  ;;  %vm1449_vm11 = vweird.f32 %v3855_v57 }
 0x53c   : > { %v3865_v37 = vpop.eup %2658  ;;  %v1433_v44 = vmul.f32 %v2655_v54, %v1432_v41  ;;  %1719 = vmatmul.f32.gmra.mxu2 %v1608_v22  ;;  %2473 = vmatmul.msk.f32.gmra.mxu3 %vm1093_vm0, %v1609_v16  ;;  %vm1440_vm8 = vcmp.eq.f32.partialorder %v1439_v23, 8.507059e+37 }
 0x53d   : > { %2662 = vpow2.f32 %v1258_v27  ;;  %v1326_v61 = vsel %vm1093_vm0, %v3865_v37, 0.0  ;;  %v1456_v21 = vor.u32 1.1754944e-38, %v1455_v60 }
 0x53e   : > { %2664 = vpow2.f32 %v1260_v46  ;;  %v1327_v3 = vadd.f32 %v3861_v36, %v1326_v61  ;;  %v1434_v0 = vadd.f32 %v2655_v54, %v1433_v44 }
 0x53f   : > { %v2661_v34 = vpop.eup %2660 }
 0x540   : > { %v1445_v35 = vmul.f32 %v2661_v34, %v3855_v57  ;;  %1328 = vadd.xlane.f32.xlu1 %v1327_v3  ;;  %v1157_v53 = vpop.xlane.xlu0 %1156  ;;  %v1438_v49 = vsel %vm1437_vm7, %v2655_v54, %v1434_v0  ;;  %vm1450_vm10 = vweird.f32 %v2661_v34 }
 0x541   : > { %v1196_v59 = vsub.f32 %v3731_v19, %v1157_v53  ;;  %v1197_v26 = vsub.f32 %v3724_v63, %v1157_v53  ;;  %v1443_v11 = vsel %vm1440_vm8, %v1442_v29, %v1438_v49  ;;  %v1453_v19 = vand.u32 2147483647, %v3855_v57  ;;  %vm1451_vm12 = vmor %vm1449_vm11, %vm1450_vm10 }
 0x542   : > { %v1446_v39 = vsub.f32 1.0, %v1445_v35  ;;  %v1610_v31 = vmul.f32 %v3689_v4, %v1443_v11  ;;  %v1611_v42 = vmul.f32 %v3693_v9, %v1443_v11 }
 0x543   : > { %v3878_v43 = vpop.eup %2662  ;;  %v1262_v30 = vmul.f32 1.442695, %v1196_v59  ;;  %v1264_v6 = vmul.f32 1.442695, %v1197_v26  ;;  %vm1454_vm13 = vcmp.eq.f32.partialorder %v1453_v19, 8.507059e+37 }
 0x544   : > { %v3881_v7 = vpop.eup %2664  ;;  %v1447_v10 = vmul.f32 %v2661_v34, %v1446_v39  ;;  %1722 = vmatmul.f32.gmra.mxu2 %v1610_v31  ;;  %2474 = vmatmul.msk.f32.gmra.mxu3 %vm1093_vm0, %v1611_v42 }
 0x545   : > { %2666 = vpow2.f32 %v1262_v30  ;;  %v1330_v4 = vsel %vm1093_vm0, %v3881_v7, 0.0 }
 0x546   : > { %2668 = vpow2.f32 %v1264_v6  ;;  %v1331_v9 = vadd.f32 %v3878_v43, %v1330_v4  ;;  %v1448_v63 = vadd.f32 %v2661_v34, %v1447_v10 }
 0x548   : > { %1332 = vadd.xlane.f32.xlu2 %v1331_v9  ;;  %v1161_v54 = vpop.xlane.xlu0 %1160  ;;  %v1452_v52 = vsel %vm1451_vm12, %v2661_v34, %v1448_v63 }
 0x549   : > { %v1198_v32 = vsub.f32 %v3744_v38, %v1161_v54  ;;  %v1199_v17 = vsub.f32 %v3737_v5, %v1161_v54  ;;  %v1457_v58 = vsel %vm1454_vm13, %v1456_v21, %v1452_v52 }
 0x54a   : > { %v1612_v20 = vmul.f32 %v3709_v51, %v1457_v58  ;;  %v1613_v40 = vmul.f32 %v3713_v14, %v1457_v58 }
 0x54b   : > { %v3893_v57 = vpop.eup %2666  ;;  %v1266_v41 = vmul.f32 1.442695, %v1198_v32  ;;  %v1268_v8 = vmul.f32 1.442695, %v1199_v17 }
 0x54c   : > { %v3895_v55 = vpop.eup %2668  ;;  %1725 = vmatmul.f32.gmra.mxu2 %v1612_v20  ;;  %2475 = vmatmul.msk.f32.gmra.mxu3 %vm1093_vm0, %v1613_v40 }
 0x54d   : > { %2670 = vpow2.f32 %v1266_v41  ;;  %v1334_v38 = vsel %vm1093_vm0, %v3895_v55, 0.0 }
 0x54e   : > { %2672 = vpow2.f32 %v1268_v8  ;;  %v1335_v5 = vadd.f32 %v3893_v57, %v1334_v38 }
 0x550   : > { %1336 = vadd.xlane.f32.xlu0 %v1335_v5 }
 0x553   : > { %v3901_v51 = vpop.eup %2670 }
 0x554   : > { %v3903_v14 = vpop.eup %2672 }
 0x555   : > { %v1338_v27 = vsel %vm1093_vm0, %v3903_v14, 0.0 }
 0x556   : > { %v1339_v46 = vadd.f32 %v3901_v51, %v1338_v27 }
 0x558   : > { %1340 = vadd.xlane.f32.xlu1 %v1339_v46 }
 0x58b   : > { %v1309_v22 = vpop.xlane.xlu2 %1308 }
 0x58c   : > { %2674 = vrcp.f32 %v1309_v22  ;;  %v1469_v3 = vand.u32 2147483648, %v1309_v22  ;;  %v1467_v35 = vand.u32 2147483647, %v1309_v22  ;;  %vm1463_vm1 = vweird.f32 %v1309_v22 }
 0x58e   : > { %v1470_v26 = vor.u32 1.1754944e-38, %v1469_v3  ;;  %vm1468_vm5 = vcmp.eq.f32.partialorder %v1467_v35, 8.507059e+37 }
 0x592   : > { %v2675_v16 = vpop.eup %2674 }
 0x593   : > { %v1459_v44 = vmul.f32 %v2675_v16, %v1309_v22  ;;  %v1313_v23 = vpop.xlane.xlu1 %1312  ;;  %vm1464_vm14 = vweird.f32 %v2675_v16 }
 0x594   : > { %2676 = vrcp.f32 %v1313_v23  ;;  %vm1465_vm4 = vmor %vm1463_vm1, %vm1464_vm14  ;;  %v1483_v19 = vand.u32 2147483648, %v1313_v23  ;;  %v1481_v21 = vand.u32 2147483647, %v1313_v23  ;;  %vm1477_vm7 = vweird.f32 %v1313_v23 }
 0x595   : > { %v1460_v61 = vsub.f32 1.0, %v1459_v44 }
 0x596   : > { %v1484_v32 = vor.u32 1.1754944e-38, %v1483_v19  ;;  %vm1482_vm10 = vcmp.eq.f32.partialorder %v1481_v21, 8.507059e+37 }
 0x597   : > { %v1461_v0 = vmul.f32 %v2675_v16, %v1460_v61  ;;  %v1705_v34 = vpop.f32.mrf.mxu2  ;;  %v1776_v29 = vpop.f32.mrf.mxu3 }
 0x598   : > { %v3908_v53 = vadd.f32 %v1776_v29, %v1705_v34 }
 0x599   : > { %v1462_v49 = vadd.f32 %v2675_v16, %v1461_v0 }
 0x59a   : > { %v2677_v59 = vpop.eup %2676 }
 0x59b   : > { %v1473_v11 = vmul.f32 %v2677_v59, %v1313_v23  ;;  %v1317_v39 = vpop.xlane.xlu2 %1316  ;;  %v1466_v31 = vsel %vm1465_vm4, %v2675_v16, %v1462_v49  ;;  %vm1478_vm6 = vweird.f32 %v2677_v59 }
 0x59c   : > { %2678 = vrcp.f32 %v1317_v39  ;;  %v1471_v42 = vsel %vm1468_vm5, %v1470_v26, %v1466_v31  ;;  %vm1479_vm8 = vmor %vm1477_vm7, %vm1478_vm6  ;;  %v1497_v38 = vand.u32 2147483648, %v1317_v39  ;;  %v1495_v61 = vand.u32 2147483647, %v1317_v39 }
 0x59d   : > { %v1474_v60 = vsub.f32 1.0, %v1473_v11  ;;  %v1614_v30 = vmul.f32 %v3756_v25, %v1471_v42  ;;  %v1615_v6 = vmul.f32 %v3758_v62, %v1471_v42  ;;  %vm1491_vm12 = vweird.f32 %v1317_v39 }
 0x59e   : > { %v1498_v0 = vor.u32 1.1754944e-38, %v1497_v38  ;;  %vm1496_vm14 = vcmp.eq.f32.partialorder %v1495_v61, 8.507059e+37 }
 0x59f   : > { %v1475_v10 = vmul.f32 %v2677_v59, %v1474_v60  ;;  %1728 = vmatmul.f32.gmra.mxu2 %v1614_v30  ;;  %2476 = vmatmul.msk.f32.gmra.mxu3 %vm1093_vm0, %v1615_v6  ;;  %v1708_v4 = vpop.f32.mrf.mxu2  ;;  %v1779_v9 = vpop.f32.mrf.mxu3 }
 0x5a0   : > { %v3913_v63 = vadd.f32 %v1779_v9, %v1708_v4 }
 0x5a1   : > { %v1476_v54 = vadd.f32 %v2677_v59, %v1475_v10 }
 0x5a2   : > { %v2679_v52 = vpop.eup %2678 }
 0x5a3   : > { %v1487_v17 = vmul.f32 %v2679_v52, %v1317_v39  ;;  %v1321_v25 = vpop.xlane.xlu1 %1320  ;;  %v1165_v58 = vpop.xlane.xlu2 %1164  ;;  %v1480_v62 = vsel %vm1479_vm8, %v2677_v59, %v1476_v54  ;;  %vm1492_vm11 = vweird.f32 %v2679_v52 }
 0x5a4   : > { %2680 = vrcp.f32 %v1321_v25  ;;  %v1200_v20 = vsub.f32 %v3823_v50, %v1165_v58  ;;  %v1201_v41 = vsub.f32 %v3801_v2, %v1165_v58  ;;  %v1485_v8 = vsel %vm1482_vm10, %v1484_v32, %v1480_v62  ;;  %vm1493_vm13 = vmor %vm1491_vm12, %vm1492_vm11 }
 0x5a5   : > { %v1488_v40 = vsub.f32 1.0, %v1487_v17  ;;  %v1616_v27 = vmul.f32 %v3772_v33, %v1485_v8  ;;  %v1617_v46 = vmul.f32 %v3775_v45, %v1485_v8  ;;  %v1511_v11 = vand.u32 2147483648, %v1321_v25 }
 0x5a6   : > { %v1270_v5 = vmul.f32 1.442695, %v1200_v20  ;;  %v1272_v16 = vmul.f32 1.442695, %v1201_v41  ;;  %v1509_v30 = vand.u32 2147483647, %v1321_v25  ;;  %vm1505_vm4 = vweird.f32 %v1321_v25 }
 0x5a7   : > { %v1489_v22 = vmul.f32 %v2679_v52, %v1488_v40  ;;  %v1711_v44 = vpop.f32.mrf.mxu2  ;;  %v1782_v23 = vpop.f32.mrf.mxu3  ;;  %1731 = vmatmul.f32.gmra.mxu2 %v1616_v27  ;;  %2477 = vmatmul.msk.f32.gmra.mxu3 %vm1093_vm0, %v1617_v46  ;;  %v1512_v4 = vor.u32 1.1754944e-38, %v1511_v11 }
 0x5a8   : > { %2682 = vpow2.f32 %v1270_v5  ;;  %v3920_v50 = vadd.f32 %v1782_v23, %v1711_v44  ;;  %vm1510_vm6 = vcmp.eq.f32.partialorder %v1509_v30, 8.507059e+37 }
 0x5a9   : > { %2684 = vpow2.f32 %v1272_v16  ;;  %v1490_v2 = vadd.f32 %v2679_v52, %v1489_v22 }
 0x5aa   : > { %v2681_v3 = vpop.eup %2680 }
 0x5ab   : > { %v1501_v33 = vmul.f32 %v2681_v3, %v1321_v25  ;;  %v1325_v45 = vpop.xlane.xlu0 %1324  ;;  %v1494_v34 = vsel %vm1493_vm13, %v2679_v52, %v1490_v2  ;;  %vm1506_vm1 = vweird.f32 %v2681_v3 }
 0x5ac   : > { %2686 = vrcp.f32 %v1325_v45  ;;  %v1499_v29 = vsel %vm1496_vm14, %v1498_v0, %v1494_v34  ;;  %vm1507_vm5 = vmor %vm1505_vm4, %vm1506_vm1  ;;  %v1525_v62 = vand.u32 2147483648, %v1325_v45  ;;  %v1523_v20 = vand.u32 2147483647, %v1325_v45 }
 0x5ad   : > { %v1502_v35 = vsub.f32 1.0, %v1501_v33  ;;  %v1618_v49 = vmul.f32 %v3794_v24, %v1499_v29  ;;  %v1619_v59 = vmul.f32 %v3797_v13, %v1499_v29  ;;  %vm1519_vm8 = vweird.f32 %v1325_v45 }
 0x5ae   : > { %v3924_v26 = vpop.eup %2682  ;;  %v1526_v27 = vor.u32 1.1754944e-38, %v1525_v62  ;;  %vm1524_vm11 = vcmp.eq.f32.partialorder %v1523_v20, 8.507059e+37 }
 0x5af   : > { %v3926_v39 = vpop.eup %2684  ;;  %v1503_v31 = vmul.f32 %v2681_v3, %v1502_v35  ;;  %v1714_v42 = vpop.f32.mrf.mxu2  ;;  %1734 = vmatmul.f32.gmra.mxu2 %v1618_v49  ;;  %2478 = vmatmul.msk.f32.gmra.mxu3 %vm1093_vm0, %v1619_v59 }
 0x5b0   : > { %v1785_v60 = vpop.f32.mrf.mxu3  ;;  %v1342_v24 = vsel %vm1093_vm0, %v3926_v39, 0.0 }
 0x5b1   : > { %v3929_v6 = vadd.f32 %v1785_v60, %v1714_v42  ;;  %v1343_v13 = vadd.f32 %v3924_v26, %v1342_v24  ;;  %v1504_v10 = vadd.f32 %v2681_v3, %v1503_v31 }
 0x5b2   : > { %v2687_v19 = vpop.eup %2686 }
 0x5b3   : > { %v1515_v9 = vmul.f32 %v2687_v19, %v1325_v45  ;;  %1344 = vadd.xlane.f32.xlu2 %v1343_v13  ;;  %v1329_v21 = vpop.xlane.xlu1 %1328  ;;  %v1508_v54 = vsel %vm1507_vm5, %v2681_v3, %v1504_v10  ;;  %vm1520_vm7 = vweird.f32 %v2687_v19 }
 0x5b4   : > { %2688 = vrcp.f32 %v1329_v21  ;;  %v1513_v52 = vsel %vm1510_vm6, %v1512_v4, %v1508_v54  ;;  %vm1521_vm10 = vmor %vm1519_vm8, %vm1520_vm7  ;;  %v1539_v61 = vand.u32 2147483648, %v1329_v21  ;;  %v1537_v3 = vand.u32 2147483647, %v1329_v21 }
 0x5b5   : > { %v1516_v32 = vsub.f32 1.0, %v1515_v9  ;;  %v1620_v17 = vmul.f32 %v3820_v1, %v1513_v52  ;;  %v1621_v58 = vmul.f32 %v3825_v47, %v1513_v52  ;;  %vm1533_vm13 = vweird.f32 %v1329_v21 }
 0x5b6   : > { %v1540_v35 = vor.u32 1.1754944e-38, %v1539_v61  ;;  %vm1538_vm1 = vcmp.eq.f32.partialorder %v1537_v3, 8.507059e+37 }
 0x5b7   : > { %v1517_v25 = vmul.f32 %v2687_v19, %v1516_v32  ;;  %1737 = vmatmul.f32.gmra.mxu2 %v1620_v17  ;;  %2479 = vmatmul.msk.f32.gmra.mxu3 %vm1093_vm0, %v1621_v58  ;;  %v1717_v40 = vpop.f32.mrf.mxu2 }
 0x5b8   : > { %v1788_v41 = vpop.f32.mrf.mxu3 }
 0x5b9   : > { %v3937_v8 = vadd.f32 %v1788_v41, %v1717_v40  ;;  %v1518_v38 = vadd.f32 %v2687_v19, %v1517_v25 }
 0x5ba   : > { %v2689_v5 = vpop.eup %2688 }
 0x5bb   : > { %v1529_v46 = vmul.f32 %v2689_v5, %v1329_v21  ;;  %v1333_v1 = vpop.xlane.xlu2 %1332  ;;  %v1522_v22 = vsel %vm1521_vm10, %v2687_v19, %v1518_v38  ;;  %vm1534_vm12 = vweird.f32 %v2689_v5 }
 0x5bc   : > { %2690 = vrcp.f32 %v1333_v1  ;;  %v1527_v47 = vsel %vm1524_vm11, %v1526_v27, %v1522_v22  ;;  %vm1535_vm14 = vmor %vm1533_vm13, %vm1534_vm12  ;;  %v1553_v60 = vand.u32 2147483648, %v1333_v1  ;;  %v1551_v24 = vand.u32 2147483647, %v1333_v1 }
 0x5bd   : > { %v1530_v16 = vsub.f32 1.0, %v1529_v46  ;;  %v1622_v44 = vmul.f32 %v3841_v56, %v1527_v47  ;;  %v1623_v23 = vmul.f32 %v3845_v48, %v1527_v47  ;;  %vm1547_vm5 = vweird.f32 %v1333_v1 }
 0x5be   : > { %v1554_v21 = vor.u32 1.1754944e-38, %v1553_v60  ;;  %vm1552_vm7 = vcmp.eq.f32.partialorder %v1551_v24, 8.507059e+37 }
 0x5bf   : > { %v1531_v2 = vmul.f32 %v2689_v5, %v1530_v16  ;;  %1740 = vmatmul.f32.gmra.mxu2 %v1622_v44  ;;  %2480 = vmatmul.msk.f32.gmra.mxu3 %vm1093_vm0, %v1623_v23  ;;  %v1720_v0 = vpop.f32.mrf.mxu2 }
 0x5c0   : > { %v1791_v33 = vpop.f32.mrf.mxu3 }
 0x5c1   : > { %v3942_v45 = vadd.f32 %v1791_v33, %v1720_v0  ;;  %v1532_v34 = vadd.f32 %v2689_v5, %v1531_v2 }
 0x5c2   : > { %v2691_v29 = vpop.eup %2690 }
 0x5c3   : > { %v1543_v49 = vmul.f32 %v2691_v29, %v1333_v1  ;;  %v1337_v56 = vpop.xlane.xlu0 %1336  ;;  %v1536_v59 = vsel %vm1535_vm14, %v2689_v5, %v1532_v34  ;;  %vm1548_vm4 = vweird.f32 %v2691_v29 }
 0x5c4   : > { %2692 = vrcp.f32 %v1337_v56  ;;  %v1541_v48 = vsel %vm1538_vm1, %v1540_v35, %v1536_v59  ;;  %vm1549_vm6 = vmor %vm1547_vm5, %vm1548_vm4  ;;  %v1567_v62 = vand.u32 2147483648, %v1337_v56  ;;  %v1565_v20 = vand.u32 2147483647, %v1337_v56 }
 0x5c5   : > { %v1544_v11 = vsub.f32 1.0, %v1543_v49  ;;  %v1624_v31 = vmul.f32 %v3861_v36, %v1541_v48  ;;  %v1625_v42 = vmul.f32 %v3865_v37, %v1541_v48  ;;  %vm1561_vm10 = vweird.f32 %v1337_v56 }
 0x5c6   : > { %v1568_v38 = vor.u32 1.1754944e-38, %v1567_v62  ;;  %vm1566_vm12 = vcmp.eq.f32.partialorder %v1565_v20, 8.507059e+37 }
 0x5c7   : > { %v1545_v30 = vmul.f32 %v2691_v29, %v1544_v11  ;;  %1743 = vmatmul.f32.gmra.mxu2 %v1624_v31  ;;  %2481 = vmatmul.msk.f32.gmra.mxu3 %vm1093_vm0, %v1625_v42  ;;  %v1723_v13 = vpop.f32.mrf.mxu2 }
 0x5c8   : > { %v1794_v10 = vpop.f32.mrf.mxu3 }
 0x5c9   : > { %v3947_v19 = vadd.f32 %v1794_v10, %v1723_v13  ;;  %v1546_v4 = vadd.f32 %v2691_v29, %v1545_v30 }
 0x5ca   : > { %v2693_v9 = vpop.eup %2692 }
 0x5cb   : > { %v1557_v54 = vmul.f32 %v2693_v9, %v1337_v56  ;;  %v1341_v36 = vpop.xlane.xlu1 %1340  ;;  %v1550_v52 = vsel %vm1549_vm6, %v2691_v29, %v1546_v4  ;;  %vm1562_vm8 = vweird.f32 %v2693_v9 }
 0x5cc   : > { %2694 = vrcp.f32 %v1341_v36  ;;  %v1555_v37 = vsel %vm1552_vm7, %v1554_v21, %v1550_v52  ;;  %vm1563_vm11 = vmor %vm1561_vm10, %vm1562_vm8  ;;  %v1581_v22 = vand.u32 2147483648, %v1341_v36  ;;  %v1579_v16 = vand.u32 2147483647, %v1341_v36 }
 0x5cd   : > { %v1558_v32 = vsub.f32 1.0, %v1557_v54  ;;  %v1626_v17 = vmul.f32 %v3878_v43, %v1555_v37  ;;  %v1627_v58 = vmul.f32 %v3881_v7, %v1555_v37  ;;  %vm1575_vm14 = vweird.f32 %v1341_v36 }
 0x5ce   : > { %v1582_v23 = vor.u32 1.1754944e-38, %v1581_v22  ;;  %vm1580_vm4 = vcmp.eq.f32.partialorder %v1579_v16, 8.507059e+37  ;;  %v1833_v16 = vld [vmem:[%s4213_s5 + $0x18] sm:$0xff] }
 0x5cf   : > { %v1559_v25 = vmul.f32 %v2693_v9, %v1558_v32  ;;  %1746 = vmatmul.f32.gmra.mxu2 %v1626_v17  ;;  %2482 = vmatmul.msk.f32.gmra.mxu3 %vm1093_vm0, %v1627_v58 }
 0x5d0   : > { %v1797_v0 = vpop.f32.mrf.mxu3 }
 0x5d1   : > { %v1560_v40 = vadd.f32 %v2693_v9, %v1559_v25 }
 0x5d2   : > { %v2695_v41 = vpop.eup %2694 }
 0x5d3   : > { %v1571_v5 = vmul.f32 %v2695_v41, %v1341_v36  ;;  %v1564_v27 = vsel %vm1563_vm11, %v2693_v9, %v1560_v40  ;;  %vm1576_vm13 = vweird.f32 %v2695_v41 }
 0x5d4   : > { %v1569_v46 = vsel %vm1566_vm12, %v1568_v38, %v1564_v27  ;;  %vm1577_vm1 = vmor %vm1575_vm14, %vm1576_vm13 }
 0x5d5   : > { %v1572_v1 = vsub.f32 1.0, %v1571_v5  ;;  %v1628_v43 = vmul.f32 %v3893_v57, %v1569_v46  ;;  %v1629_v7 = vmul.f32 %v3895_v55, %v1569_v46  ;;  %v1726_v55 = vpop.f32.mrf.mxu2  ;;  %v1830_v46 = vld [vmem:[%s4213_s5] sm:$0xff] }
 0x5d6   : > { %v1798_v27 = vadd.f32 %v1797_v0, %v1726_v55 }
 0x5d7   : > { %v1573_v47 = vmul.f32 %v2695_v41, %v1572_v1  ;;  %1749 = vmatmul.f32.gmra.mxu2 %v1628_v43  ;;  %2483 = vmatmul.msk.f32.gmra.mxu3 %vm1093_vm0, %v1629_v7 }
 0x5d9   : > { %v1574_v44 = vadd.f32 %v2695_v41, %v1573_v47  ;;  %v1831_v47 = vld [vmem:[%s4213_s5 + $0x8] sm:$0xff] }
 0x5db   : > { %v1578_v61 = vsel %vm1577_vm1, %v2695_v41, %v1574_v44  ;;  %v1835_v44 = vld [vmem:[%s4213_s5 + $0x28] sm:$0x3] }
 0x5dc   : > { %v1583_v2 = vsel %vm1580_vm4, %v1582_v23, %v1578_v61  ;;  %v1898_v23 = vld [vmem:[%s1897_s9] sm:$0xff] }
 0x5dd   : > { %v1630_v3 = vmul.f32 %v3901_v51, %v1583_v2  ;;  %v1631_v57 = vmul.f32 %v3903_v14, %v1583_v2 }
 0x5df   : > { %1752 = vmatmul.f32.gmra.mxu2 %v1630_v3  ;;  %2484 = vmatmul.msk.f32.gmra.mxu3 %vm1093_vm0, %v1631_v57 }
 0x622   : > { %v1729_v33 = vpop.f32.mrf.mxu2  ;;  %v1800_v34 = vpop.f32.mrf.mxu3 }
 0x623   : > { %v1801_v29 = vadd.f32 %v1800_v34, %v1729_v33 }
 0x626   : > { %v1345_v35 = vpop.xlane.xlu2 %1344 }
 0x627   : > { %2696 = vrcp.f32 %v1345_v35  ;;  %v1595_v31 = vand.u32 2147483648, %v1345_v35  ;;  %v1593_v51 = vand.u32 2147483647, %v1345_v35  ;;  %vm1589_vm6 = vweird.f32 %v1345_v35 }
 0x629   : > { %v1596_v24 = vor.u32 1.1754944e-38, %v1595_v31  ;;  %vm1594_vm8 = vcmp.eq.f32.partialorder %v1593_v51, 8.507059e+37 }
 0x62a   : > { %v1732_v49 = vpop.f32.mrf.mxu2  ;;  %v1803_v56 = vpop.f32.mrf.mxu3 }
 0x62b   : > { %v1804_v5 = vadd.f32 %v1803_v56, %v1732_v49 }
 0x62d   : > { %v2697_v59 = vpop.eup %2696 }
 0x62e   : > { %v1585_v48 = vmul.f32 %v2697_v59, %v1345_v35  ;;  %vm1590_vm5 = vweird.f32 %v2697_v59  ;;  %v2577_v35 = vld [vmem:[%s1952_s29] ss:$0 sm:$0xff] }
 0x62f   : > { %vm1591_vm7 = vmor %vm1589_vm6, %vm1590_vm5 }
 0x630   : > { %v1586_v11 = vsub.f32 1.0, %v1585_v48 }
 0x632   : > { %v1587_v42 = vmul.f32 %v2697_v59, %v1586_v11  ;;  %v1735_v14 = vpop.f32.mrf.mxu2  ;;  %v1806_v60 = vpop.f32.mrf.mxu3 }
 0x633   : > { %v1807_v38 = vadd.f32 %v1806_v60, %v1735_v14 }
 0x634   : > { %v1588_v30 = vadd.f32 %v2697_v59, %v1587_v42 }
 0x636   : > { %v1592_v13 = vsel %vm1591_vm7, %v2697_v59, %v1588_v30  ;;  %v2058_v30 = vld [vmem:[%s4031_s0 + $0x70] sm:$0xff] }
 0x637   : > { %v1597_v10 = vsel %vm1594_vm8, %v1596_v24, %v1592_v13  ;;  %v2057_v24 = vld [vmem:[%s4031_s0 + $0x68] sm:$0xff] }
 0x638   : > { %v1632_v4 = vmul.f32 %v3924_v26, %v1597_v10  ;;  %v1633_v9 = vmul.f32 %v3926_v39, %v1597_v10 }
 0x63a   : > { %1755 = vmatmul.f32.gmra.mxu2 %v1632_v4  ;;  %2485 = vmatmul.msk.f32.gmra.mxu3 %vm1093_vm0, %v1633_v9  ;;  %v1738_v21 = vpop.f32.mrf.mxu2  ;;  %v1809_v54 = vpop.f32.mrf.mxu3  ;;  %v2056_v4 = vld [vmem:[%s4031_s0 + $0x60] sm:$0xff] }
 0x63b   : > { %v1810_v39 = vadd.f32 %v1809_v54, %v1738_v21  ;;  %v2055_v54 = vld [vmem:[%s4031_s0 + $0x58] sm:$0xff] }
 0x642   : > { %v1741_v36 = vpop.f32.mrf.mxu2  ;;  %v1812_v52 = vpop.f32.mrf.mxu3 }
 0x643   : > { %v1813_v26 = vadd.f32 %v1812_v52, %v1741_v36 }
 0x64a   : > { %v1744_v37 = vpop.f32.mrf.mxu2  ;;  %v1815_v32 = vpop.f32.mrf.mxu3 }
 0x64b   : > { %v1816_v41 = vadd.f32 %v1815_v32, %v1744_v37  ;;  %v2054_v32 = vld [vmem:[%s4031_s0 + $0x50] sm:$0xff] }
 0x652   : > { %v1747_v17 = vpop.f32.mrf.mxu2  ;;  %v1818_v58 = vpop.f32.mrf.mxu3 }
 0x653   : > { %v1819_v40 = vadd.f32 %v1818_v58, %v1747_v17 }
 0x65a   : > { %v1750_v62 = vpop.f32.mrf.mxu2  ;;  %v1821_v25 = vpop.f32.mrf.mxu3 }
 0x65b   : > { %v1822_v20 = vadd.f32 %v1821_v25, %v1750_v62  ;;  %v2053_v62 = vld [vmem:[%s4031_s0 + $0x48] sm:$0xff] }
 0x65d   : > { %1845 = vmatpush.msra.mxu0 %v1822_v20 }
 0x65f   : > { %1846 = vmatpush.msra.mxu0 %v1819_v40 }
 0x661   : > { %1847 = vmatpush.msra.mxu0 %v1816_v41  ;;  %v2052_v41 = vld [vmem:[%s4031_s0 + $0x40] sm:$0xff] }
 0x663   : > { %1848 = vmatpush.msra.mxu0 %v1813_v26 }
 0x665   : > { %1849 = vmatpush.msra.mxu0 %v1810_v39 }
 0x667   : > { %1850 = vmatpush.msra.mxu0 %v1807_v38  ;;  %v2051_v38 = vld [vmem:[%s4031_s0 + $0x38] sm:$0xff] }
 0x669   : > { %1851 = vmatpush.msra.mxu0 %v1804_v5 }
 0x66b   : > { %1852 = vmatpush.msra.mxu0 %v1801_v29 }
 0x66d   : > { %1853 = vmatpush.msra.mxu0 %v1798_v27  ;;  %v2050_v27 = vld [vmem:[%s4031_s0 + $0x30] sm:$0xff] }
 0x66f   : > { %1854 = vmatpush.msra.mxu0 %v3947_v19  ;;  %v1832_v19 = vld [vmem:[%s4213_s5 + $0x10] sm:$0xff] }
 0x671   : > { %1855 = vmatpush.msra.mxu0 %v3942_v45  ;;  %v1899_v45 = vld [vmem:[%s1897_s9 + $0x8] sm:$0xff] }
 0x673   : > { %1856 = vmatpush.msra.mxu0 %v3937_v8  ;;  %v1900_v8 = vld [vmem:[%s1897_s9 + $0x10] sm:$0xff] }
 0x675   : > { %1857 = vmatpush.msra.mxu0 %v3929_v6  ;;  %v1834_v6 = vld [vmem:[%s4213_s5 + $0x20] sm:$0x3] }
 0x677   : > { %1858 = vmatpush.msra.mxu0 %v3920_v50  ;;  %v1824_v50 = vpop.f32.mrf.mxu3 }
 0x679   : > { %1859 = vmatpush.msra.mxu0 %v3913_v63  ;;  %v1753_v63 = vpop.f32.mrf.mxu2 }
 0x67a   : > { %v1825_v22 = vadd.f32 %v1824_v50, %v1753_v63  ;;  %v2045_v63 = vld [vmem:[%s4031_s0 + $0x8] sm:$0xff]  ;;  %v2044_v50 = vld [vmem:[%s4031_s0] sm:$0xff] }
 0x67b   : > { %1860 = vmatpush.msra.mxu0 %v3908_v53  ;;  %v1901_v53 = vld [vmem:[%s1897_s9 + $0x18] sm:$0xff] }
 0x67c   : > { %1861 = vmatmul.f32.vlgmr.msra.gmra.mxu0 %v1830_v46  ;;  %2489 = vmatpush.xpose.msk.msra.mxu2 %vm184_vm3, %v1901_v53  ;;  %v2049_v46 = vld [vmem:[%s4031_s0 + $0x28] sm:$0xff]  ;;  %v2046_v53 = vld [vmem:[%s4031_s0 + $0x10] sm:$0xff] }
 0x680   : > { %2490 = vmatpush.xpose.msk.msra.mxu2 %vm184_vm3, %v1900_v8 }
 0x684   : > { %1864 = vmatmul.f32.gmra.mxu0 %v1832_v19  ;;  %2491 = vmatpush.xpose.msk.msra.mxu2 %vm184_vm3, %v1899_v45  ;;  %v2048_v19 = vld [vmem:[%s4031_s0 + $0x20] sm:$0xff] }
 0x688   : > { %2492 = vmatpush.xpose.msk.msra.mxu2 %vm184_vm3, %v1898_v23 }
 0x68c   : > { %1867 = vmatmul.f32.gmra.mxu0 %v1834_v6  ;;  %v2047_v6 = vld [vmem:[%s4031_s0 + $0x18] sm:$0xff] }
 0x6bd   : > { %v1756_v1 = vpop.f32.mrf.mxu2  ;;  %v1827_v43 = vpop.f32.mrf.mxu3 }
 0x6be   : > { %v1828_v7 = vadd.f32 %v1827_v43, %v1756_v1 }
 0x6c0   : > { %1885 = vmatpush.msrb.mxu1 %v1828_v7 }
 0x6c2   : > { %1886 = vmatpush.msrb.mxu1 %v1825_v22 }
 0x6c3   : > { %2486 = vmatmul.msk.f32.vlgmr.msrb.gmra.mxu1 %vm1093_vm0, %v1831_v47 }
 0x6cb   : > { %2487 = vmatmul.msk.f32.gmra.mxu1 %vm1093_vm0, %v1833_v16 }
 0x6d3   : > { %2488 = vmatmul.msk.f32.gmra.mxu1 %vm1093_vm0, %v1835_v44  ;;  %v2155_v44 = vld [vmem:[%s4096_s27 + $0x18] sm:$0xff] }
 0x6d4   : > { %2168 = vmatpush.xpose.msrb.mxu0 %v2155_v44 }
 0x6f9   : > { %v1862_v61 = vpop.f32.mrf.mxu0 }
 0x701   : > { %v1865_v57 = vpop.f32.mrf.mxu0 }
 0x709   : > { %v1868_v33 = vpop.f32.mrf.mxu0 }
 0x740   : > { %v1888_v2 = vpop.f32.mrf.mxu1 }
 0x741   : > { %v1889_v3 = vadd.f32 %v1888_v2, %v1862_v61  ;;  %v2154_v61 = vld [vmem:[%s4096_s27 + $0x10] sm:$0xff] }
 0x742   : > { %2169 = vmatpush.xpose.msrb.mxu0 %v2154_v61 }
 0x743   : > { %2493 = vmatmul.msk.f32.vlgmr.msra.gmra.mxu2 %vm184_vm3, %v1889_v3 }
 0x748   : > { %v1891_v55 = vpop.f32.mrf.mxu1 }
 0x749   : > { %v1892_v0 = vadd.f32 %v1891_v55, %v1865_v57 }
 0x74b   : > { %2494 = vmatmul.msk.f32.gmra.mxu2 %vm184_vm3, %v1892_v0 }
 0x750   : > { %v1894_v34 = vpop.f32.mrf.mxu1 }
 0x751   : > { %v1895_v29 = vadd.f32 %v1894_v34, %v1868_v33  ;;  %v2153_v34 = vld [vmem:[%s4096_s27 + $0x8] sm:$0xff] }
 0x752   : > { %2170 = vmatpush.xpose.msrb.mxu0 %v2153_v34 }
 0x753   : > { %2495 = vmatmul.msk.f32.gmra.mxu2 %vm184_vm3, %v1895_v29 }
 0x7c6   : > { %v1940_v49 = vpop.f32.mrf.mxu2 }
 0x7c7   : > { %v1949_v56 = vadd.f32 %v2760_v12, %v1940_v49  ;;  %v2578_v49 = vld [vmem:[%s1960_s30] ss:$0 sm:$0xff] }
 0x7c9   : > { %v4005_v59 = vadd.f32 %v2577_v35, %v1949_v56 }
 0x7cb   : > { %v1964_v48 = vsel %vm184_vm3, %v4005_v59, 0.0 }
 0x7cc   : > { %1965 = vadd.xlane.f32.xlu0 %v1964_v48 }
 0x7ce   : > { %v1943_v11 = vpop.f32.mrf.mxu2 }
 0x7cf   : > { %v1950_v31 = vadd.f32 %v2756_v15, %v1943_v11  ;;  %v2579_v11 = vld [vmem:[%s1962_s26] ss:$0 sm:$0xff] }
 0x7d1   : > { %v4010_v42 = vadd.f32 %v2577_v35, %v1950_v31 }
 0x7d3   : > { %v1967_v51 = vsel %vm184_vm3, %v4010_v42, 0.0 }
 0x7d4   : > { %1968 = vadd.xlane.f32.xlu1 %v1967_v51 }
 0x7d6   : > { %v1946_v14 = vpop.f32.mrf.mxu2 }
 0x7d7   : > { %v1951_v60 = vadd.f32 %v2752_v18, %v1946_v14  ;;  %v2059_v18 = vld [vmem:[%s4031_s0 + $0x78] sm:$0xff] }
 0x7d8   : > { %2497 = vmatpush.xpose.msk.msra.mxu3 %vm184_vm3, %v2059_v18 }
 0x7d9   : > { %v4019_v12 = vadd.f32 %v2577_v35, %v1951_v60 }
 0x7db   : > { %v1970_v15 = vsel %vm191_vm2, %v4019_v12, 0.0 }
 0x7dc   : > { %1971 = vadd.xlane.f32.xlu2 %v1970_v15  ;;  %2498 = vmatpush.xpose.msk.msra.mxu3 %vm184_vm3, %v2058_v30 }
 0x7e0   : > { %2499 = vmatpush.xpose.msk.msra.mxu3 %vm184_vm3, %v2057_v24 }
 0x7e4   : > { %2500 = vmatpush.xpose.msk.msra.mxu3 %vm184_vm3, %v2056_v4 }
 0x7e8   : > { %2501 = vmatpush.xpose.msk.msra.mxu3 %vm184_vm3, %v2055_v54 }
 0x7ec   : > { %2502 = vmatpush.xpose.msk.msra.mxu3 %vm184_vm3, %v2054_v32 }
 0x7f0   : > { %2503 = vmatpush.xpose.msk.msra.mxu3 %vm184_vm3, %v2053_v62 }
 0x7f4   : > { %2504 = vmatpush.xpose.msk.msra.mxu3 %vm184_vm3, %v2052_v41 }
 0x7f8   : > { %2505 = vmatpush.xpose.msk.msra.mxu3 %vm184_vm3, %v2051_v38 }
 0x7fc   : > { %2506 = vmatpush.xpose.msk.msra.mxu3 %vm184_vm3, %v2050_v27 }
 0x800   : > { %2507 = vmatpush.xpose.msk.msra.mxu3 %vm184_vm3, %v2049_v46 }
 0x804   : > { %2508 = vmatpush.xpose.msk.msra.mxu3 %vm184_vm3, %v2048_v19  ;;  %v2581_v19 = vld [vmem:[%s2185_s28] ss:$0 sm:$0xff] }
 0x808   : > { %2509 = vmatpush.xpose.msk.msra.mxu3 %vm184_vm3, %v2047_v6 }
 0x80c   : > { %2510 = vmatpush.xpose.msk.msra.mxu3 %vm184_vm3, %v2046_v53 }
 0x810   : > { %2511 = vmatpush.xpose.msk.msra.mxu3 %vm184_vm3, %v2045_v63 }
 0x814   : > { %2512 = vmatpush.xpose.msk.msra.mxu3 %vm184_vm3, %v2044_v50 }
 0x83f   : > { %v1966_v13 = vpop.xlane.xlu0 %1965 }
 0x840   : > { %v1973_v10 = vmul.f32 %v1966_v13, %v2960_v28 }
 0x842   : > { %v4042_v9 = vsub.f32 %v4005_v59, %v1973_v10 }
 0x844   : > { %v1979_v21 = vmul.f32 %v4042_v9, %v4042_v9 }
 0x846   : > { %v1982_v36 = vsel %vm184_vm3, %v1979_v21, 0.0 }
 0x847   : > { %1983 = vadd.xlane.f32.xlu0 %v1982_v36  ;;  %v1969_v52 = vpop.xlane.xlu1 %1968 }
 0x848   : > { %v1974_v37 = vmul.f32 %v1969_v52, %v2960_v28 }
 0x84a   : > { %v4053_v17 = vsub.f32 %v4010_v42, %v1974_v37 }
 0x84c   : > { %v1980_v58 = vmul.f32 %v4053_v17, %v4053_v17 }
 0x84e   : > { %v1985_v25 = vsel %vm184_vm3, %v1980_v58, 0.0 }
 0x84f   : > { %1986 = vadd.xlane.f32.xlu1 %v1985_v25  ;;  %v1972_v20 = vpop.xlane.xlu2 %1971  ;;  %v2580_v25 = vld [vmem:[%s2060_s15] ss:$0 sm:$0xff] }
 0x850   : > { %v1975_v40 = vmul.f32 %v1972_v20, %v2960_v28 }
 0x852   : > { %v4064_v26 = vsub.f32 %v4019_v12, %v1975_v40 }
 0x854   : > { %v1981_v39 = vmul.f32 %v4064_v26, %v4064_v26 }
 0x856   : > { %v1988_v5 = vsel %vm191_vm2, %v1981_v39, 0.0 }
 0x857   : > { %1989 = vadd.xlane.f32.xlu2 %v1988_v5 }
 0x8ba   : > { %v1984_v8 = vpop.xlane.xlu0 %1983 }
 0x8bb   : > { %v1991_v45 = vmul.f32 %v1984_v8, %v2960_v28 }
 0x8bd   : > { %v1994_v1 = vadd.f32 1e-05, %v1991_v45 }
 0x8bf   : > { %2698 = vrsqrt.f32 %v1994_v1  ;;  %vm2003_vm10 = vweird.f32 %v1994_v1 }
 0x8c2   : > { %v1987_v43 = vpop.xlane.xlu1 %1986 }
 0x8c3   : > { %v1992_v7 = vmul.f32 %v1987_v43, %v2960_v28 }
 0x8c5   : > { %v2699_v22 = vpop.eup %2698  ;;  %v1995_v47 = vadd.f32 1e-05, %v1992_v7 }
 0x8c6   : > { %v1998_v16 = vmul.f32 %v2699_v22, %v1994_v1  ;;  %vm2004_vm0 = vweird.f32 %v2699_v22 }
 0x8c7   : > { %2700 = vrsqrt.f32 %v1995_v47  ;;  %vm2005_vm11 = vmor %vm2003_vm10, %vm2004_vm0  ;;  %vm2013_vm13 = vweird.f32 %v1995_v47 }
 0x8c8   : > { %v1999_v23 = vmul.f32 %v2699_v22, %v1998_v16 }
 0x8ca   : > { %v2000_v2 = vmul.f32 0.5, %v1999_v23  ;;  %v1990_v3 = vpop.xlane.xlu2 %1989 }
 0x8cb   : > { %v1993_v57 = vmul.f32 %v1990_v3, %v2960_v28 }
 0x8cc   : > { %v2001_v55 = vsub.f32 1.5, %v2000_v2 }
 0x8cd   : > { %v2701_v0 = vpop.eup %2700  ;;  %v1996_v33 = vadd.f32 1e-05, %v1993_v57 }
 0x8ce   : > { %v2002_v29 = vmul.f32 %v2699_v22, %v2001_v55  ;;  %v2008_v35 = vmul.f32 %v2701_v0, %v1995_v47  ;;  %vm2014_vm12 = vweird.f32 %v2701_v0 }
 0x8cf   : > { %2702 = vrsqrt.f32 %v1996_v33  ;;  %vm2015_vm14 = vmor %vm2013_vm13, %vm2014_vm12  ;;  %vm2023_vm4 = vweird.f32 %v1996_v33 }
 0x8d0   : > { %v2006_v56 = vsel %vm2005_vm11, %v2699_v22, %v2002_v29  ;;  %v2009_v48 = vmul.f32 %v2701_v0, %v2008_v35  ;;  %v2704_v35 = vld [vmem:[%s4182_s23] ss:$0 sm:$0xff] (%p173_p0) }
 0x8d1   : > { %v2027_v31 = vmul.f32 %v2006_v56, %v4042_v9 }
 0x8d2   : > { %v2010_v51 = vmul.f32 0.5, %v2009_v48 }
 0x8d3   : > { %v2033_v14 = vmul.f32 %v2578_v49, %v2027_v31 }
 0x8d4   : > { %v2011_v60 = vsub.f32 1.5, %v2010_v51 }
 0x8d5   : > { %v2703_v15 = vpop.eup %2702  ;;  %v2039_v18 = vadd.f32 %v2579_v11, %v2033_v14 }
 0x8d6   : > { %v2012_v30 = vmul.f32 %v2701_v0, %v2011_v60  ;;  %v2018_v24 = vmul.f32 %v2703_v15, %v1996_v33  ;;  %vm2024_vm1 = vweird.f32 %v2703_v15 }
 0x8d7   : > { %2513 = vmatmul.msk.f32.vlgmr.msra.gmra.mxu3 %vm184_vm3, %v2039_v18  ;;  %vm2025_vm5 = vmor %vm2023_vm4, %vm2024_vm1 }
 0x8d8   : > { %v2016_v13 = vsel %vm2015_vm14, %v2701_v0, %v2012_v30  ;;  %v2019_v10 = vmul.f32 %v2703_v15, %v2018_v24 }
 0x8d9   : > { %v2028_v4 = vmul.f32 %v2016_v13, %v4053_v17  ;;  %v2152_v17 = vld [vmem:[%s4096_s27] sm:$0xff] }
 0x8da   : > { %v2020_v21 = vmul.f32 0.5, %v2019_v10  ;;  %2171 = vmatpush.xpose.msrb.mxu0 %v2152_v17 }
 0x8db   : > { %v2034_v9 = vmul.f32 %v2578_v49, %v2028_v4 }
 0x8dc   : > { %v2021_v54 = vsub.f32 1.5, %v2020_v21 }
 0x8dd   : > { %v2040_v36 = vadd.f32 %v2579_v11, %v2034_v9 }
 0x8de   : > { %v2022_v52 = vmul.f32 %v2703_v15, %v2021_v54 }
 0x8df   : > { %2514 = vmatmul.msk.f32.gmra.mxu3 %vm184_vm3, %v2040_v36 }
 0x8e0   : > { %v2026_v37 = vsel %vm2025_vm5, %v2703_v15, %v2022_v52 }
 0x8e1   : > { %v2029_v32 = vmul.f32 %v2026_v37, %v4064_v26 }
 0x8e3   : > { %v2035_v58 = vmul.f32 %v2578_v49, %v2029_v32 }
 0x8e5   : > { %v2041_v62 = vadd.f32 %v2579_v11, %v2035_v58 }
 0x8e7   : > { %2515 = vmatmul.msk.f32.gmra.mxu3 %vm184_vm3, %v2041_v62 }
 0x95a   : > { %v2139_v20 = vpop.f32.mrf.mxu3 }
 0x95b   : > { %v2140_v40 = vadd.f32 %v2580_v25, %v2139_v20 }
 0x95d   : > { %v2148_v41 = vmax.f32 %v2140_v40, 0.0 }
 0x95f   : > { %2172 = vmatmul.f32.vlgmr.msrb.gmra.mxu0 %v2148_v41 }
 0x962   : > { %v2142_v26 = vpop.f32.mrf.mxu3 }
 0x963   : > { %v2143_v39 = vadd.f32 %v2580_v25, %v2142_v26 }
 0x965   : > { %v2149_v38 = vmax.f32 %v2143_v39, 0.0 }
 0x967   : > { %2175 = vmatmul.f32.gmra.mxu0 %v2149_v38 }
 0x96a   : > { %v2145_v5 = vpop.f32.mrf.mxu3 }
 0x96b   : > { %v2146_v27 = vadd.f32 %v2580_v25, %v2145_v5 }
 0x96d   : > { %v2150_v46 = vmax.f32 %v2146_v27, 0.0 }
 0x96f   : > { %2178 = vmatmul.f32.gmra.mxu0 %v2150_v46 }
 0x9dc   : > { %v2173_v6 = vpop.f32.mrf.mxu0 }
 0x9dd   : > { %v2182_v53 = vadd.f32 %v2173_v6, %v4005_v59  ;;  %v2193_v59 = vld [vmem:[%s4217_s3] sm:$0x3] (%p173_p0) }
 0x9df   : > { %v2190_v63 = vadd.f32 %v2581_v19, %v2182_v53  }
 0x9e4   : > { %v2176_v50 = vpop.f32.mrf.mxu0 }
 0x9e5   : > { %v2183_v8 = vadd.f32 %v2176_v50, %v4010_v42 }
 0x9e7   : > { %v2191_v45 = vadd.f32 %v2581_v19, %v2183_v8  }
 0x9e9   : > { %v4215_v15 = vmov %v2191_v45 }
 0x9ec   : > { %v2179_v1 = vpop.f32.mrf.mxu0 }
 0x9ed   : > { %v2184_v43 = vadd.f32 %v2179_v1, %v4019_v12  ;;  %v4216_v12 = vmov %v2190_v63  ;;  %175 = sbr.rel (!%p173_p0) target bundleno = 164 (0xa4), region = 145 }
 0x9ef   : > { %v2192_v7 = vadd.f32 %v2581_v19, %v2184_v43  }
 0x9f1   : > { %v4214_v18 = vmov %v2192_v7  ;;  %2516 = vmatpush.msk.msra.mxu0 (%p173_p0), %vm344_vm9, %v2192_v7 }
 0x9f3   :  { %2216 = vmatpush.msra.mxu0 %v2191_v45 }
 0x9f5   :  { %2217 = vmatpush.msra.mxu0 %v2190_v63 }
 0x9f6   :  { %2517 = vmatmul.msk.f32.vlgmr.msra.gmra.mxu0 %vm289_vm15, %v2193_v59 }
 0xa73   :  { %v2219_v42 = vpop.f32.mrf.mxu0 }
 0xa74   :  { %v2225_v12 = vsel %vm191_vm2, %v2219_v42, 0.0 }
 0xa75   :  { %2226 = vadd.xlane.f32.xlu0 %v2225_v12 }
 0xae8   :  { %v2227_v22 = vpop.xlane.xlu0 %2226 }
 0xae9   :  { %v2235_v47 = vmul.f32 %v2227_v22, %v2960_v28 }
 0xaeb   :  { %v2236_v16 = vsub.f32 %v2219_v42, %v2235_v47 }
 0xaed   :  { %v2237_v44 = vmul.f32 %v2236_v16, %v2236_v16 }
 0xaef   :  { %v2238_v23 = vsel %vm191_vm2, %v2237_v44, 0.0 }
 0xaf0   :  { %2239 = vadd.xlane.f32.xlu0 %v2238_v23 }
 0xb63   :  { %v2240_v61 = vpop.xlane.xlu0 %2239 }
 0xb64   :  { %v2241_v2 = vmul.f32 %v2240_v61, %v2960_v28  ;;  %v2705_v28 = vld [vmem:[%s4183_s24] ss:$0 sm:$0xff] }
 0xb66   :  { %v2242_v3 = vadd.f32 1e-05, %v2241_v2 }
 0xb68   :  { %2706 = vrsqrt.f32 %v2242_v3  ;;  %vm2249_vm9 = vweird.f32 %v2242_v3 }
 0xb6e   :  { %v2707_v57 = vpop.eup %2706 }
 0xb6f   :  { %v2244_v55 = vmul.f32 %v2707_v57, %v2242_v3  ;;  %vm2250_vm3 = vweird.f32 %v2707_v57 }
 0xb70   :  { %vm2251_vm15 = vmor %vm2249_vm9, %vm2250_vm3 }
 0xb71   :  { %v2245_v0 = vmul.f32 %v2707_v57, %v2244_v55 }
 0xb73   :  { %v2246_v33 = vmul.f32 0.5, %v2245_v0 }
 0xb75   :  { %v2247_v34 = vsub.f32 1.5, %v2246_v33 }
 0xb77   :  { %v2248_v29 = vmul.f32 %v2707_v57, %v2247_v34 }
 0xb79   :  { %v2252_v49 = vsel %vm2251_vm15, %v2707_v57, %v2248_v29 }
 0xb7a   :  { %v2253_v56 = vmul.f32 %v2252_v49, %v2236_v16 }
 0xb7c   :  { %v2257_v48 = vmul.f32 %v2704_v35, %v2253_v56 }
 0xb7e   :  { %v2261_v11 = vadd.f32 %v2705_v28, %v2257_v48 }
 0xb80   :  { %2262 = vst.msk [vmem:[#allocation2] sm:$0x3] %vm191_vm2, %v2261_v11 }
 0xb81   :  { %2273 = dma.vmem_to_hbm [thread:$0]  %s2269_s16, 32, %s2271_s19, [#allocation3]  }
 0xb82   :  { %2748 = dma.done.wait [#allocation3], 32  }
 0xb83   :  { %2749 = vsyncadd [#allocation3], 4294967264 }
 0xb84   :  { %2278 = vsyncpa [#allocation3], 1 }

</bundles_post_ra>
